<compile_context>
chip_gen: v7x
topology: tpu7x:2x2x1
jax: 0.10.0
libtpu: 0.0.40
codegen_flags: <defaults>
</compile_context>

<pallas_src>
import functools
import math

import jax
import jax.numpy as jnp
from jax.experimental import pallas as pl
from jax.experimental.pallas import tpu as pltpu

# Keep reference matmuls and the wrapper-side W2@W3 fold in full f32 so the
# correctness check against the Pallas (f32 MXU) path is tight.
jax.config.update("jax_default_matmul_precision", "highest")

_ROW_TILE_CAP = 256  # rows of the flattened (B*V) axis per grid step (mult. of 8)


def _row_tile(M):
    return M if M <= _ROW_TILE_CAP else _ROW_TILE_CAP


# ----------------------------------------------------------------------------
# Fused per-level Pallas kernels
# ----------------------------------------------------------------------------
def _fused_level_kernel(x_ref, w1_ref, b1_ref, w23t_ref, w23b_ref, b23_ref,
                        rw_ref, rb_ref, out_ref, nxt_ref):
    # x: (TM, P, D) rows of the flattened (B*V) axis, fully VMEM resident.
    TM, P, D = x_ref.shape
    N = w1_ref.shape[1]
    L = P * N

    w1 = w1_ref[...]          # (D, N)   stays resident (constant index_map)
    b1 = b1_ref[...]          # (1, N)
    rw = rw_ref[...]          # (TM, 1)  per-row (= per (b,v)) RevIN affine
    rb = rb_ref[...]          # (TM, 1)

    # --- linear1 per patch; outputs kept in registers/VMEM for the rest -----
    ys = []
    for p in range(P):        # P is small & static -> unrolled
        yp = jnp.dot(x_ref[:, p, :], w1,
                     preferred_element_type=jnp.float32) + b1      # (TM, N)
        out_ref[:, p, :] = yp.astype(out_ref.dtype)                 # level out
        ys.append(yp)

    # --- RevIN 'norm' statistics over the flattened time axis L = P*N -------
    mean = sum(jnp.sum(yp, axis=-1, keepdims=True) for yp in ys) / L
    var = sum(jnp.sum((yp - mean) ** 2, axis=-1, keepdims=True)
              for yp in ys) / L
    inv = jax.lax.rsqrt(var + 1e-5)

    # --- folded linear2 -> pair-merge -> linear3 -----------------------------
    w23t = w23t_ref[...]      # (N, D) = W2 @ W3[:D]
    w23b = w23b_ref[...]      # (N, D) = W2 @ W3[D:]
    b23 = b23_ref[...]        # (1, D)
    for q in range(P // 2):
        xa = ((ys[2 * q] - mean) * inv) * rw + rb
        xb = ((ys[2 * q + 1] - mean) * inv) * rw + rb
        z = (jnp.dot(xa, w23t, preferred_element_type=jnp.float32)
             + jnp.dot(xb, w23b, preferred_element_type=jnp.float32)
             + b23)
        nxt_ref[:, q, :] = z.astype(nxt_ref.dtype)


def _last_level_kernel(x_ref, w1_ref, b1_ref, out_ref):
    TM, P, D = x_ref.shape
    w1 = w1_ref[...]
    b1 = b1_ref[...]
    for p in range(P):
        yp = jnp.dot(x_ref[:, p, :], w1,
                     preferred_element_type=jnp.float32) + b1
        out_ref[:, p, :] = yp.astype(out_ref.dtype)


# ----------------------------------------------------------------------------
# Wrappers
# ----------------------------------------------------------------------------
def fused_encoder_level(x, w1, b1, w23_top, w23_bot, b23, rw_rows, rb_rows):
    """x: (M, P, D). Returns (level_out (M, P, N), next_x (M, P//2, D))."""
    M, P, D = x.shape
    N = w1.shape[1]
    TM = _row_tile(M)
    grid = (pl.cdiv(M, TM),)
    out, nxt = pl.pallas_call(
        _fused_level_kernel,
        out_shape=(jax.ShapeDtypeStruct((M, P, N), x.dtype),
                   jax.ShapeDtypeStruct((M, P // 2, D), x.dtype)),
        grid=grid,
        in_specs=[
            pl.BlockSpec((TM, P, D), lambda i: (i, 0, 0)),
            pl.BlockSpec((D, N), lambda i: (0, 0)),
            pl.BlockSpec((1, N), lambda i: (0, 0)),
            pl.BlockSpec((N, D), lambda i: (0, 0)),
            pl.BlockSpec((N, D), lambda i: (0, 0)),
            pl.BlockSpec((1, D), lambda i: (0, 0)),
            pl.BlockSpec((TM, 1), lambda i: (i, 0)),
            pl.BlockSpec((TM, 1), lambda i: (i, 0)),
        ],
        out_specs=(pl.BlockSpec((TM, P, N), lambda i: (i, 0, 0)),
                   pl.BlockSpec((TM, P // 2, D), lambda i: (i, 0, 0))),
        compiler_params=pltpu.CompilerParams(
            dimension_semantics=("parallel",)),
    )(x, w1, b1.reshape(1, N), w23_top, w23_bot, b23.reshape(1, D),
      rw_rows, rb_rows)
    return out, nxt


def last_encoder_level(x, w1, b1):
    """x: (M, P, D). Returns level_out (M, P, N)."""
    M, P, D = x.shape
    N = w1.shape[1]
    TM = _row_tile(M)
    grid = (pl.cdiv(M, TM),)
    return pl.pallas_call(
        _last_level_kernel,
        out_shape=jax.ShapeDtypeStruct((M, P, N), x.dtype),
        grid=grid,
        in_specs=[
            pl.BlockSpec((TM, P, D), lambda i: (i, 0, 0)),
            pl.BlockSpec((D, N), lambda i: (0, 0)),
            pl.BlockSpec((1, N), lambda i: (0, 0)),
        ],
        out_specs=pl.BlockSpec((TM, P, N), lambda i: (i, 0, 0)),
        compiler_params=pltpu.CompilerParams(
            dimension_semantics=("parallel",)),
    )(x, w1, b1.reshape(1, N))


# ----------------------------------------------------------------------------
# Parameter initialization (deterministic, nn.Linear-style uniform)
# ----------------------------------------------------------------------------
def init_linear(key, in_dim, out_dim):
    k1, k2 = jax.random.split(key)
    lim = 1.0 / math.sqrt(in_dim)
    w = jax.random.uniform(k1, (in_dim, out_dim), jnp.float32, -lim, lim)
    b = jax.random.uniform(k2, (out_dim,), jnp.float32, -lim, lim)
    return w, b


def init_params(key, patch_size, d_model, encoder_num, num_vars):
    keys = jax.random.split(key, 3 * encoder_num + 2)
    w1, b1, w2, b2, w3, b3 = [], [], [], [], [], []
    for i in range(encoder_num):
        w, b = init_linear(keys[i], d_model, patch_size * 2 ** i)
        w1.append(w)
        b1.append(b)
    for i in range(encoder_num - 1):
        w, b = init_linear(keys[encoder_num + i], patch_size * 2 ** i, d_model)
        w2.append(w)
        b2.append(b)
        w, b = init_linear(keys[2 * encoder_num + i], 2 * d_model, d_model)
        w3.append(w)
        b3.append(b)
    # RevIN affine params (num_features = V, since revin sees (B, L, V)).
    # Randomized (instead of ones/zeros) so the affine path is exercised.
    kr1, kr2 = jax.random.split(keys[-1])
    revin_w = 1.0 + 0.1 * jax.random.normal(kr1, (num_vars,), jnp.float32)
    revin_b = 0.1 * jax.random.normal(kr2, (num_vars,), jnp.float32)
    return dict(w1=w1, b1=b1, w2=w2, b2=b2, w3=w3, b3=b3,
                revin_w=revin_w, revin_b=revin_b)


# ----------------------------------------------------------------------------
# Encoder_process.forward
# ----------------------------------------------------------------------------
def encoder_process_forward(x_enc, var_ccc, params, patch_size, d_model,
                            encoder_num):
    # TODO(synk): var_ccc is consumed only by the external encoders1/encoders2
    #             sub-modules (treated as identity here).
    del var_ccc, patch_size
    B, V, P, D = x_enc.shape
    M = B * V
    x = x_enc.reshape(M, P, D)
    # Per-row RevIN affine params: row = b*V + v -> feature v.
    rw_rows = jnp.tile(params["revin_w"], B).reshape(M, 1)
    rb_rows = jnp.tile(params["revin_b"], B).reshape(M, 1)

    outs = []
    for i in range(encoder_num):
        w1, b1 = params["w1"][i], params["b1"][i]
        if i != encoder_num - 1:
            # Algebraic fold of linear2 + pair-merge + linear3.
            w2, b2 = params["w2"][i], params["b2"][i]
            w3, b3 = params["w3"][i], params["b3"][i]
            w3_top, w3_bot = w3[:d_model], w3[d_model:]
            w23_top = w2 @ w3_top                      # (N, D)
            w23_bot = w2 @ w3_bot                      # (N, D)
            b23 = b2 @ (w3_top + w3_bot) + b3          # (D,)
            out3, x = fused_encoder_level(
                x, w1, b1, w23_top, w23_bot, b23, rw_rows, rb_rows)
        else:
            out3 = last_encoder_level(x, w1, b1)
        # nn.Flatten(start_dim=2): (B, V, P, N) -> (B, V, P*N); free reshape.
        outs.append(out3.reshape(B, V, -1))
    return outs


# ----------------------------------------------------------------------------
# Pure-JAX reference (unfused, mirrors the PyTorch module math)
# ----------------------------------------------------------------------------
def reference_forward(x_enc, params, patch_size, d_model, encoder_num):
    outs = []
    for i in range(encoder_num):
        B, V, P, D = x_enc.shape
        x_lin = x_enc @ params["w1"][i] + params["b1"][i]
        x_cur = x_lin.reshape(B, V, P * patch_size * 2 ** i)
        outs.append(x_cur)
        if i != encoder_num - 1:
            mean = jnp.mean(x_cur, axis=-1, keepdims=True)
            var = jnp.mean((x_cur - mean) ** 2, axis=-1, keepdims=True)
            x_cur = (x_cur - mean) / jnp.sqrt(var + 1e-5)
            x_cur = (x_cur * params["revin_w"][None, :, None]
                     + params["revin_b"][None, :, None])
            x_enc = x_cur.reshape(B, V, P, -1) @ params["w2"][i] + params["b2"][i]
            x_enc = x_enc.reshape(B, V, P // 2, 2 * D)
            x_enc = x_enc @ params["w3"][i] + params["b3"][i]
    return outs


if __name__ == "__main__":
    # Small shapes consistent with the module
    B, V = 2, 4
    patch_size = 4
    d_model = 32
    encoder_num = 3
    P = 8                      # divisible by 2**(encoder_num-1)

    key = jax.random.PRNGKey(0)
    k_x, k_c, k_p = jax.random.split(key, 3)
    x_enc = jax.random.normal(k_x, (B, V, P, d_model), jnp.float32)
    var_ccc = jax.random.normal(k_c, (B, encoder_num, V), jnp.float32)

    params = init_params(k_p, patch_size, d_model, encoder_num, V)

    fwd = jax.jit(functools.partial(
        encoder_process_forward, patch_size=patch_size, d_model=d_model,
        encoder_num=encoder_num))
    outs = fwd(x_enc, var_ccc, params)
    outs = [jax.block_until_ready(o) for o in outs]

    refs = reference_forward(x_enc, params, patch_size, d_model, encoder_num)
    for o, r in zip(outs, refs):
        assert o.shape == r.shape
        assert jnp.allclose(o, r, atol=2e-4, rtol=2e-4), "mismatch vs reference"

    print("KERNEL_OK")
</pallas_src>

<mosaic_0001>
module attributes {stable_mosaic.version = 11 : i64} {
  func.func @_fused_level_kernel(%arg0: i32, %arg1: memref<8x8x32xf32, #tpu.memory_space<vmem>>, %arg2: memref<32x4xf32, #tpu.memory_space<vmem>>, %arg3: memref<1x4xf32, #tpu.memory_space<vmem>>, %arg4: memref<4x32xf32, #tpu.memory_space<vmem>>, %arg5: memref<4x32xf32, #tpu.memory_space<vmem>>, %arg6: memref<1x32xf32, #tpu.memory_space<vmem>>, %arg7: memref<8x1xf32, #tpu.memory_space<vmem>>, %arg8: memref<8x1xf32, #tpu.memory_space<vmem>>, %arg9: memref<8x8x4xf32, #tpu.memory_space<vmem>>, %arg10: memref<8x4x32xf32, #tpu.memory_space<vmem>>) attributes {dimension_semantics = [#tpu.dimension_semantics<parallel>], iteration_bounds = array<i64: 1>, scalar_prefetch = 0 : i64, scratch_operands = 0 : i64, tpu.core_type = #tpu.core_type<tc>, window_params = [{transform_indices = @transform_0, window_bounds = array<i64: 8, 8, 32>}, {pipeline_mode = #tpu.pipeline_mode<synchronous>, transform_indices = @transform_1, window_bounds = array<i64: 32, 4>}, {pipeline_mode = #tpu.pipeline_mode<synchronous>, transform_indices = @transform_2, window_bounds = array<i64: 1, 4>}, {pipeline_mode = #tpu.pipeline_mode<synchronous>, transform_indices = @transform_3, window_bounds = array<i64: 4, 32>}, {pipeline_mode = #tpu.pipeline_mode<synchronous>, transform_indices = @transform_4, window_bounds = array<i64: 4, 32>}, {pipeline_mode = #tpu.pipeline_mode<synchronous>, transform_indices = @transform_5, window_bounds = array<i64: 1, 32>}, {transform_indices = @transform_6, window_bounds = array<i64: 8, 1>}, {transform_indices = @transform_7, window_bounds = array<i64: 8, 1>}, {transform_indices = @transform_8, window_bounds = array<i64: 8, 8, 4>}, {transform_indices = @transform_9, window_bounds = array<i64: 8, 4, 32>}]} {
    %c0 = arith.constant 0 : index
    %c0_0 = arith.constant 0 : index
    %0 = vector.load %arg2[%c0, %c0_0] : memref<32x4xf32, #tpu.memory_space<vmem>>, vector<32x4xf32>
    %c0_1 = arith.constant 0 : index
    %c0_2 = arith.constant 0 : index
    %1 = vector.load %arg3[%c0_1, %c0_2] : memref<1x4xf32, #tpu.memory_space<vmem>>, vector<1x4xf32>
    %c0_3 = arith.constant 0 : index
    %c0_4 = arith.constant 0 : index
    %2 = vector.load %arg7[%c0_3, %c0_4] : memref<8x1xf32, #tpu.memory_space<vmem>>, vector<8x1xf32>
    %c0_5 = arith.constant 0 : index
    %c0_6 = arith.constant 0 : index
    %3 = vector.load %arg8[%c0_5, %c0_6] : memref<8x1xf32, #tpu.memory_space<vmem>>, vector<8x1xf32>
    %c0_7 = arith.constant 0 : index
    %c0_8 = arith.constant 0 : index
    %c0_9 = arith.constant 0 : index
    %4 = vector.load %arg1[%c0_7, %c0_8, %c0_9] : memref<8x8x32xf32, #tpu.memory_space<vmem>>, vector<8x1x32xf32>
    %5 = vector.shape_cast %4 : vector<8x1x32xf32> to vector<8x32xf32>
    %cst = arith.constant dense<0.000000e+00> : vector<8x4xf32>
    %6 = tpu.matmul %5, %0, %cst {dimension_numbers = #tpu.dot_dimension_numbers<[1], [0], [0], [1], [0, 0, 1, 1], [], []>, precision = #tpu.contract_precision<fp32>} : vector<8x32xf32>, vector<32x4xf32>, vector<8x4xf32> -> vector<8x4xf32>
    %7 = vector.broadcast %1 : vector<1x4xf32> to vector<8x4xf32>
    %8 = arith.addf %6, %7 : vector<8x4xf32>
    %c0_10 = arith.constant 0 : index
    %c0_11 = arith.constant 0 : index
    %c0_12 = arith.constant 0 : index
    %9 = vector.load %arg9[%c0_10, %c0_11, %c0_12] : memref<8x8x4xf32, #tpu.memory_space<vmem>>, vector<8x1x4xf32>
    %10 = vector.shape_cast %9 : vector<8x1x4xf32> to vector<8x4xf32>
    %11 = vector.shape_cast %8 : vector<8x4xf32> to vector<8x1x4xf32>
    tpu.vector_store %arg9[%c0_10, %c0_11, %c0_12], %11 {strides = array<i32>} : memref<8x8x4xf32, #tpu.memory_space<vmem>>, vector<8x1x4xf32>,
    %c0_13 = arith.constant 0 : index
    %c1 = arith.constant 1 : index
    %c0_14 = arith.constant 0 : index
    %12 = vector.load %arg1[%c0_13, %c1, %c0_14] : memref<8x8x32xf32, #tpu.memory_space<vmem>>, vector<8x1x32xf32>
    %13 = vector.shape_cast %12 : vector<8x1x32xf32> to vector<8x32xf32>
    %cst_15 = arith.constant dense<0.000000e+00> : vector<8x4xf32>
    %14 = tpu.matmul %13, %0, %cst_15 {dimension_numbers = #tpu.dot_dimension_numbers<[1], [0], [0], [1], [0, 0, 1, 1], [], []>, precision = #tpu.contract_precision<fp32>} : vector<8x32xf32>, vector<32x4xf32>, vector<8x4xf32> -> vector<8x4xf32>
    %15 = vector.broadcast %1 : vector<1x4xf32> to vector<8x4xf32>
    %16 = arith.addf %14, %15 : vector<8x4xf32>
    %c0_16 = arith.constant 0 : index
    %c1_17 = arith.constant 1 : index
    %c0_18 = arith.constant 0 : index
    %17 = vector.load %arg9[%c0_16, %c1_17, %c0_18] : memref<8x8x4xf32, #tpu.memory_space<vmem>>, vector<8x1x4xf32>
    %18 = vector.shape_cast %17 : vector<8x1x4xf32> to vector<8x4xf32>
    %19 = vector.shape_cast %16 : vector<8x4xf32> to vector<8x1x4xf32>
    tpu.vector_store %arg9[%c0_16, %c1_17, %c0_18], %19 {strides = array<i32>} : memref<8x8x4xf32, #tpu.memory_space<vmem>>, vector<8x1x4xf32>,
    %c0_19 = arith.constant 0 : index
    %c2 = arith.constant 2 : index
    %c0_20 = arith.constant 0 : index
    %20 = vector.load %arg1[%c0_19, %c2, %c0_20] : memref<8x8x32xf32, #tpu.memory_space<vmem>>, vector<8x1x32xf32>
    %21 = vector.shape_cast %20 : vector<8x1x32xf32> to vector<8x32xf32>
    %cst_21 = arith.constant dense<0.000000e+00> : vector<8x4xf32>
    %22 = tpu.matmul %21, %0, %cst_21 {dimension_numbers = #tpu.dot_dimension_numbers<[1], [0], [0], [1], [0, 0, 1, 1], [], []>, precision = #tpu.contract_precision<fp32>} : vector<8x32xf32>, vector<32x4xf32>, vector<8x4xf32> -> vector<8x4xf32>
    %23 = vector.broadcast %1 : vector<1x4xf32> to vector<8x4xf32>
    %24 = arith.addf %22, %23 : vector<8x4xf32>
    %c0_22 = arith.constant 0 : index
    %c2_23 = arith.constant 2 : index
    %c0_24 = arith.constant 0 : index
    %25 = vector.load %arg9[%c0_22, %c2_23, %c0_24] : memref<8x8x4xf32, #tpu.memory_space<vmem>>, vector<8x1x4xf32>
    %26 = vector.shape_cast %25 : vector<8x1x4xf32> to vector<8x4xf32>
    %27 = vector.shape_cast %24 : vector<8x4xf32> to vector<8x1x4xf32>
    tpu.vector_store %arg9[%c0_22, %c2_23, %c0_24], %27 {strides = array<i32>} : memref<8x8x4xf32, #tpu.memory_space<vmem>>, vector<8x1x4xf32>,
    %c0_25 = arith.constant 0 : index
    %c3 = arith.constant 3 : index
    %c0_26 = arith.constant 0 : index
    %28 = vector.load %arg1[%c0_25, %c3, %c0_26] : memref<8x8x32xf32, #tpu.memory_space<vmem>>, vector<8x1x32xf32>
    %29 = vector.shape_cast %28 : vector<8x1x32xf32> to vector<8x32xf32>
    %cst_27 = arith.constant dense<0.000000e+00> : vector<8x4xf32>
    %30 = tpu.matmul %29, %0, %cst_27 {dimension_numbers = #tpu.dot_dimension_numbers<[1], [0], [0], [1], [0, 0, 1, 1], [], []>, precision = #tpu.contract_precision<fp32>} : vector<8x32xf32>, vector<32x4xf32>, vector<8x4xf32> -> vector<8x4xf32>
    %31 = vector.broadcast %1 : vector<1x4xf32> to vector<8x4xf32>
    %32 = arith.addf %30, %31 : vector<8x4xf32>
    %c0_28 = arith.constant 0 : index
    %c3_29 = arith.constant 3 : index
    %c0_30 = arith.constant 0 : index
    %33 = vector.load %arg9[%c0_28, %c3_29, %c0_30] : memref<8x8x4xf32, #tpu.memory_space<vmem>>, vector<8x1x4xf32>
    %34 = vector.shape_cast %33 : vector<8x1x4xf32> to vector<8x4xf32>
    %35 = vector.shape_cast %32 : vector<8x4xf32> to vector<8x1x4xf32>
    tpu.vector_store %arg9[%c0_28, %c3_29, %c0_30], %35 {strides = array<i32>} : memref<8x8x4xf32, #tpu.memory_space<vmem>>, vector<8x1x4xf32>,
    %c0_31 = arith.constant 0 : index
    %c4 = arith.constant 4 : index
    %c0_32 = arith.constant 0 : index
    %36 = vector.load %arg1[%c0_31, %c4, %c0_32] : memref<8x8x32xf32, #tpu.memory_space<vmem>>, vector<8x1x32xf32>
    %37 = vector.shape_cast %36 : vector<8x1x32xf32> to vector<8x32xf32>
    %cst_33 = arith.constant dense<0.000000e+00> : vector<8x4xf32>
    %38 = tpu.matmul %37, %0, %cst_33 {dimension_numbers = #tpu.dot_dimension_numbers<[1], [0], [0], [1], [0, 0, 1, 1], [], []>, precision = #tpu.contract_precision<fp32>} : vector<8x32xf32>, vector<32x4xf32>, vector<8x4xf32> -> vector<8x4xf32>
    %39 = vector.broadcast %1 : vector<1x4xf32> to vector<8x4xf32>
    %40 = arith.addf %38, %39 : vector<8x4xf32>
    %c0_34 = arith.constant 0 : index
    %c4_35 = arith.constant 4 : index
    %c0_36 = arith.constant 0 : index
    %41 = vector.load %arg9[%c0_34, %c4_35, %c0_36] : memref<8x8x4xf32, #tpu.memory_space<vmem>>, vector<8x1x4xf32>
    %42 = vector.shape_cast %41 : vector<8x1x4xf32> to vector<8x4xf32>
    %43 = vector.shape_cast %40 : vector<8x4xf32> to vector<8x1x4xf32>
    tpu.vector_store %arg9[%c0_34, %c4_35, %c0_36], %43 {strides = array<i32>} : memref<8x8x4xf32, #tpu.memory_space<vmem>>, vector<8x1x4xf32>,
    %c0_37 = arith.constant 0 : index
    %c5 = arith.constant 5 : index
    %c0_38 = arith.constant 0 : index
    %44 = vector.load %arg1[%c0_37, %c5, %c0_38] : memref<8x8x32xf32, #tpu.memory_space<vmem>>, vector<8x1x32xf32>
    %45 = vector.shape_cast %44 : vector<8x1x32xf32> to vector<8x32xf32>
    %cst_39 = arith.constant dense<0.000000e+00> : vector<8x4xf32>
    %46 = tpu.matmul %45, %0, %cst_39 {dimension_numbers = #tpu.dot_dimension_numbers<[1], [0], [0], [1], [0, 0, 1, 1], [], []>, precision = #tpu.contract_precision<fp32>} : vector<8x32xf32>, vector<32x4xf32>, vector<8x4xf32> -> vector<8x4xf32>
    %47 = vector.broadcast %1 : vector<1x4xf32> to vector<8x4xf32>
    %48 = arith.addf %46, %47 : vector<8x4xf32>
    %c0_40 = arith.constant 0 : index
    %c5_41 = arith.constant 5 : index
    %c0_42 = arith.constant 0 : index
    %49 = vector.load %arg9[%c0_40, %c5_41, %c0_42] : memref<8x8x4xf32, #tpu.memory_space<vmem>>, vector<8x1x4xf32>
    %50 = vector.shape_cast %49 : vector<8x1x4xf32> to vector<8x4xf32>
    %51 = vector.shape_cast %48 : vector<8x4xf32> to vector<8x1x4xf32>
    tpu.vector_store %arg9[%c0_40, %c5_41, %c0_42], %51 {strides = array<i32>} : memref<8x8x4xf32, #tpu.memory_space<vmem>>, vector<8x1x4xf32>,
    %c0_43 = arith.constant 0 : index
    %c6 = arith.constant 6 : index
    %c0_44 = arith.constant 0 : index
    %52 = vector.load %arg1[%c0_43, %c6, %c0_44] : memref<8x8x32xf32, #tpu.memory_space<vmem>>, vector<8x1x32xf32>
    %53 = vector.shape_cast %52 : vector<8x1x32xf32> to vector<8x32xf32>
    %cst_45 = arith.constant dense<0.000000e+00> : vector<8x4xf32>
    %54 = tpu.matmul %53, %0, %cst_45 {dimension_numbers = #tpu.dot_dimension_numbers<[1], [0], [0], [1], [0, 0, 1, 1], [], []>, precision = #tpu.contract_precision<fp32>} : vector<8x32xf32>, vector<32x4xf32>, vector<8x4xf32> -> vector<8x4xf32>
    %55 = vector.broadcast %1 : vector<1x4xf32> to vector<8x4xf32>
    %56 = arith.addf %54, %55 : vector<8x4xf32>
    %c0_46 = arith.constant 0 : index
    %c6_47 = arith.constant 6 : index
    %c0_48 = arith.constant 0 : index
    %57 = vector.load %arg9[%c0_46, %c6_47, %c0_48] : memref<8x8x4xf32, #tpu.memory_space<vmem>>, vector<8x1x4xf32>
    %58 = vector.shape_cast %57 : vector<8x1x4xf32> to vector<8x4xf32>
    %59 = vector.shape_cast %56 : vector<8x4xf32> to vector<8x1x4xf32>
    tpu.vector_store %arg9[%c0_46, %c6_47, %c0_48], %59 {strides = array<i32>} : memref<8x8x4xf32, #tpu.memory_space<vmem>>, vector<8x1x4xf32>,
    %c0_49 = arith.constant 0 : index
    %c7 = arith.constant 7 : index
    %c0_50 = arith.constant 0 : index
    %60 = vector.load %arg1[%c0_49, %c7, %c0_50] : memref<8x8x32xf32, #tpu.memory_space<vmem>>, vector<8x1x32xf32>
    %61 = vector.shape_cast %60 : vector<8x1x32xf32> to vector<8x32xf32>
    %cst_51 = arith.constant dense<0.000000e+00> : vector<8x4xf32>
    %62 = tpu.matmul %61, %0, %cst_51 {dimension_numbers = #tpu.dot_dimension_numbers<[1], [0], [0], [1], [0, 0, 1, 1], [], []>, precision = #tpu.contract_precision<fp32>} : vector<8x32xf32>, vector<32x4xf32>, vector<8x4xf32> -> vector<8x4xf32>
    %63 = vector.broadcast %1 : vector<1x4xf32> to vector<8x4xf32>
    %64 = arith.addf %62, %63 : vector<8x4xf32>
    %c0_52 = arith.constant 0 : index
    %c7_53 = arith.constant 7 : index
    %c0_54 = arith.constant 0 : index
    %65 = vector.load %arg9[%c0_52, %c7_53, %c0_54] : memref<8x8x4xf32, #tpu.memory_space<vmem>>, vector<8x1x4xf32>
    %66 = vector.shape_cast %65 : vector<8x1x4xf32> to vector<8x4xf32>
    %67 = vector.shape_cast %64 : vector<8x4xf32> to vector<8x1x4xf32>
    tpu.vector_store %arg9[%c0_52, %c7_53, %c0_54], %67 {strides = array<i32>} : memref<8x8x4xf32, #tpu.memory_space<vmem>>, vector<8x1x4xf32>,
    %cst_55 = arith.constant dense<0.000000e+00> : vector<8xf32>
    %68 = vector.multi_reduction <add>, %8, %cst_55 [1] : vector<8x4xf32> to vector<8xf32>
    %69 = vector.shape_cast %68 : vector<8xf32> to vector<8x1xf32>
    %cst_56 = arith.constant 0.000000e+00 : f32
    %70 = vector.broadcast %cst_56 : f32 to vector<8x1xf32>
    %71 = arith.addf %70, %69 : vector<8x1xf32>
    %cst_57 = arith.constant dense<0.000000e+00> : vector<8xf32>
    %72 = vector.multi_reduction <add>, %16, %cst_57 [1] : vector<8x4xf32> to vector<8xf32>
    %73 = vector.shape_cast %72 : vector<8xf32> to vector<8x1xf32>
    %74 = arith.addf %71, %73 : vector<8x1xf32>
    %cst_58 = arith.constant dense<0.000000e+00> : vector<8xf32>
    %75 = vector.multi_reduction <add>, %24, %cst_58 [1] : vector<8x4xf32> to vector<8xf32>
    %76 = vector.shape_cast %75 : vector<8xf32> to vector<8x1xf32>
    %77 = arith.addf %74, %76 : vector<8x1xf32>
    %cst_59 = arith.constant dense<0.000000e+00> : vector<8xf32>
    %78 = vector.multi_reduction <add>, %32, %cst_59 [1] : vector<8x4xf32> to vector<8xf32>
    %79 = vector.shape_cast %78 : vector<8xf32> to vector<8x1xf32>
    %80 = arith.addf %77, %79 : vector<8x1xf32>
    %cst_60 = arith.constant dense<0.000000e+00> : vector<8xf32>
    %81 = vector.multi_reduction <add>, %40, %cst_60 [1] : vector<8x4xf32> to vector<8xf32>
    %82 = vector.shape_cast %81 : vector<8xf32> to vector<8x1xf32>
    %83 = arith.addf %80, %82 : vector<8x1xf32>
    %cst_61 = arith.constant dense<0.000000e+00> : vector<8xf32>
    %84 = vector.multi_reduction <add>, %48, %cst_61 [1] : vector<8x4xf32> to vector<8xf32>
    %85 = vector.shape_cast %84 : vector<8xf32> to vector<8x1xf32>
    %86 = arith.addf %83, %85 : vector<8x1xf32>
    %cst_62 = arith.constant dense<0.000000e+00> : vector<8xf32>
    %87 = vector.multi_reduction <add>, %56, %cst_62 [1] : vector<8x4xf32> to vector<8xf32>
    %88 = vector.shape_cast %87 : vector<8xf32> to vector<8x1xf32>
    %89 = arith.addf %86, %88 : vector<8x1xf32>
    %cst_63 = arith.constant dense<0.000000e+00> : vector<8xf32>
    %90 = vector.multi_reduction <add>, %64, %cst_63 [1] : vector<8x4xf32> to vector<8xf32>
    %91 = vector.shape_cast %90 : vector<8xf32> to vector<8x1xf32>
    %92 = arith.addf %89, %91 : vector<8x1xf32>
    %cst_64 = arith.constant 3.200000e+01 : f32
    %93 = vector.broadcast %cst_64 : f32 to vector<8x1xf32>
    %94 = arith.divf %92, %93 : vector<8x1xf32>
    %95 = vector.broadcast %94 : vector<8x1xf32> to vector<8x4xf32>
    %96 = arith.subf %8, %95 : vector<8x4xf32>
    %97 = arith.mulf %96, %96 : vector<8x4xf32>
    %cst_65 = arith.constant dense<0.000000e+00> : vector<8xf32>
    %98 = vector.multi_reduction <add>, %97, %cst_65 [1] : vector<8x4xf32> to vector<8xf32>
    %99 = vector.shape_cast %98 : vector<8xf32> to vector<8x1xf32>
    %cst_66 = arith.constant 0.000000e+00 : f32
    %100 = vector.broadcast %cst_66 : f32 to vector<8x1xf32>
    %101 = arith.addf %100, %99 : vector<8x1xf32>
    %102 = vector.broadcast %94 : vector<8x1xf32> to vector<8x4xf32>
    %103 = arith.subf %16, %102 : vector<8x4xf32>
    %104 = arith.mulf %103, %103 : vector<8x4xf32>
    %cst_67 = arith.constant dense<0.000000e+00> : vector<8xf32>
    %105 = vector.multi_reduction <add>, %104, %cst_67 [1] : vector<8x4xf32> to vector<8xf32>
    %106 = vector.shape_cast %105 : vector<8xf32> to vector<8x1xf32>
    %107 = arith.addf %101, %106 : vector<8x1xf32>
    %108 = vector.broadcast %94 : vector<8x1xf32> to vector<8x4xf32>
    %109 = arith.subf %24, %108 : vector<8x4xf32>
    %110 = arith.mulf %109, %109 : vector<8x4xf32>
    %cst_68 = arith.constant dense<0.000000e+00> : vector<8xf32>
    %111 = vector.multi_reduction <add>, %110, %cst_68 [1] : vector<8x4xf32> to vector<8xf32>
    %112 = vector.shape_cast %111 : vector<8xf32> to vector<8x1xf32>
    %113 = arith.addf %107, %112 : vector<8x1xf32>
    %114 = vector.broadcast %94 : vector<8x1xf32> to vector<8x4xf32>
    %115 = arith.subf %32, %114 : vector<8x4xf32>
    %116 = arith.mulf %115, %115 : vector<8x4xf32>
    %cst_69 = arith.constant dense<0.000000e+00> : vector<8xf32>
    %117 = vector.multi_reduction <add>, %116, %cst_69 [1] : vector<8x4xf32> to vector<8xf32>
    %118 = vector.shape_cast %117 : vector<8xf32> to vector<8x1xf32>
    %119 = arith.addf %113, %118 : vector<8x1xf32>
    %120 = vector.broadcast %94 : vector<8x1xf32> to vector<8x4xf32>
    %121 = arith.subf %40, %120 : vector<8x4xf32>
    %122 = arith.mulf %121, %121 : vector<8x4xf32>
    %cst_70 = arith.constant dense<0.000000e+00> : vector<8xf32>
    %123 = vector.multi_reduction <add>, %122, %cst_70 [1] : vector<8x4xf32> to vector<8xf32>
    %124 = vector.shape_cast %123 : vector<8xf32> to vector<8x1xf32>
    %125 = arith.addf %119, %124 : vector<8x1xf32>
    %126 = vector.broadcast %94 : vector<8x1xf32> to vector<8x4xf32>
    %127 = arith.subf %48, %126 : vector<8x4xf32>
    %128 = arith.mulf %127, %127 : vector<8x4xf32>
    %cst_71 = arith.constant dense<0.000000e+00> : vector<8xf32>
    %129 = vector.multi_reduction <add>, %128, %cst_71 [1] : vector<8x4xf32> to vector<8xf32>
    %130 = vector.shape_cast %129 : vector<8xf32> to vector<8x1xf32>
    %131 = arith.addf %125, %130 : vector<8x1xf32>
    %132 = vector.broadcast %94 : vector<8x1xf32> to vector<8x4xf32>
    %133 = arith.subf %56, %132 : vector<8x4xf32>
    %134 = arith.mulf %133, %133 : vector<8x4xf32>
    %cst_72 = arith.constant dense<0.000000e+00> : vector<8xf32>
    %135 = vector.multi_reduction <add>, %134, %cst_72 [1] : vector<8x4xf32> to vector<8xf32>
    %136 = vector.shape_cast %135 : vector<8xf32> to vector<8x1xf32>
    %137 = arith.addf %131, %136 : vector<8x1xf32>
    %138 = vector.broadcast %94 : vector<8x1xf32> to vector<8x4xf32>
    %139 = arith.subf %64, %138 : vector<8x4xf32>
    %140 = arith.mulf %139, %139 : vector<8x4xf32>
    %cst_73 = arith.constant dense<0.000000e+00> : vector<8xf32>
    %141 = vector.multi_reduction <add>, %140, %cst_73 [1] : vector<8x4xf32> to vector<8xf32>
    %142 = vector.shape_cast %141 : vector<8xf32> to vector<8x1xf32>
    %143 = arith.addf %137, %142 : vector<8x1xf32>
    %cst_74 = arith.constant 3.200000e+01 : f32
    %144 = vector.broadcast %cst_74 : f32 to vector<8x1xf32>
    %145 = arith.divf %143, %144 : vector<8x1xf32>
    %cst_75 = arith.constant 9.99999974E-6 : f32
    %146 = vector.broadcast %cst_75 : f32 to vector<8x1xf32>
    %147 = arith.addf %145, %146 : vector<8x1xf32>
    %148 = math.rsqrt %147 : vector<8x1xf32>
    %c0_76 = arith.constant 0 : index
    %c0_77 = arith.constant 0 : index
    %149 = vector.load %arg4[%c0_76, %c0_77] : memref<4x32xf32, #tpu.memory_space<vmem>>, vector<4x32xf32>
    %c0_78 = arith.constant 0 : index
    %c0_79 = arith.constant 0 : index
    %150 = vector.load %arg5[%c0_78, %c0_79] : memref<4x32xf32, #tpu.memory_space<vmem>>, vector<4x32xf32>
    %c0_80 = arith.constant 0 : index
    %c0_81 = arith.constant 0 : index
    %151 = vector.load %arg6[%c0_80, %c0_81] : memref<1x32xf32, #tpu.memory_space<vmem>>, vector<1x32xf32>
    %152 = vector.broadcast %94 : vector<8x1xf32> to vector<8x4xf32>
    %153 = arith.subf %8, %152 : vector<8x4xf32>
    %154 = vector.broadcast %148 : vector<8x1xf32> to vector<8x4xf32>
    %155 = arith.mulf %153, %154 : vector<8x4xf32>
    %156 = vector.broadcast %2 : vector<8x1xf32> to vector<8x4xf32>
    %157 = arith.mulf %155, %156 : vector<8x4xf32>
    %158 = vector.broadcast %3 : vector<8x1xf32> to vector<8x4xf32>
    %159 = arith.addf %157, %158 : vector<8x4xf32>
    %160 = vector.broadcast %94 : vector<8x1xf32> to vector<8x4xf32>
    %161 = arith.subf %16, %160 : vector<8x4xf32>
    %162 = vector.broadcast %148 : vector<8x1xf32> to vector<8x4xf32>
    %163 = arith.mulf %161, %162 : vector<8x4xf32>
    %164 = vector.broadcast %2 : vector<8x1xf32> to vector<8x4xf32>
    %165 = arith.mulf %163, %164 : vector<8x4xf32>
    %166 = vector.broadcast %3 : vector<8x1xf32> to vector<8x4xf32>
    %167 = arith.addf %165, %166 : vector<8x4xf32>
    %cst_82 = arith.constant dense<0.000000e+00> : vector<8x32xf32>
    %168 = tpu.matmul %159, %149, %cst_82 {dimension_numbers = #tpu.dot_dimension_numbers<[1], [0], [0], [1], [0, 0, 1, 1], [], []>, precision = #tpu.contract_precision<fp32>} : vector<8x4xf32>, vector<4x32xf32>, vector<8x32xf32> -> vector<8x32xf32>
    %cst_83 = arith.constant dense<0.000000e+00> : vector<8x32xf32>
    %169 = tpu.matmul %167, %150, %cst_83 {dimension_numbers = #tpu.dot_dimension_numbers<[1], [0], [0], [1], [0, 0, 1, 1], [], []>, precision = #tpu.contract_precision<fp32>} : vector<8x4xf32>, vector<4x32xf32>, vector<8x32xf32> -> vector<8x32xf32>
    %170 = arith.addf %168, %169 : vector<8x32xf32>
    %171 = vector.broadcast %151 : vector<1x32xf32> to vector<8x32xf32>
    %172 = arith.addf %170, %171 : vector<8x32xf32>
    %c0_84 = arith.constant 0 : index
    %c0_85 = arith.constant 0 : index
    %c0_86 = arith.constant 0 : index
    %173 = vector.load %arg10[%c0_84, %c0_85, %c0_86] : memref<8x4x32xf32, #tpu.memory_space<vmem>>, vector<8x1x32xf32>
    %174 = vector.shape_cast %173 : vector<8x1x32xf32> to vector<8x32xf32>
    %175 = vector.shape_cast %172 : vector<8x32xf32> to vector<8x1x32xf32>
    tpu.vector_store %arg10[%c0_84, %c0_85, %c0_86], %175 {strides = array<i32>} : memref<8x4x32xf32, #tpu.memory_space<vmem>>, vector<8x1x32xf32>,
    %176 = vector.broadcast %94 : vector<8x1xf32> to vector<8x4xf32>
    %177 = arith.subf %24, %176 : vector<8x4xf32>
    %178 = vector.broadcast %148 : vector<8x1xf32> to vector<8x4xf32>
    %179 = arith.mulf %177, %178 : vector<8x4xf32>
    %180 = vector.broadcast %2 : vector<8x1xf32> to vector<8x4xf32>
    %181 = arith.mulf %179, %180 : vector<8x4xf32>
    %182 = vector.broadcast %3 : vector<8x1xf32> to vector<8x4xf32>
    %183 = arith.addf %181, %182 : vector<8x4xf32>
    %184 = vector.broadcast %94 : vector<8x1xf32> to vector<8x4xf32>
    %185 = arith.subf %32, %184 : vector<8x4xf32>
    %186 = vector.broadcast %148 : vector<8x1xf32> to vector<8x4xf32>
    %187 = arith.mulf %185, %186 : vector<8x4xf32>
    %188 = vector.broadcast %2 : vector<8x1xf32> to vector<8x4xf32>
    %189 = arith.mulf %187, %188 : vector<8x4xf32>
    %190 = vector.broadcast %3 : vector<8x1xf32> to vector<8x4xf32>
    %191 = arith.addf %189, %190 : vector<8x4xf32>
    %cst_87 = arith.constant dense<0.000000e+00> : vector<8x32xf32>
    %192 = tpu.matmul %183, %149, %cst_87 {dimension_numbers = #tpu.dot_dimension_numbers<[1], [0], [0], [1], [0, 0, 1, 1], [], []>, precision = #tpu.contract_precision<fp32>} : vector<8x4xf32>, vector<4x32xf32>, vector<8x32xf32> -> vector<8x32xf32>
    %cst_88 = arith.constant dense<0.000000e+00> : vector<8x32xf32>
    %193 = tpu.matmul %191, %150, %cst_88 {dimension_numbers = #tpu.dot_dimension_numbers<[1], [0], [0], [1], [0, 0, 1, 1], [], []>, precision = #tpu.contract_precision<fp32>} : vector<8x4xf32>, vector<4x32xf32>, vector<8x32xf32> -> vector<8x32xf32>
    %194 = arith.addf %192, %193 : vector<8x32xf32>
    %195 = vector.broadcast %151 : vector<1x32xf32> to vector<8x32xf32>
    %196 = arith.addf %194, %195 : vector<8x32xf32>
    %c0_89 = arith.constant 0 : index
    %c1_90 = arith.constant 1 : index
    %c0_91 = arith.constant 0 : index
    %197 = vector.load %arg10[%c0_89, %c1_90, %c0_91] : memref<8x4x32xf32, #tpu.memory_space<vmem>>, vector<8x1x32xf32>
    %198 = vector.shape_cast %197 : vector<8x1x32xf32> to vector<8x32xf32>
    %199 = vector.shape_cast %196 : vector<8x32xf32> to vector<8x1x32xf32>
    tpu.vector_store %arg10[%c0_89, %c1_90, %c0_91], %199 {strides = array<i32>} : memref<8x4x32xf32, #tpu.memory_space<vmem>>, vector<8x1x32xf32>,
    %200 = vector.broadcast %94 : vector<8x1xf32> to vector<8x4xf32>
    %201 = arith.subf %40, %200 : vector<8x4xf32>
    %202 = vector.broadcast %148 : vector<8x1xf32> to vector<8x4xf32>
    %203 = arith.mulf %201, %202 : vector<8x4xf32>
    %204 = vector.broadcast %2 : vector<8x1xf32> to vector<8x4xf32>
    %205 = arith.mulf %203, %204 : vector<8x4xf32>
    %206 = vector.broadcast %3 : vector<8x1xf32> to vector<8x4xf32>
    %207 = arith.addf %205, %206 : vector<8x4xf32>
    %208 = vector.broadcast %94 : vector<8x1xf32> to vector<8x4xf32>
    %209 = arith.subf %48, %208 : vector<8x4xf32>
    %210 = vector.broadcast %148 : vector<8x1xf32> to vector<8x4xf32>
    %211 = arith.mulf %209, %210 : vector<8x4xf32>
    %212 = vector.broadcast %2 : vector<8x1xf32> to vector<8x4xf32>
    %213 = arith.mulf %211, %212 : vector<8x4xf32>
    %214 = vector.broadcast %3 : vector<8x1xf32> to vector<8x4xf32>
    %215 = arith.addf %213, %214 : vector<8x4xf32>
    %cst_92 = arith.constant dense<0.000000e+00> : vector<8x32xf32>
    %216 = tpu.matmul %207, %149, %cst_92 {dimension_numbers = #tpu.dot_dimension_numbers<[1], [0], [0], [1], [0, 0, 1, 1], [], []>, precision = #tpu.contract_precision<fp32>} : vector<8x4xf32>, vector<4x32xf32>, vector<8x32xf32> -> vector<8x32xf32>
    %cst_93 = arith.constant dense<0.000000e+00> : vector<8x32xf32>
    %217 = tpu.matmul %215, %150, %cst_93 {dimension_numbers = #tpu.dot_dimension_numbers<[1], [0], [0], [1], [0, 0, 1, 1], [], []>, precision = #tpu.contract_precision<fp32>} : vector<8x4xf32>, vector<4x32xf32>, vector<8x32xf32> -> vector<8x32xf32>
    %218 = arith.addf %216, %217 : vector<8x32xf32>
    %219 = vector.broadcast %151 : vector<1x32xf32> to vector<8x32xf32>
    %220 = arith.addf %218, %219 : vector<8x32xf32>
    %c0_94 = arith.constant 0 : index
    %c2_95 = arith.constant 2 : index
    %c0_96 = arith.constant 0 : index
    %221 = vector.load %arg10[%c0_94, %c2_95, %c0_96] : memref<8x4x32xf32, #tpu.memory_space<vmem>>, vector<8x1x32xf32>
    %222 = vector.shape_cast %221 : vector<8x1x32xf32> to vector<8x32xf32>
    %223 = vector.shape_cast %220 : vector<8x32xf32> to vector<8x1x32xf32>
    tpu.vector_store %arg10[%c0_94, %c2_95, %c0_96], %223 {strides = array<i32>} : memref<8x4x32xf32, #tpu.memory_space<vmem>>, vector<8x1x32xf32>,
    %224 = vector.broadcast %94 : vector<8x1xf32> to vector<8x4xf32>
    %225 = arith.subf %56, %224 : vector<8x4xf32>
    %226 = vector.broadcast %148 : vector<8x1xf32> to vector<8x4xf32>
    %227 = arith.mulf %225, %226 : vector<8x4xf32>
    %228 = vector.broadcast %2 : vector<8x1xf32> to vector<8x4xf32>
    %229 = arith.mulf %227, %228 : vector<8x4xf32>
    %230 = vector.broadcast %3 : vector<8x1xf32> to vector<8x4xf32>
    %231 = arith.addf %229, %230 : vector<8x4xf32>
    %232 = vector.broadcast %94 : vector<8x1xf32> to vector<8x4xf32>
    %233 = arith.subf %64, %232 : vector<8x4xf32>
    %234 = vector.broadcast %148 : vector<8x1xf32> to vector<8x4xf32>
    %235 = arith.mulf %233, %234 : vector<8x4xf32>
    %236 = vector.broadcast %2 : vector<8x1xf32> to vector<8x4xf32>
    %237 = arith.mulf %235, %236 : vector<8x4xf32>
    %238 = vector.broadcast %3 : vector<8x1xf32> to vector<8x4xf32>
    %239 = arith.addf %237, %238 : vector<8x4xf32>
    %cst_97 = arith.constant dense<0.000000e+00> : vector<8x32xf32>
    %240 = tpu.matmul %231, %149, %cst_97 {dimension_numbers = #tpu.dot_dimension_numbers<[1], [0], [0], [1], [0, 0, 1, 1], [], []>, precision = #tpu.contract_precision<fp32>} : vector<8x4xf32>, vector<4x32xf32>, vector<8x32xf32> -> vector<8x32xf32>
    %cst_98 = arith.constant dense<0.000000e+00> : vector<8x32xf32>
    %241 = tpu.matmul %239, %150, %cst_98 {dimension_numbers = #tpu.dot_dimension_numbers<[1], [0], [0], [1], [0, 0, 1, 1], [], []>, precision = #tpu.contract_precision<fp32>} : vector<8x4xf32>, vector<4x32xf32>, vector<8x32xf32> -> vector<8x32xf32>
    %242 = arith.addf %240, %241 : vector<8x32xf32>
    %243 = vector.broadcast %151 : vector<1x32xf32> to vector<8x32xf32>
    %244 = arith.addf %242, %243 : vector<8x32xf32>
    %c0_99 = arith.constant 0 : index
    %c3_100 = arith.constant 3 : index
    %c0_101 = arith.constant 0 : index
    %245 = vector.load %arg10[%c0_99, %c3_100, %c0_101] : memref<8x4x32xf32, #tpu.memory_space<vmem>>, vector<8x1x32xf32>
    %246 = vector.shape_cast %245 : vector<8x1x32xf32> to vector<8x32xf32>
    %247 = vector.shape_cast %244 : vector<8x32xf32> to vector<8x1x32xf32>
    tpu.vector_store %arg10[%c0_99, %c3_100, %c0_101], %247 {strides = array<i32>} : memref<8x4x32xf32, #tpu.memory_space<vmem>>, vector<8x1x32xf32>,
    return
  }
  func.func @transform_0(%arg0: i32) -> (i32, i32, i32) {
    %c0_i32 = arith.constant 0 : i32
    %c0_i32_0 = arith.constant 0 : i32
    %c0_i32_1 = arith.constant 0 : i32
    return %arg0, %c0_i32, %c0_i32_0 : i32, i32, i32
  }
  func.func @transform_1(%arg0: i32) -> (i32, i32) {
    %c0_i32 = arith.constant 0 : i32
    %c0_i32_0 = arith.constant 0 : i32
    %c0_i32_1 = arith.constant 0 : i32
    return %c0_i32, %c0_i32_0 : i32, i32
  }
  func.func @transform_2(%arg0: i32) -> (i32, i32) {
    %c0_i32 = arith.constant 0 : i32
    %c0_i32_0 = arith.constant 0 : i32
    %c0_i32_1 = arith.constant 0 : i32
    return %c0_i32, %c0_i32_0 : i32, i32
  }
  func.func @transform_3(%arg0: i32) -> (i32, i32) {
    %c0_i32 = arith.constant 0 : i32
    %c0_i32_0 = arith.constant 0 : i32
    %c0_i32_1 = arith.constant 0 : i32
    return %c0_i32, %c0_i32_0 : i32, i32
  }
  func.func @transform_4(%arg0: i32) -> (i32, i32) {
    %c0_i32 = arith.constant 0 : i32
    %c0_i32_0 = arith.constant 0 : i32
    %c0_i32_1 = arith.constant 0 : i32
    return %c0_i32, %c0_i32_0 : i32, i32
  }
  func.func @transform_5(%arg0: i32) -> (i32, i32) {
    %c0_i32 = arith.constant 0 : i32
    %c0_i32_0 = arith.constant 0 : i32
    %c0_i32_1 = arith.constant 0 : i32
    return %c0_i32, %c0_i32_0 : i32, i32
  }
  func.func @transform_6(%arg0: i32) -> (i32, i32) {
    %c0_i32 = arith.constant 0 : i32
    %c0_i32_0 = arith.constant 0 : i32
    return %arg0, %c0_i32 : i32, i32
  }
  func.func @transform_7(%arg0: i32) -> (i32, i32) {
    %c0_i32 = arith.constant 0 : i32
    %c0_i32_0 = arith.constant 0 : i32
    return %arg0, %c0_i32 : i32, i32
  }
  func.func @transform_8(%arg0: i32) -> (i32, i32, i32) {
    %c0_i32 = arith.constant 0 : i32
    %c0_i32_0 = arith.constant 0 : i32
    %c0_i32_1 = arith.constant 0 : i32
    return %arg0, %c0_i32, %c0_i32_0 : i32, i32, i32
  }
  func.func @transform_9(%arg0: i32) -> (i32, i32, i32) {
    %c0_i32 = arith.constant 0 : i32
    %c0_i32_0 = arith.constant 0 : i32
    %c0_i32_1 = arith.constant 0 : i32
    return %arg0, %c0_i32, %c0_i32_0 : i32, i32, i32
  }
}

module attributes {stable_mosaic.version = 11 : i64} {
  func.func @_last_level_kernel(%arg0: i32, %arg1: memref<8x2x32xf32, #tpu.memory_space<vmem>>, %arg2: memref<32x16xf32, #tpu.memory_space<vmem>>, %arg3: memref<1x16xf32, #tpu.memory_space<vmem>>, %arg4: memref<8x2x16xf32, #tpu.memory_space<vmem>>) attributes {dimension_semantics = [#tpu.dimension_semantics<parallel>], iteration_bounds = array<i64: 1>, scalar_prefetch = 0 : i64, scratch_operands = 0 : i64, tpu.core_type = #tpu.core_type<tc>, window_params = [{transform_indices = @transform_0, window_bounds = array<i64: 8, 2, 32>}, {pipeline_mode = #tpu.pipeline_mode<synchronous>, transform_indices = @transform_1, window_bounds = array<i64: 32, 16>}, {pipeline_mode = #tpu.pipeline_mode<synchronous>, transform_indices = @transform_2, window_bounds = array<i64: 1, 16>}, {transform_indices = @transform_3, window_bounds = array<i64: 8, 2, 16>}]} {
    %c0 = arith.constant 0 : index
    %c0_0 = arith.constant 0 : index
    %0 = vector.load %arg2[%c0, %c0_0] : memref<32x16xf32, #tpu.memory_space<vmem>>, vector<32x16xf32>
    %c0_1 = arith.constant 0 : index
    %c0_2 = arith.constant 0 : index
    %1 = vector.load %arg3[%c0_1, %c0_2] : memref<1x16xf32, #tpu.memory_space<vmem>>, vector<1x16xf32>
    %c0_3 = arith.constant 0 : index
    %c0_4 = arith.constant 0 : index
    %c0_5 = arith.constant 0 : index
    %2 = vector.load %arg1[%c0_3, %c0_4, %c0_5] : memref<8x2x32xf32, #tpu.memory_space<vmem>>, vector<8x1x32xf32>
    %3 = vector.shape_cast %2 : vector<8x1x32xf32> to vector<8x32xf32>
    %cst = arith.constant dense<0.000000e+00> : vector<8x16xf32>
    %4 = tpu.matmul %3, %0, %cst {dimension_numbers = #tpu.dot_dimension_numbers<[1], [0], [0], [1], [0, 0, 1, 1], [], []>, precision = #tpu.contract_precision<fp32>} : vector<8x32xf32>, vector<32x16xf32>, vector<8x16xf32> -> vector<8x16xf32>
    %5 = vector.broadcast %1 : vector<1x16xf32> to vector<8x16xf32>
    %6 = arith.addf %4, %5 : vector<8x16xf32>
    %c0_6 = arith.constant 0 : index
    %c0_7 = arith.constant 0 : index
    %c0_8 = arith.constant 0 : index
    %7 = vector.load %arg4[%c0_6, %c0_7, %c0_8] : memref<8x2x16xf32, #tpu.memory_space<vmem>>, vector<8x1x16xf32>
    %8 = vector.shape_cast %7 : vector<8x1x16xf32> to vector<8x16xf32>
    %9 = vector.shape_cast %6 : vector<8x16xf32> to vector<8x1x16xf32>
    tpu.vector_store %arg4[%c0_6, %c0_7, %c0_8], %9 {strides = array<i32>} : memref<8x2x16xf32, #tpu.memory_space<vmem>>, vector<8x1x16xf32>,
    %c0_9 = arith.constant 0 : index
    %c1 = arith.constant 1 : index
    %c0_10 = arith.constant 0 : index
    %10 = vector.load %arg1[%c0_9, %c1, %c0_10] : memref<8x2x32xf32, #tpu.memory_space<vmem>>, vector<8x1x32xf32>
    %11 = vector.shape_cast %10 : vector<8x1x32xf32> to vector<8x32xf32>
    %cst_11 = arith.constant dense<0.000000e+00> : vector<8x16xf32>
    %12 = tpu.matmul %11, %0, %cst_11 {dimension_numbers = #tpu.dot_dimension_numbers<[1], [0], [0], [1], [0, 0, 1, 1], [], []>, precision = #tpu.contract_precision<fp32>} : vector<8x32xf32>, vector<32x16xf32>, vector<8x16xf32> -> vector<8x16xf32>
    %13 = vector.broadcast %1 : vector<1x16xf32> to vector<8x16xf32>
    %14 = arith.addf %12, %13 : vector<8x16xf32>
    %c0_12 = arith.constant 0 : index
    %c1_13 = arith.constant 1 : index
    %c0_14 = arith.constant 0 : index
    %15 = vector.load %arg4[%c0_12, %c1_13, %c0_14] : memref<8x2x16xf32, #tpu.memory_space<vmem>>, vector<8x1x16xf32>
    %16 = vector.shape_cast %15 : vector<8x1x16xf32> to vector<8x16xf32>
    %17 = vector.shape_cast %14 : vector<8x16xf32> to vector<8x1x16xf32>
    tpu.vector_store %arg4[%c0_12, %c1_13, %c0_14], %17 {strides = array<i32>} : memref<8x2x16xf32, #tpu.memory_space<vmem>>, vector<8x1x16xf32>,
    return
  }
  func.func @transform_0(%arg0: i32) -> (i32, i32, i32) {
    %c0_i32 = arith.constant 0 : i32
    %c0_i32_0 = arith.constant 0 : i32
    %c0_i32_1 = arith.constant 0 : i32
    return %arg0, %c0_i32, %c0_i32_0 : i32, i32, i32
  }
  func.func @transform_1(%arg0: i32) -> (i32, i32) {
    %c0_i32 = arith.constant 0 : i32
    %c0_i32_0 = arith.constant 0 : i32
    %c0_i32_1 = arith.constant 0 : i32
    return %c0_i32, %c0_i32_0 : i32, i32
  }
  func.func @transform_2(%arg0: i32) -> (i32, i32) {
    %c0_i32 = arith.constant 0 : i32
    %c0_i32_0 = arith.constant 0 : i32
    %c0_i32_1 = arith.constant 0 : i32
    return %c0_i32, %c0_i32_0 : i32, i32
  }
  func.func @transform_3(%arg0: i32) -> (i32, i32, i32) {
    %c0_i32 = arith.constant 0 : i32
    %c0_i32_0 = arith.constant 0 : i32
    %c0_i32_1 = arith.constant 0 : i32
    return %arg0, %c0_i32, %c0_i32_0 : i32, i32, i32
  }
}

module attributes {stable_mosaic.version = 11 : i64} {
  func.func @_fused_level_kernel(%arg0: i32, %arg1: memref<8x4x32xf32, #tpu.memory_space<vmem>>, %arg2: memref<32x8xf32, #tpu.memory_space<vmem>>, %arg3: memref<1x8xf32, #tpu.memory_space<vmem>>, %arg4: memref<8x32xf32, #tpu.memory_space<vmem>>, %arg5: memref<8x32xf32, #tpu.memory_space<vmem>>, %arg6: memref<1x32xf32, #tpu.memory_space<vmem>>, %arg7: memref<8x1xf32, #tpu.memory_space<vmem>>, %arg8: memref<8x1xf32, #tpu.memory_space<vmem>>, %arg9: memref<8x4x8xf32, #tpu.memory_space<vmem>>, %arg10: memref<8x2x32xf32, #tpu.memory_space<vmem>>) attributes {dimension_semantics = [#tpu.dimension_semantics<parallel>], iteration_bounds = array<i64: 1>, scalar_prefetch = 0 : i64, scratch_operands = 0 : i64, tpu.core_type = #tpu.core_type<tc>, window_params = [{transform_indices = @transform_0, window_bounds = array<i64: 8, 4, 32>}, {pipeline_mode = #tpu.pipeline_mode<synchronous>, transform_indices = @transform_1, window_bounds = array<i64: 32, 8>}, {pipeline_mode = #tpu.pipeline_mode<synchronous>, transform_indices = @transform_2, window_bounds = array<i64: 1, 8>}, {pipeline_mode = #tpu.pipeline_mode<synchronous>, transform_indices = @transform_3, window_bounds = array<i64: 8, 32>}, {pipeline_mode = #tpu.pipeline_mode<synchronous>, transform_indices = @transform_4, window_bounds = array<i64: 8, 32>}, {pipeline_mode = #tpu.pipeline_mode<synchronous>, transform_indices = @transform_5, window_bounds = array<i64: 1, 32>}, {transform_indices = @transform_6, window_bounds = array<i64: 8, 1>}, {transform_indices = @transform_7, window_bounds = array<i64: 8, 1>}, {transform_indices = @transform_8, window_bounds = array<i64: 8, 4, 8>}, {transform_indices = @transform_9, window_bounds = array<i64: 8, 2, 32>}]} {
    %c0 = arith.constant 0 : index
    %c0_0 = arith.constant 0 : index
    %0 = vector.load %arg2[%c0, %c0_0] : memref<32x8xf32, #tpu.memory_space<vmem>>, vector<32x8xf32>
    %c0_1 = arith.constant 0 : index
    %c0_2 = arith.constant 0 : index
    %1 = vector.load %arg3[%c0_1, %c0_2] : memref<1x8xf32, #tpu.memory_space<vmem>>, vector<1x8xf32>
    %c0_3 = arith.constant 0 : index
    %c0_4 = arith.constant 0 : index
    %2 = vector.load %arg7[%c0_3, %c0_4] : memref<8x1xf32, #tpu.memory_space<vmem>>, vector<8x1xf32>
    %c0_5 = arith.constant 0 : index
    %c0_6 = arith.constant 0 : index
    %3 = vector.load %arg8[%c0_5, %c0_6] : memref<8x1xf32, #tpu.memory_space<vmem>>, vector<8x1xf32>
    %c0_7 = arith.constant 0 : index
    %c0_8 = arith.constant 0 : index
    %c0_9 = arith.constant 0 : index
    %4 = vector.load %arg1[%c0_7, %c0_8, %c0_9] : memref<8x4x32xf32, #tpu.memory_space<vmem>>, vector<8x1x32xf32>
    %5 = vector.shape_cast %4 : vector<8x1x32xf32> to vector<8x32xf32>
    %cst = arith.constant dense<0.000000e+00> : vector<8x8xf32>
    %6 = tpu.matmul %5, %0, %cst {dimension_numbers = #tpu.dot_dimension_numbers<[1], [0], [0], [1], [0, 0, 1, 1], [], []>, precision = #tpu.contract_precision<fp32>} : vector<8x32xf32>, vector<32x8xf32>, vector<8x8xf32> -> vector<8x8xf32>
    %7 = vector.broadcast %1 : vector<1x8xf32> to vector<8x8xf32>
    %8 = arith.addf %6, %7 : vector<8x8xf32>
    %c0_10 = arith.constant 0 : index
    %c0_11 = arith.constant 0 : index
    %c0_12 = arith.constant 0 : index
    %9 = vector.load %arg9[%c0_10, %c0_11, %c0_12] : memref<8x4x8xf32, #tpu.memory_space<vmem>>, vector<8x1x8xf32>
    %10 = vector.shape_cast %9 : vector<8x1x8xf32> to vector<8x8xf32>
    %11 = vector.shape_cast %8 : vector<8x8xf32> to vector<8x1x8xf32>
    tpu.vector_store %arg9[%c0_10, %c0_11, %c0_12], %11 {strides = array<i32>} : memref<8x4x8xf32, #tpu.memory_space<vmem>>, vector<8x1x8xf32>,
    %c0_13 = arith.constant 0 : index
    %c1 = arith.constant 1 : index
    %c0_14 = arith.constant 0 : index
    %12 = vector.load %arg1[%c0_13, %c1, %c0_14] : memref<8x4x32xf32, #tpu.memory_space<vmem>>, vector<8x1x32xf32>
    %13 = vector.shape_cast %12 : vector<8x1x32xf32> to vector<8x32xf32>
    %cst_15 = arith.constant dense<0.000000e+00> : vector<8x8xf32>
    %14 = tpu.matmul %13, %0, %cst_15 {dimension_numbers = #tpu.dot_dimension_numbers<[1], [0], [0], [1], [0, 0, 1, 1], [], []>, precision = #tpu.contract_precision<fp32>} : vector<8x32xf32>, vector<32x8xf32>, vector<8x8xf32> -> vector<8x8xf32>
    %15 = vector.broadcast %1 : vector<1x8xf32> to vector<8x8xf32>
    %16 = arith.addf %14, %15 : vector<8x8xf32>
    %c0_16 = arith.constant 0 : index
    %c1_17 = arith.constant 1 : index
    %c0_18 = arith.constant 0 : index
    %17 = vector.load %arg9[%c0_16, %c1_17, %c0_18] : memref<8x4x8xf32, #tpu.memory_space<vmem>>, vector<8x1x8xf32>
    %18 = vector.shape_cast %17 : vector<8x1x8xf32> to vector<8x8xf32>
    %19 = vector.shape_cast %16 : vector<8x8xf32> to vector<8x1x8xf32>
    tpu.vector_store %arg9[%c0_16, %c1_17, %c0_18], %19 {strides = array<i32>} : memref<8x4x8xf32, #tpu.memory_space<vmem>>, vector<8x1x8xf32>,
    %c0_19 = arith.constant 0 : index
    %c2 = arith.constant 2 : index
    %c0_20 = arith.constant 0 : index
    %20 = vector.load %arg1[%c0_19, %c2, %c0_20] : memref<8x4x32xf32, #tpu.memory_space<vmem>>, vector<8x1x32xf32>
    %21 = vector.shape_cast %20 : vector<8x1x32xf32> to vector<8x32xf32>
    %cst_21 = arith.constant dense<0.000000e+00> : vector<8x8xf32>
    %22 = tpu.matmul %21, %0, %cst_21 {dimension_numbers = #tpu.dot_dimension_numbers<[1], [0], [0], [1], [0, 0, 1, 1], [], []>, precision = #tpu.contract_precision<fp32>} : vector<8x32xf32>, vector<32x8xf32>, vector<8x8xf32> -> vector<8x8xf32>
    %23 = vector.broadcast %1 : vector<1x8xf32> to vector<8x8xf32>
    %24 = arith.addf %22, %23 : vector<8x8xf32>
    %c0_22 = arith.constant 0 : index
    %c2_23 = arith.constant 2 : index
    %c0_24 = arith.constant 0 : index
    %25 = vector.load %arg9[%c0_22, %c2_23, %c0_24] : memref<8x4x8xf32, #tpu.memory_space<vmem>>, vector<8x1x8xf32>
    %26 = vector.shape_cast %25 : vector<8x1x8xf32> to vector<8x8xf32>
    %27 = vector.shape_cast %24 : vector<8x8xf32> to vector<8x1x8xf32>
    tpu.vector_store %arg9[%c0_22, %c2_23, %c0_24], %27 {strides = array<i32>} : memref<8x4x8xf32, #tpu.memory_space<vmem>>, vector<8x1x8xf32>,
    %c0_25 = arith.constant 0 : index
    %c3 = arith.constant 3 : index
    %c0_26 = arith.constant 0 : index
    %28 = vector.load %arg1[%c0_25, %c3, %c0_26] : memref<8x4x32xf32, #tpu.memory_space<vmem>>, vector<8x1x32xf32>
    %29 = vector.shape_cast %28 : vector<8x1x32xf32> to vector<8x32xf32>
    %cst_27 = arith.constant dense<0.000000e+00> : vector<8x8xf32>
    %30 = tpu.matmul %29, %0, %cst_27 {dimension_numbers = #tpu.dot_dimension_numbers<[1], [0], [0], [1], [0, 0, 1, 1], [], []>, precision = #tpu.contract_precision<fp32>} : vector<8x32xf32>, vector<32x8xf32>, vector<8x8xf32> -> vector<8x8xf32>
    %31 = vector.broadcast %1 : vector<1x8xf32> to vector<8x8xf32>
    %32 = arith.addf %30, %31 : vector<8x8xf32>
    %c0_28 = arith.constant 0 : index
    %c3_29 = arith.constant 3 : index
    %c0_30 = arith.constant 0 : index
    %33 = vector.load %arg9[%c0_28, %c3_29, %c0_30] : memref<8x4x8xf32, #tpu.memory_space<vmem>>, vector<8x1x8xf32>
    %34 = vector.shape_cast %33 : vector<8x1x8xf32> to vector<8x8xf32>
    %35 = vector.shape_cast %32 : vector<8x8xf32> to vector<8x1x8xf32>
    tpu.vector_store %arg9[%c0_28, %c3_29, %c0_30], %35 {strides = array<i32>} : memref<8x4x8xf32, #tpu.memory_space<vmem>>, vector<8x1x8xf32>,
    %cst_31 = arith.constant dense<0.000000e+00> : vector<8xf32>
    %36 = vector.multi_reduction <add>, %8, %cst_31 [1] : vector<8x8xf32> to vector<8xf32>
    %37 = vector.shape_cast %36 : vector<8xf32> to vector<8x1xf32>
    %cst_32 = arith.constant 0.000000e+00 : f32
    %38 = vector.broadcast %cst_32 : f32 to vector<8x1xf32>
    %39 = arith.addf %38, %37 : vector<8x1xf32>
    %cst_33 = arith.constant dense<0.000000e+00> : vector<8xf32>
    %40 = vector.multi_reduction <add>, %16, %cst_33 [1] : vector<8x8xf32> to vector<8xf32>
    %41 = vector.shape_cast %40 : vector<8xf32> to vector<8x1xf32>
    %42 = arith.addf %39, %41 : vector<8x1xf32>
    %cst_34 = arith.constant dense<0.000000e+00> : vector<8xf32>
    %43 = vector.multi_reduction <add>, %24, %cst_34 [1] : vector<8x8xf32> to vector<8xf32>
    %44 = vector.shape_cast %43 : vector<8xf32> to vector<8x1xf32>
    %45 = arith.addf %42, %44 : vector<8x1xf32>
    %cst_35 = arith.constant dense<0.000000e+00> : vector<8xf32>
    %46 = vector.multi_reduction <add>, %32, %cst_35 [1] : vector<8x8xf32> to vector<8xf32>
    %47 = vector.shape_cast %46 : vector<8xf32> to vector<8x1xf32>
    %48 = arith.addf %45, %47 : vector<8x1xf32>
    %cst_36 = arith.constant 3.200000e+01 : f32
    %49 = vector.broadcast %cst_36 : f32 to vector<8x1xf32>
    %50 = arith.divf %48, %49 : vector<8x1xf32>
    %51 = vector.broadcast %50 : vector<8x1xf32> to vector<8x8xf32>
    %52 = arith.subf %8, %51 : vector<8x8xf32>
    %53 = arith.mulf %52, %52 : vector<8x8xf32>
    %cst_37 = arith.constant dense<0.000000e+00> : vector<8xf32>
    %54 = vector.multi_reduction <add>, %53, %cst_37 [1] : vector<8x8xf32> to vector<8xf32>
    %55 = vector.shape_cast %54 : vector<8xf32> to vector<8x1xf32>
    %cst_38 = arith.constant 0.000000e+00 : f32
    %56 = vector.broadcast %cst_38 : f32 to vector<8x1xf32>
    %57 = arith.addf %56, %55 : vector<8x1xf32>
    %58 = vector.broadcast %50 : vector<8x1xf32> to vector<8x8xf32>
    %59 = arith.subf %16, %58 : vector<8x8xf32>
    %60 = arith.mulf %59, %59 : vector<8x8xf32>
    %cst_39 = arith.constant dense<0.000000e+00> : vector<8xf32>
    %61 = vector.multi_reduction <add>, %60, %cst_39 [1] : vector<8x8xf32> to vector<8xf32>
    %62 = vector.shape_cast %61 : vector<8xf32> to vector<8x1xf32>
    %63 = arith.addf %57, %62 : vector<8x1xf32>
    %64 = vector.broadcast %50 : vector<8x1xf32> to vector<8x8xf32>
    %65 = arith.subf %24, %64 : vector<8x8xf32>
    %66 = arith.mulf %65, %65 : vector<8x8xf32>
    %cst_40 = arith.constant dense<0.000000e+00> : vector<8xf32>
    %67 = vector.multi_reduction <add>, %66, %cst_40 [1] : vector<8x8xf32> to vector<8xf32>
    %68 = vector.shape_cast %67 : vector<8xf32> to vector<8x1xf32>
    %69 = arith.addf %63, %68 : vector<8x1xf32>
    %70 = vector.broadcast %50 : vector<8x1xf32> to vector<8x8xf32>
    %71 = arith.subf %32, %70 : vector<8x8xf32>
    %72 = arith.mulf %71, %71 : vector<8x8xf32>
    %cst_41 = arith.constant dense<0.000000e+00> : vector<8xf32>
    %73 = vector.multi_reduction <add>, %72, %cst_41 [1] : vector<8x8xf32> to vector<8xf32>
    %74 = vector.shape_cast %73 : vector<8xf32> to vector<8x1xf32>
    %75 = arith.addf %69, %74 : vector<8x1xf32>
    %cst_42 = arith.constant 3.200000e+01 : f32
    %76 = vector.broadcast %cst_42 : f32 to vector<8x1xf32>
    %77 = arith.divf %75, %76 : vector<8x1xf32>
    %cst_43 = arith.constant 9.99999974E-6 : f32
    %78 = vector.broadcast %cst_43 : f32 to vector<8x1xf32>
    %79 = arith.addf %77, %78 : vector<8x1xf32>
    %80 = math.rsqrt %79 : vector<8x1xf32>
    %c0_44 = arith.constant 0 : index
    %c0_45 = arith.constant 0 : index
    %81 = vector.load %arg4[%c0_44, %c0_45] : memref<8x32xf32, #tpu.memory_space<vmem>>, vector<8x32xf32>
    %c0_46 = arith.constant 0 : index
    %c0_47 = arith.constant 0 : index
    %82 = vector.load %arg5[%c0_46, %c0_47] : memref<8x32xf32, #tpu.memory_space<vmem>>, vector<8x32xf32>
    %c0_48 = arith.constant 0 : index
    %c0_49 = arith.constant 0 : index
    %83 = vector.load %arg6[%c0_48, %c0_49] : memref<1x32xf32, #tpu.memory_space<vmem>>, vector<1x32xf32>
    %84 = vector.broadcast %50 : vector<8x1xf32> to vector<8x8xf32>
    %85 = arith.subf %8, %84 : vector<8x8xf32>
    %86 = vector.broadcast %80 : vector<8x1xf32> to vector<8x8xf32>
    %87 = arith.mulf %85, %86 : vector<8x8xf32>
    %88 = vector.broadcast %2 : vector<8x1xf32> to vector<8x8xf32>
    %89 = arith.mulf %87, %88 : vector<8x8xf32>
    %90 = vector.broadcast %3 : vector<8x1xf32> to vector<8x8xf32>
    %91 = arith.addf %89, %90 : vector<8x8xf32>
    %92 = vector.broadcast %50 : vector<8x1xf32> to vector<8x8xf32>
    %93 = arith.subf %16, %92 : vector<8x8xf32>
    %94 = vector.broadcast %80 : vector<8x1xf32> to vector<8x8xf32>
    %95 = arith.mulf %93, %94 : vector<8x8xf32>
    %96 = vector.broadcast %2 : vector<8x1xf32> to vector<8x8xf32>
    %97 = arith.mulf %95, %96 : vector<8x8xf32>
    %98 = vector.broadcast %3 : vector<8x1xf32> to vector<8x8xf32>
    %99 = arith.addf %97, %98 : vector<8x8xf32>
    %cst_50 = arith.constant dense<0.000000e+00> : vector<8x32xf32>
    %100 = tpu.matmul %91, %81, %cst_50 {dimension_numbers = #tpu.dot_dimension_numbers<[1], [0], [0], [1], [0, 0, 1, 1], [], []>, precision = #tpu.contract_precision<fp32>} : vector<8x8xf32>, vector<8x32xf32>, vector<8x32xf32> -> vector<8x32xf32>
    %cst_51 = arith.constant dense<0.000000e+00> : vector<8x32xf32>
    %101 = tpu.matmul %99, %82, %cst_51 {dimension_numbers = #tpu.dot_dimension_numbers<[1], [0], [0], [1], [0, 0, 1, 1], [], []>, precision = #tpu.contract_precision<fp32>} : vector<8x8xf32>, vector<8x32xf32>, vector<8x32xf32> -> vector<8x32xf32>
    %102 = arith.addf %100, %101 : vector<8x32xf32>
    %103 = vector.broadcast %83 : vector<1x32xf32> to vector<8x32xf32>
    %104 = arith.addf %102, %103 : vector<8x32xf32>
    %c0_52 = arith.constant 0 : index
    %c0_53 = arith.constant 0 : index
    %c0_54 = arith.constant 0 : index
    %105 = vector.load %arg10[%c0_52, %c0_53, %c0_54] : memref<8x2x32xf32, #tpu.memory_space<vmem>>, vector<8x1x32xf32>
    %106 = vector.shape_cast %105 : vector<8x1x32xf32> to vector<8x32xf32>
    %107 = vector.shape_cast %104 : vector<8x32xf32> to vector<8x1x32xf32>
    tpu.vector_store %arg10[%c0_52, %c0_53, %c0_54], %107 {strides = array<i32>} : memref<8x2x32xf32, #tpu.memory_space<vmem>>, vector<8x1x32xf32>,
    %108 = vector.broadcast %50 : vector<8x1xf32> to vector<8x8xf32>
    %109 = arith.subf %24, %108 : vector<8x8xf32>
    %110 = vector.broadcast %80 : vector<8x1xf32> to vector<8x8xf32>
    %111 = arith.mulf %109, %110 : vector<8x8xf32>
    %112 = vector.broadcast %2 : vector<8x1xf32> to vector<8x8xf32>
    %113 = arith.mulf %111, %112 : vector<8x8xf32>
    %114 = vector.broadcast %3 : vector<8x1xf32> to vector<8x8xf32>
    %115 = arith.addf %113, %114 : vector<8x8xf32>
    %116 = vector.broadcast %50 : vector<8x1xf32> to vector<8x8xf32>
    %117 = arith.subf %32, %116 : vector<8x8xf32>
    %118 = vector.broadcast %80 : vector<8x1xf32> to vector<8x8xf32>
    %119 = arith.mulf %117, %118 : vector<8x8xf32>
    %120 = vector.broadcast %2 : vector<8x1xf32> to vector<8x8xf32>
    %121 = arith.mulf %119, %120 : vector<8x8xf32>
    %122 = vector.broadcast %3 : vector<8x1xf32> to vector<8x8xf32>
    %123 = arith.addf %121, %122 : vector<8x8xf32>
    %cst_55 = arith.constant dense<0.000000e+00> : vector<8x32xf32>
    %124 = tpu.matmul %115, %81, %cst_55 {dimension_numbers = #tpu.dot_dimension_numbers<[1], [0], [0], [1], [0, 0, 1, 1], [], []>, precision = #tpu.contract_precision<fp32>} : vector<8x8xf32>, vector<8x32xf32>, vector<8x32xf32> -> vector<8x32xf32>
    %cst_56 = arith.constant dense<0.000000e+00> : vector<8x32xf32>
    %125 = tpu.matmul %123, %82, %cst_56 {dimension_numbers = #tpu.dot_dimension_numbers<[1], [0], [0], [1], [0, 0, 1, 1], [], []>, precision = #tpu.contract_precision<fp32>} : vector<8x8xf32>, vector<8x32xf32>, vector<8x32xf32> -> vector<8x32xf32>
    %126 = arith.addf %124, %125 : vector<8x32xf32>
    %127 = vector.broadcast %83 : vector<1x32xf32> to vector<8x32xf32>
    %128 = arith.addf %126, %127 : vector<8x32xf32>
    %c0_57 = arith.constant 0 : index
    %c1_58 = arith.constant 1 : index
    %c0_59 = arith.constant 0 : index
    %129 = vector.load %arg10[%c0_57, %c1_58, %c0_59] : memref<8x2x32xf32, #tpu.memory_space<vmem>>, vector<8x1x32xf32>
    %130 = vector.shape_cast %129 : vector<8x1x32xf32> to vector<8x32xf32>
    %131 = vector.shape_cast %128 : vector<8x32xf32> to vector<8x1x32xf32>
    tpu.vector_store %arg10[%c0_57, %c1_58, %c0_59], %131 {strides = array<i32>} : memref<8x2x32xf32, #tpu.memory_space<vmem>>, vector<8x1x32xf32>,
    return
  }
  func.func @transform_0(%arg0: i32) -> (i32, i32, i32) {
    %c0_i32 = arith.constant 0 : i32
    %c0_i32_0 = arith.constant 0 : i32
    %c0_i32_1 = arith.constant 0 : i32
    return %arg0, %c0_i32, %c0_i32_0 : i32, i32, i32
  }
  func.func @transform_1(%arg0: i32) -> (i32, i32) {
    %c0_i32 = arith.constant 0 : i32
    %c0_i32_0 = arith.constant 0 : i32
    %c0_i32_1 = arith.constant 0 : i32
    return %c0_i32, %c0_i32_0 : i32, i32
  }
  func.func @transform_2(%arg0: i32) -> (i32, i32) {
    %c0_i32 = arith.constant 0 : i32
    %c0_i32_0 = arith.constant 0 : i32
    %c0_i32_1 = arith.constant 0 : i32
    return %c0_i32, %c0_i32_0 : i32, i32
  }
  func.func @transform_3(%arg0: i32) -> (i32, i32) {
    %c0_i32 = arith.constant 0 : i32
    %c0_i32_0 = arith.constant 0 : i32
    %c0_i32_1 = arith.constant 0 : i32
    return %c0_i32, %c0_i32_0 : i32, i32
  }
  func.func @transform_4(%arg0: i32) -> (i32, i32) {
    %c0_i32 = arith.constant 0 : i32
    %c0_i32_0 = arith.constant 0 : i32
    %c0_i32_1 = arith.constant 0 : i32
    return %c0_i32, %c0_i32_0 : i32, i32
  }
  func.func @transform_5(%arg0: i32) -> (i32, i32) {
    %c0_i32 = arith.constant 0 : i32
    %c0_i32_0 = arith.constant 0 : i32
    %c0_i32_1 = arith.constant 0 : i32
    return %c0_i32, %c0_i32_0 : i32, i32
  }
  func.func @transform_6(%arg0: i32) -> (i32, i32) {
    %c0_i32 = arith.constant 0 : i32
    %c0_i32_0 = arith.constant 0 : i32
    return %arg0, %c0_i32 : i32, i32
  }
  func.func @transform_7(%arg0: i32) -> (i32, i32) {
    %c0_i32 = arith.constant 0 : i32
    %c0_i32_0 = arith.constant 0 : i32
    return %arg0, %c0_i32 : i32, i32
  }
  func.func @transform_8(%arg0: i32) -> (i32, i32, i32) {
    %c0_i32 = arith.constant 0 : i32
    %c0_i32_0 = arith.constant 0 : i32
    %c0_i32_1 = arith.constant 0 : i32
    return %arg0, %c0_i32, %c0_i32_0 : i32, i32, i32
  }
  func.func @transform_9(%arg0: i32) -> (i32, i32, i32) {
    %c0_i32 = arith.constant 0 : i32
    %c0_i32_0 = arith.constant 0 : i32
    %c0_i32_1 = arith.constant 0 : i32
    return %arg0, %c0_i32, %c0_i32_0 : i32, i32, i32
  }
}

</mosaic_0001>

<bundles_post_ra>
// kernel: tile.13
= control target key start
LH: loop header
LB: loop body
LE: loop exit
PB: predicated region body
PF: predicated region fallthrough
CT: control target
= control target key end

     0   :  { %s22_s0 = inlined_call_operand.vmem [shape: f32[4], index: 0, kind: input, shape index: {}]   ;;  %s23_s1 = inlined_call_operand.vmem [shape: f32[2,4], index: 1, kind: output, shape index: {}]  }
   0x1   :  { %v4_v0 = vld [vmem:[%s22_s0] ss:$0 sm:$0xff] }
   0x2   :  { %5 = vst [vmem:[%s23_s1] sm:$0x3] %v4_v0 }

// kernel: tile.0
= control target key start
LH: loop header
LB: loop body
LE: loop exit
PB: predicated region body
PF: predicated region fallthrough
CT: control target
= control target key end

     0   :  { %s34_s8 = smov 125   ;;  %vm7_vm0 = vcmask 7168   ;;  %s35_s11 = smov 126   ;;  %s61_s0 = inlined_call_operand.vmem [shape: f32[2,4], index: 0, kind: input, shape index: {}]   ;;  %s62_s1 = inlined_call_operand.vmem [shape: f32[8,1], index: 1, kind: output, shape index: {}]  }
   0x1   :  { %v4_v0 = vld [vmem:[%s61_s0] sm:$0x3]  ;;  %s33_s0 = smov 127  }
   0x2   :  { %5 = vst [vmem:[#allocation0] sm:$0x3] %v4_v0 }
   0x9   :  { %v9_v1 = vld [vmem:[#allocation0] sm:$0x3]  }
   0xa   :  { %v21_v2 = vld [vmem:[#allocation0] sm:$0x3]   ;;  %10 = vrot.lane.b32.xlu0 %v9_v1, %s33_s0 }
   0xb   :  { %22 = vrot.lane.b32.xlu1 %v21_v2, %s34_s8  ;;  %v6_v3 = vld [vmem:[#allocation0] sm:$0x3]  }
   0xc   :  { %v15_v4 = vld [vmem:[#allocation0] sm:$0x3]   ;;  %8 = vst.msk [vmem:[%s62_s1] ss:$4 sm:$0x3] %vm7_vm0, %v6_v3  }
   0xe   :  { %16 = vrot.lane.b32.xlu0 %v15_v4, %s35_s11 }
  0x7c   :  { %v11_v5 = vpop.permute.xlu0 %10  }
  0x7d   :  { %v23_v6 = vpop.permute.xlu1 %22   ;;  %27 = vst.msk [vmem:[%s62_s1 + $0x1] ss:$4 sm:$0x3] %vm7_vm0, %v11_v5  }
  0x7e   :  { %29 = vst.msk [vmem:[%s62_s1 + $0x3] ss:$4 sm:$0x3] %vm7_vm0, %v23_v6  }
  0x80   :  { %v17_v7 = vpop.permute.xlu0 %16  }
  0x81   :  { %28 = vst.msk [vmem:[%s62_s1 + $0x2] ss:$4 sm:$0x3] %vm7_vm0, %v17_v7  }

// kernel: encoder_process_forward.5
= control target key start
LH: loop header
LB: loop body
LE: loop exit
PB: predicated region body
PF: predicated region fallthrough
CT: control target
= control target key end

     0   :  { %vm42_vm0 = vcmask 1041409   ;;  %v1495_v0 = vmov 0.0|0.0   ;;  %vm45_vm1 = vcmask 1042434   ;;  %vm48_vm2 = vcmask 1043459   ;;  %s1766_s1 = inlined_call_operand.vmem [shape: f32[32,16], index: 1, kind: input, shape index: {}]   ;;  %s1767_s0 = inlined_call_operand.vmem [shape: f32[8,2,32], index: 0, kind: input, shape index: {}]   ;;  %s1768_s2 = inlined_call_operand.vmem [shape: f32[1,16], index: 2, kind: input, shape index: {}]   ;;  %s1769_s3 = inlined_call_operand.vmem [shape: f32[8,2,16], index: 3, kind: output, shape index: {}]  }
   0x1   :  { %1397 = vmatprep.subr.bf16.mxu0 %v1495_v0  ;;  %1433 = vmatprep.subr.bf16.mxu1 %v1495_v0  ;;  %v14_v1 = vld [vmem:[%s1766_s1] sm:$0xff]  ;;  %v15_v2 = vld [vmem:[%s1766_s1 + $0x8] sm:$0xff]  ;;  %v16_v3 = vld [vmem:[%s1766_s1 + $0x10] sm:$0xff]  ;;  %vm51_vm3 = vcmask 1044484   ;;  %vm1496_vm4 = vmmov 0   ;;  %v1497_v8 = vmov 0.0  }
   0x2   :  { %v66_v4 = vand.u32 4294901760, %v14_v1  ;;  %v69_v5 = vand.u32 4294901760, %v15_v2  ;;  %v17_v6 = vld [vmem:[%s1766_s1 + $0x18] sm:$0xff]  ;;  %v72_v7 = vand.u32 4294901760, %v16_v3  ;;  %1273 = vmatprep.mubr.msk.f32.mxu0 %vm1496_vm4, %v1497_v8  ;;  %1339 = vmatprep.mubr.msk.f32.mxu1 %vm1496_vm4, %v1497_v8  ;;  %v19_v9 = vld [vmem:[%s1767_s0] sm:$0x1] }
   0x3   :  { %v75_v10 = vand.u32 4294901760, %v17_v6  ;;  %v20_v11 = vld [vmem:[%s1767_s0 + $0x2] sm:$0x1]  ;;  %v21_v12 = vld [vmem:[%s1767_s0 + $0x4] sm:$0x1]  ;;  %vm54_vm5 = vcmask 1045509  }
   0x4   :  { %v1546_v13 = vpack.c.bf16 %v69_v5, %v66_v4  ;;  %v22_v14 = vld [vmem:[%s1767_s0 + $0x6] sm:$0x1]  ;;  %v23_v15 = vld [vmem:[%s1767_s0 + $0x8] sm:$0x1]  ;;  %v24_v16 = vld [vmem:[%s1767_s0 + $0xa] sm:$0x1]  ;;  %v1557_v17 = vsub.f32 %v14_v1, %v66_v4  ;;  %v1569_v25 = vsub.f32 %v15_v2, %v69_v5  ;;  %v1592_v38 = vsub.f32 %v16_v3, %v72_v7 }
   0x5   :  { %v25_v18 = vld [vmem:[%s1767_s0 + $0xc] sm:$0x1]  ;;  %v26_v19 = vld [vmem:[%s1767_s0 + $0xe] sm:$0x1]  ;;  %v41_v20 = vrot.slane %v20_v11, 7  ;;  %v44_v21 = vrot.slane %v21_v12, 6  ;;  %v1567_v22 = vpack.c.bf16 %v75_v10, %v72_v7  ;;  %v1604_v44 = vsub.f32 %v17_v6, %v75_v10 }
   0x6   :  { %1399 = vmatpush3.bf16.msra.mxu0 %v1546_v13  ;;  %1435 = vmatpush3.bf16.msra.mxu1 %v1546_v13  ;;  %v47_v23 = vrot.slane %v22_v14, 5  ;;  %v50_v24 = vrot.slane %v23_v15, 4  ;;  %v53_v27 = vrot.slane %v24_v16, 3  ;;  %v56_v28 = vrot.slane %v25_v18, 2  ;;  %v617_v29 = vld [vmem:[%s1767_s0 + $0x1] sm:$0x1] }
   0x7   :  { %1400 = vmatprep.subr.bf16.mxu0 %v1495_v0  ;;  %1436 = vmatprep.subr.bf16.mxu1 %v1495_v0  ;;  %v43_v26 = vsel %vm42_vm0, %v41_v20, %v19_v9  ;;  %v618_v30 = vld [vmem:[%s1767_s0 + $0x3] sm:$0x1]  ;;  %vm57_vm6 = vcmask 1046534   ;;  %v59_v32 = vrot.slane %v26_v19, 1  ;;  %v147_v33 = vand.u32 4294901760, %v1557_v17 }
   0x8   :  { %v46_v31 = vsel %vm45_vm1, %v44_v21, %v43_v26  ;;  %v619_v34 = vld [vmem:[%s1767_s0 + $0x5] sm:$0x1]  ;;  %vm60_vm7 = vcmask 1047559   ;;  %vm62_vm8 = vcmask 261120   ;;  %v620_v36 = vld [vmem:[%s1767_s0 + $0x7] sm:$0x1] }
   0x9   :  { %v49_v35 = vsel %vm48_vm2, %v47_v23, %v46_v31  ;;  %v621_v37 = vld [vmem:[%s1767_s0 + $0x9] sm:$0x1]  ;;  %v154_v40 = vand.u32 4294901760, %v1569_v25  ;;  %v622_v41 = vld [vmem:[%s1767_s0 + $0xb] sm:$0x1]  ;;  %v633_v43 = vrot.slane %v618_v30, 7  ;;  %v148_v51 = vsub.f32 %v1557_v17, %v147_v33 }
   0xa   :  { %1402 = vmatpush3.bf16.msra.mxu0 %v1567_v22  ;;  %1438 = vmatpush3.bf16.msra.mxu1 %v1567_v22  ;;  %v52_v39 = vsel %vm51_vm3, %v50_v24, %v49_v35  ;;  %v623_v42 = vld [vmem:[%s1767_s0 + $0xd] sm:$0x1]  ;;  %v624_v46 = vld [vmem:[%s1767_s0 + $0xf] sm:$0x1]  ;;  %v635_v47 = vrot.slane %v619_v34, 6  ;;  %v637_v48 = vrot.slane %v620_v36, 5 }
   0xb   :  { %1403 = vmatprep.subr.bf16.mxu0 %v1495_v0  ;;  %1439 = vmatprep.subr.bf16.mxu1 %v1495_v0  ;;  %v55_v45 = vsel %vm54_vm5, %v53_v27, %v52_v39  ;;  %v639_v49 = vrot.slane %v621_v37, 4  ;;  %v634_v52 = vsel %vm42_vm0, %v633_v43, %v617_v29  ;;  %v641_v55 = vrot.slane %v622_v41, 3 }
   0xc   :  { %v58_v50 = vsel %vm57_vm6, %v56_v28, %v55_v45  ;;  %v636_v54 = vsel %vm45_vm1, %v635_v47, %v634_v52  ;;  %v643_v56 = vrot.slane %v623_v42, 2  ;;  %v155_v58 = vsub.f32 %v1569_v25, %v154_v40 }
   0xd   :  { %v61_v53 = vsel %vm60_vm7, %v59_v32, %v58_v50  ;;  %v638_v59 = vsel %vm48_vm2, %v637_v48, %v636_v54  ;;  %v645_v60 = vrot.slane %v624_v46, 1  ;;  %v161_v63 = vand.u32 4294901760, %v1592_v38 }
   0xe   :  { %v63_v57 = vsel %vm62_vm8, %v61_v53, 0  ;;  %v640_v62 = vsel %vm51_vm3, %v639_v49, %v638_v59  ;;  %v168_v1 = vand.u32 4294901760, %v1604_v44  ;;  %v149_v4 = vand.u32 4294901760, %v148_v51 }
   0xf   :  { %v1624_v61 = vand.u32 4294901760, %v63_v57  ;;  %v642_v2 = vsel %vm54_vm5, %v641_v55, %v640_v62  ;;  %v156_v6 = vand.u32 4294901760, %v155_v58  ;;  %v162_v9 = vsub.f32 %v1592_v38, %v161_v63 }
  0x10   :  { %v644_v5 = vsel %vm57_vm6, %v643_v56, %v642_v2  ;;  %v169_v10 = vsub.f32 %v1604_v44, %v168_v1  ;;  %v1410_v28 = vpack.c.bf16 %v1569_v25, %v1557_v17  ;;  %v1413_v29 = vpack.c.bf16 %v1604_v44, %v1592_v38 }
  0x11   :  { %v135_v3 = vsub.f32 %v63_v57, %v1624_v61  ;;  %v646_v7 = vsel %vm60_vm7, %v645_v60, %v644_v5  ;;  %v1404_v16 = vpack.c.bf16 %v156_v6, %v149_v4  ;;  %v163_v19 = vand.u32 4294901760, %v162_v9 }
  0x12   :  { %v647_v12 = vsel %vm62_vm8, %v646_v7, 0  ;;  %v170_v20 = vand.u32 4294901760, %v169_v10  ;;  %v1422_v30 = vpack.c.bf16 %v154_v40, %v147_v33  ;;  %v1425_v31 = vpack.c.bf16 %v168_v1, %v161_v63 }
  0x13   :  { %v136_v11 = vand.u32 4294901760, %v135_v3  ;;  %v1636_v14 = vand.u32 4294901760, %v647_v12  ;;  %v1498_v17 = vmov 1966171168   ;;  %v555_v32 = vlaneseq }
  0x14   :  { %v1407_v26 = vpack.c.bf16 %v170_v20, %v163_v19  ;;  %v553_v25 = vunpack.c.l.s4 %v1498_v17  ;;  %vm608_vm9 = vcmask 122880  }
  0x15   :  { %v137_v15 = vsub.f32 %v135_v3, %v136_v11  ;;  %v719_v18 = vsub.f32 %v647_v12, %v1636_v14  ;;  %v556_v34 = vshrl.u32 %v555_v32, 7 }
  0x16   :  { %v554_v33 = vunpack.c.0.s8 %v553_v25 }
  0x17   :  { %v138_v21 = vand.u32 4294901760, %v137_v15  ;;  %v720_v23 = vand.u32 4294901760, %v719_v18 }
  0x18   :  { %v557_v35 = vsub.s32 %v554_v33, %v556_v34 }
  0x19   :  { %1274 = vmatmul.mubr.f32.vlgmr.msra.gmra.mrb[0].mxu0 %v138_v21  ;;  %v721_v24 = vsub.f32 %v719_v18, %v720_v23 }
  0x1a   :  { %1405 = vmatpush3.bf16.msra.mxu0 %v1404_v16  ;;  %1284 = vmatprep.mubr.msk.f32.mxu0 %vm1496_vm4, %v1497_v8 }
  0x1b   :  { %1406 = vmatprep.subr.bf16.mxu0 %v1495_v0  ;;  %v722_v27 = vand.u32 4294901760, %v721_v24 }
  0x1d   :  { %1340 = vmatmul.mubr.f32.vlgmr.msra.gmra.mrb[0].mxu1 %v722_v27 }
  0x1e   :  { %1408 = vmatpush3.bf16.msra.mxu0 %v1407_v26  ;;  %1441 = vmatpush3.bf16.msra.mxu1 %v1404_v16 }
  0x1f   :  { %1409 = vmatprep.subr.bf16.mxu0 %v1495_v0  ;;  %1442 = vmatprep.subr.bf16.mxu1 %v1495_v0 }
  0x20   :  { %1350 = vmatprep.mubr.msk.f32.mxu1 %vm1496_vm4, %v1497_v8 }
  0x21   :  { %1285 = vmatmul.mubr.f32.vlgmr.msra.gmra.mrb[0].mxu0 %v1624_v61 }
  0x22   :  { %1411 = vmatpush3.bf16.msra.mxu0 %v1410_v28  ;;  %1295 = vmatprep.mubr.msk.f32.mxu0 %vm1496_vm4, %v1497_v8 }
  0x23   :  { %1444 = vmatpush3.bf16.msra.mxu1 %v1407_v26  ;;  %1412 = vmatprep.subr.bf16.mxu0 %v1495_v0 }
  0x24   :  { %1445 = vmatprep.subr.bf16.mxu1 %v1495_v0 }
  0x26   :  { %1351 = vmatmul.mubr.f32.vlgmr.msra.gmra.mrb[0].mxu1 %v1636_v14  ;;  %1414 = vmatpush3.bf16.msra.mxu0 %v1413_v29 }
  0x27   :  { %1447 = vmatpush3.bf16.msra.mxu1 %v1410_v28  ;;  %1415 = vmatprep.subr.bf16.mxu0 %v1495_v0 }
  0x28   :  { %1448 = vmatprep.subr.bf16.mxu1 %v1495_v0  ;;  %1361 = vmatprep.mubr.msk.f32.mxu1 %vm1496_vm4, %v1497_v8 }
  0x29   :  { %1296 = vmatmul.mubr.f32.vlgmr.msra.gmra.mrb[0].mxu0 %v135_v3 }
  0x2a   :  { %1417 = vmatpush3.bf16.msra.mxu0 %v1546_v13  ;;  %1306 = vmatprep.mubr.msk.f32.mxu0 %vm1496_vm4, %v1497_v8 }
  0x2b   :  { %1450 = vmatpush3.bf16.msra.mxu1 %v1413_v29  ;;  %1418 = vmatprep.subr.bf16.mxu0 %v1495_v0 }
  0x2c   :  { %1451 = vmatprep.subr.bf16.mxu1 %v1495_v0 }
  0x2e   :  { %1362 = vmatmul.mubr.f32.vlgmr.msra.gmra.mrb[0].mxu1 %v719_v18  ;;  %1420 = vmatpush3.bf16.msra.mxu0 %v1567_v22 }
  0x2f   :  { %1453 = vmatpush3.bf16.msra.mxu1 %v1546_v13  ;;  %1421 = vmatprep.subr.bf16.mxu0 %v1495_v0 }
  0x30   :  { %1454 = vmatprep.subr.bf16.mxu1 %v1495_v0  ;;  %1372 = vmatprep.mubr.msk.f32.mxu1 %vm1496_vm4, %v1497_v8 }
  0x31   :  { %1307 = vmatmul.mubr.f32.vlgmr.msra.gmra.mrb[0].mxu0 %v136_v11 }
  0x32   :  { %1423 = vmatpush3.bf16.msra.mxu0 %v1422_v30  ;;  %1317 = vmatprep.mubr.msk.f32.mxu0 %vm1496_vm4, %v1497_v8 }
  0x33   :  { %1456 = vmatpush3.bf16.msra.mxu1 %v1567_v22  ;;  %1424 = vmatprep.subr.bf16.mxu0 %v1495_v0 }
  0x34   :  { %1457 = vmatprep.subr.bf16.mxu1 %v1495_v0 }
  0x36   :  { %1373 = vmatmul.mubr.f32.vlgmr.msra.gmra.mrb[0].mxu1 %v720_v23  ;;  %1426 = vmatpush3.bf16.msra.mxu0 %v1425_v31 }
  0x37   :  { %1459 = vmatpush3.bf16.msra.mxu1 %v1422_v30  ;;  %1427 = vmatprep.subr.bf16.mxu0 %v1495_v0 }
  0x38   :  { %1460 = vmatprep.subr.bf16.mxu1 %v1495_v0  ;;  %1383 = vmatprep.mubr.msk.f32.mxu1 %vm1496_vm4, %v1497_v8 }
  0x39   :  { %1318 = vmatmul.mubr.f32.vlgmr.msra.gmra.mrb[0].mxu0 %v1624_v61 }
  0x3a   :  { %1429 = vmatpush3.bf16.msra.mxu0 %v1546_v13  ;;  %1328 = vmatprep.mubr.msk.f32.mxu0 %vm1496_vm4, %v1497_v8 }
  0x3b   :  { %1462 = vmatpush3.bf16.msra.mxu1 %v1425_v31  ;;  %1430 = vmatprep.subr.bf16.mxu0 %v1495_v0 }
  0x3c   :  { %1463 = vmatprep.subr.bf16.mxu1 %v1495_v0 }
  0x3e   :  { %1384 = vmatmul.mubr.f32.vlgmr.msra.gmra.mrb[0].mxu1 %v1636_v14  ;;  %1432 = vmatpush3.bf16.msra.mxu0 %v1567_v22 }
  0x3f   :  { %1465 = vmatpush3.bf16.msra.mxu1 %v1546_v13  ;;  %1394 = vmatprep.mubr.msk.f32.mxu1 %vm1496_vm4, %v1497_v8  ;;  %v1204_v13 = vld [vmem:[%s1768_s2] ss:$0 sm:$0xff] }
  0x40   :  { %1466 = vmatprep.subr.bf16.mxu1 %v1495_v0 }
  0x41   :  { %1329 = vmatmul.mubr.f32.vlgmr.msra.gmra.mrb[0].mxu0 %v1624_v61 }
  0x43   :  { %1468 = vmatpush3.bf16.msra.mxu1 %v1567_v22 }
  0x46   :  { %1395 = vmatmul.mubr.f32.vlgmr.msra.gmra.mrb[0].mxu1 %v1636_v14 }
 0x114   :  { %v546_v36 = vpop.f32.mrb[0].mxu0 }
 0x115   :  { %v1469_v8 = vadd.f32 %v1204_v13, %v546_v36  ;;  %v1330_v37 = vpop.f32.mrb[1].mxu0 }
 0x117   :  { %v551_v0 = vcombine.high %v1469_v8, %v1469_v8  ;;  %v558_v38 = vrot.slane %v1469_v8, %v557_v35 }
 0x119   :  { %v565_v39 = vrot.slane %v551_v0, %v557_v35  ;;  %v566_v22 = vcombine.high %v558_v38, %v558_v38  ;;  %v574_v40 = vrot.slane %v558_v38, %v557_v35  ;;  %v1130_v41 = vpop.f32.mrb[0].mxu1 }
 0x11a   :  { %v1470_v42 = vadd.f32 %v1204_v13, %v1130_v41  ;;  %v1396_v43 = vpop.f32.mrb[1].mxu1 }
 0x11b   :  { %v567_v44 = vcombine.high %v565_v39, %v565_v39  ;;  %v581_v45 = vrot.slane %v565_v39, %v557_v35  ;;  %v588_v46 = vrot.slane %v566_v22, %v557_v35  ;;  %v596_v47 = vcombine.high %v574_v40, %v574_v40  ;;  %609 = vst.msk [vmem:[%s1769_s3] sm:$0x1] %vm608_vm9, %v574_v40 }
 0x11c   :  { %v1135_v48 = vcombine.high %v1470_v42, %v1470_v42  ;;  %v1142_v49 = vrot.slane %v1470_v42, %v557_v35 }
 0x11d   :  { %v595_v50 = vrot.slane %v567_v44, %v557_v35  ;;  %v597_v51 = vcombine.high %v581_v45, %v581_v45  ;;  %v598_v52 = vcombine.high %v588_v46, %v588_v46  ;;  %610 = vst.msk [vmem:[%s1769_s3 + $0x2] sm:$0x1] %vm608_vm9, %v588_v46  ;;  %611 = vst.msk [vmem:[%s1769_s3 + $0x4] sm:$0x1] %vm608_vm9, %v596_v47 }
 0x11e   :  { %613 = vst.msk [vmem:[%s1769_s3 + $0x8] sm:$0x1] %vm608_vm9, %v581_v45  ;;  %v1149_v53 = vrot.slane %v1135_v48, %v557_v35  ;;  %v1150_v54 = vcombine.high %v1142_v49, %v1142_v49  ;;  %v1158_v55 = vrot.slane %v1142_v49, %v557_v35 }
 0x11f   :  { %v599_v56 = vcombine.high %v595_v50, %v595_v50  ;;  %612 = vst.msk [vmem:[%s1769_s3 + $0x6] sm:$0x1] %vm608_vm9, %v598_v52  ;;  %614 = vst.msk [vmem:[%s1769_s3 + $0xa] sm:$0x1] %vm608_vm9, %v595_v50 }
 0x120   :  { %615 = vst.msk [vmem:[%s1769_s3 + $0xc] sm:$0x1] %vm608_vm9, %v597_v51  ;;  %v1151_v57 = vcombine.high %v1149_v53, %v1149_v53  ;;  %v1165_v58 = vrot.slane %v1149_v53, %v557_v35  ;;  %v1172_v59 = vrot.slane %v1150_v54, %v557_v35  ;;  %v1180_v60 = vcombine.high %v1158_v55, %v1158_v55 }
 0x121   :  { %1192 = vst.msk [vmem:[%s1769_s3 + $0x1] sm:$0x1] %vm608_vm9, %v1158_v55  ;;  %616 = vst.msk [vmem:[%s1769_s3 + $0xe] sm:$0x1] %vm608_vm9, %v599_v56 }
 0x122   :  { %v1179_v61 = vrot.slane %v1151_v57, %v557_v35  ;;  %v1181_v62 = vcombine.high %v1165_v58, %v1165_v58  ;;  %v1182_v63 = vcombine.high %v1172_v59, %v1172_v59  ;;  %1193 = vst.msk [vmem:[%s1769_s3 + $0x3] sm:$0x1] %vm608_vm9, %v1172_v59  ;;  %1194 = vst.msk [vmem:[%s1769_s3 + $0x5] sm:$0x1] %vm608_vm9, %v1180_v60 }
 0x123   :  { %1196 = vst.msk [vmem:[%s1769_s3 + $0x9] sm:$0x1] %vm608_vm9, %v1165_v58 }
 0x124   :  { %v1183_v1 = vcombine.high %v1179_v61, %v1179_v61  ;;  %1195 = vst.msk [vmem:[%s1769_s3 + $0x7] sm:$0x1] %vm608_vm9, %v1182_v63  ;;  %1197 = vst.msk [vmem:[%s1769_s3 + $0xb] sm:$0x1] %vm608_vm9, %v1179_v61 }
 0x125   :  { %1198 = vst.msk [vmem:[%s1769_s3 + $0xd] sm:$0x1] %vm608_vm9, %v1181_v62 }
 0x126   :  { %1199 = vst.msk [vmem:[%s1769_s3 + $0xf] sm:$0x1] %vm608_vm9, %v1183_v1 }

// kernel: encoder_process_forward.4
= control target key start
LH: loop header
LB: loop body
LE: loop exit
PB: predicated region body
PF: predicated region fallthrough
CT: control target
= control target key end

     0   :  { %vm61_vm0 = vcmask 1041409   ;;  %v5152_v0 = vmov 0.0|0.0   ;;  %vm64_vm1 = vcmask 1042434   ;;  %vm67_vm2 = vcmask 1043459   ;;  %s6019_s1 = inlined_call_operand.vmem [shape: f32[32,8], index: 1, kind: input, shape index: {}]   ;;  %s6020_s0 = inlined_call_operand.vmem [shape: f32[8,4,32], index: 0, kind: input, shape index: {}]   ;;  %s6021_s2 = inlined_call_operand.vmem [shape: f32[1,8], index: 2, kind: input, shape index: {}]   ;;  %s6022_s8 = inlined_call_operand.vmem [shape: f32[8,4,8], index: 8, kind: output, shape index: {0}]   ;;  %s6023_s7 = inlined_call_operand.vmem [shape: f32[8,1], index: 7, kind: input, shape index: {}]   ;;  %s6024_s6 = inlined_call_operand.vmem [shape: f32[8,1], index: 6, kind: input, shape index: {}]   ;;  %s6025_s4 = inlined_call_operand.vmem [shape: f32[8,32], index: 4, kind: input, shape index: {}]   ;;  %s6026_s3 = inlined_call_operand.vmem [shape: f32[8,32], index: 3, kind: input, shape index: {}]   ;;  %s6027_s5 = inlined_call_operand.vmem [shape: f32[1,32], index: 5, kind: input, shape index: {}]   ;;  %s6028_s9 = inlined_call_operand.vmem [shape: f32[8,2,32], index: 9, kind: output, shape index: {1}]  }
   0x1   :  { %4955 = vmatprep.subr.bf16.mxu0 %v5152_v0  ;;  %4991 = vmatprep.subr.bf16.mxu1 %v5152_v0  ;;  %v31_v1 = vld [vmem:[%s6019_s1] sm:$0xff]  ;;  %v32_v2 = vld [vmem:[%s6019_s1 + $0x8] sm:$0xff]  ;;  %v33_v3 = vld [vmem:[%s6019_s1 + $0x10] sm:$0xff]  ;;  %vm70_vm3 = vcmask 1044484   ;;  %vm5153_vm4 = vmmov 0   ;;  %v5154_v8 = vmov 0.0  }
   0x2   :  { %v85_v4 = vand.u32 4294901760, %v31_v1  ;;  %v88_v5 = vand.u32 4294901760, %v32_v2  ;;  %v34_v6 = vld [vmem:[%s6019_s1 + $0x18] sm:$0xff]  ;;  %v91_v7 = vand.u32 4294901760, %v33_v3  ;;  %4579 = vmatprep.mubr.msk.f32.mxu0 %vm5153_vm4, %v5154_v8  ;;  %4645 = vmatprep.mubr.msk.f32.mxu1 %vm5153_vm4, %v5154_v8  ;;  %v38_v9 = vld [vmem:[%s6020_s0] sm:$0x1] }
   0x3   :  { %v94_v10 = vand.u32 4294901760, %v34_v6  ;;  %v39_v11 = vld [vmem:[%s6020_s0 + $0x4] sm:$0x1]  ;;  %v40_v12 = vld [vmem:[%s6020_s0 + $0x8] sm:$0x1]  ;;  %vm73_vm5 = vcmask 1045509  }
   0x4   :  { %v5234_v13 = vpack.c.bf16 %v88_v5, %v85_v4  ;;  %v41_v14 = vld [vmem:[%s6020_s0 + $0xc] sm:$0x1]  ;;  %v42_v15 = vld [vmem:[%s6020_s0 + $0x10] sm:$0x1]  ;;  %v43_v16 = vld [vmem:[%s6020_s0 + $0x14] sm:$0x1]  ;;  %v5245_v17 = vsub.f32 %v31_v1, %v85_v4  ;;  %v5257_v25 = vsub.f32 %v32_v2, %v88_v5  ;;  %v5280_v38 = vsub.f32 %v33_v3, %v91_v7 }
   0x5   :  { %v44_v18 = vld [vmem:[%s6020_s0 + $0x18] sm:$0x1]  ;;  %v45_v19 = vld [vmem:[%s6020_s0 + $0x1c] sm:$0x1]  ;;  %v60_v20 = vrot.slane %v39_v11, 7  ;;  %v63_v21 = vrot.slane %v40_v12, 6  ;;  %v5255_v22 = vpack.c.bf16 %v94_v10, %v91_v7  ;;  %v5292_v44 = vsub.f32 %v34_v6, %v94_v10 }
   0x6   :  { %4957 = vmatpush3.bf16.msra.mxu0 %v5234_v13  ;;  %4993 = vmatpush3.bf16.msra.mxu1 %v5234_v13  ;;  %v66_v23 = vrot.slane %v41_v14, 5  ;;  %v69_v24 = vrot.slane %v42_v15, 4  ;;  %v72_v27 = vrot.slane %v43_v16, 3  ;;  %v75_v28 = vrot.slane %v44_v18, 2  ;;  %v636_v29 = vld [vmem:[%s6020_s0 + $0x1] sm:$0x1] }
   0x7   :  { %4958 = vmatprep.subr.bf16.mxu0 %v5152_v0  ;;  %4994 = vmatprep.subr.bf16.mxu1 %v5152_v0  ;;  %v62_v26 = vsel %vm61_vm0, %v60_v20, %v38_v9  ;;  %v637_v30 = vld [vmem:[%s6020_s0 + $0x5] sm:$0x1]  ;;  %vm76_vm6 = vcmask 1046534   ;;  %v78_v32 = vrot.slane %v45_v19, 1  ;;  %v166_v33 = vand.u32 4294901760, %v5245_v17 }
   0x8   :  { %v65_v31 = vsel %vm64_vm1, %v63_v21, %v62_v26  ;;  %v638_v34 = vld [vmem:[%s6020_s0 + $0x9] sm:$0x1]  ;;  %vm79_vm7 = vcmask 1047559   ;;  %vm81_vm8 = vcmask 261120   ;;  %v639_v36 = vld [vmem:[%s6020_s0 + $0xd] sm:$0x1] }
   0x9   :  { %v68_v35 = vsel %vm67_vm2, %v66_v23, %v65_v31  ;;  %v640_v37 = vld [vmem:[%s6020_s0 + $0x11] sm:$0x1]  ;;  %v173_v40 = vand.u32 4294901760, %v5257_v25  ;;  %v641_v41 = vld [vmem:[%s6020_s0 + $0x15] sm:$0x1]  ;;  %v652_v43 = vrot.slane %v637_v30, 7  ;;  %v167_v51 = vsub.f32 %v5245_v17, %v166_v33 }
   0xa   :  { %4960 = vmatpush3.bf16.msra.mxu0 %v5255_v22  ;;  %4996 = vmatpush3.bf16.msra.mxu1 %v5255_v22  ;;  %v71_v39 = vsel %vm70_vm3, %v69_v24, %v68_v35  ;;  %v642_v42 = vld [vmem:[%s6020_s0 + $0x19] sm:$0x1]  ;;  %v643_v46 = vld [vmem:[%s6020_s0 + $0x1d] sm:$0x1]  ;;  %v654_v47 = vrot.slane %v638_v34, 6  ;;  %v656_v48 = vrot.slane %v639_v36, 5 }
   0xb   :  { %4961 = vmatprep.subr.bf16.mxu0 %v5152_v0  ;;  %4997 = vmatprep.subr.bf16.mxu1 %v5152_v0  ;;  %v74_v45 = vsel %vm73_vm5, %v72_v27, %v71_v39  ;;  %v658_v49 = vrot.slane %v640_v37, 4  ;;  %v653_v52 = vsel %vm61_vm0, %v652_v43, %v636_v29  ;;  %v660_v55 = vrot.slane %v641_v41, 3  ;;  %v1220_v21 = vld [vmem:[%s6020_s0 + $0x6] sm:$0x1]  ;;  %v1221_v26 = vld [vmem:[%s6020_s0 + $0xa] sm:$0x1] }
   0xc   :  { %v77_v50 = vsel %vm76_vm6, %v75_v28, %v74_v45  ;;  %v655_v54 = vsel %vm64_vm1, %v654_v47, %v653_v52  ;;  %v662_v56 = vrot.slane %v642_v42, 2  ;;  %v174_v58 = vsub.f32 %v5257_v25, %v173_v40  ;;  %v1219_v30 = vld [vmem:[%s6020_s0 + $0x2] sm:$0x1]  ;;  %v1803_v31 = vld [vmem:[%s6020_s0 + $0x7] sm:$0x1] }
   0xd   :  { %v80_v53 = vsel %vm79_vm7, %v78_v32, %v77_v50  ;;  %v657_v59 = vsel %vm67_vm2, %v656_v48, %v655_v54  ;;  %v664_v60 = vrot.slane %v643_v46, 1  ;;  %v180_v63 = vand.u32 4294901760, %v5280_v38  ;;  %v1222_v34 = vld [vmem:[%s6020_s0 + $0xe] sm:$0x1]  ;;  %v1804_v39 = vld [vmem:[%s6020_s0 + $0xb] sm:$0x1] }
   0xe   :  { %v82_v57 = vsel %vm81_vm8, %v80_v53, 0  ;;  %v659_v62 = vsel %vm70_vm3, %v658_v49, %v657_v59  ;;  %v187_v1 = vand.u32 4294901760, %v5292_v44  ;;  %v168_v4 = vand.u32 4294901760, %v167_v51  ;;  %v1223_v42 = vld [vmem:[%s6020_s0 + $0x12] sm:$0x1] }
   0xf   :  { %v5312_v61 = vand.u32 4294901760, %v82_v57  ;;  %v661_v2 = vsel %vm73_vm5, %v660_v55, %v659_v62  ;;  %v175_v6 = vand.u32 4294901760, %v174_v58  ;;  %v181_v9 = vsub.f32 %v5280_v38, %v180_v63  ;;  %v1802_v45 = vld [vmem:[%s6020_s0 + $0x3] sm:$0x1]  ;;  %v1805_v47 = vld [vmem:[%s6020_s0 + $0xf] sm:$0x1] }
  0x10   :  { %v663_v5 = vsel %vm76_vm6, %v662_v56, %v661_v2  ;;  %v188_v10 = vsub.f32 %v5292_v44, %v187_v1  ;;  %v1235_v27 = vrot.slane %v1220_v21, 7  ;;  %v1237_v35 = vrot.slane %v1221_v26, 6  ;;  %v1224_v50 = vld [vmem:[%s6020_s0 + $0x16] sm:$0x1]  ;;  %v1806_v54 = vld [vmem:[%s6020_s0 + $0x13] sm:$0x1] }
  0x11   :  { %v5319_v3 = vsub.f32 %v82_v57, %v5312_v61  ;;  %v665_v7 = vsel %vm79_vm7, %v664_v60, %v663_v5  ;;  %v5336_v16 = vpack.c.bf16 %v175_v6, %v168_v4  ;;  %v182_v19 = vand.u32 4294901760, %v181_v9  ;;  %v1225_v56 = vld [vmem:[%s6020_s0 + $0x1a] sm:$0x1]  ;;  %v1807_v60 = vld [vmem:[%s6020_s0 + $0x17] sm:$0x1] }
  0x12   :  { %v666_v12 = vsel %vm81_vm8, %v665_v7, 0  ;;  %v189_v20 = vand.u32 4294901760, %v188_v10  ;;  %v1236_v36 = vsel %vm61_vm0, %v1235_v27, %v1219_v30  ;;  %v5370_v37 = vpack.c.bf16 %v5257_v25, %v5245_v17  ;;  %v1226_v2 = vld [vmem:[%s6020_s0 + $0x1e] sm:$0x1]  ;;  %v1808_v7 = vld [vmem:[%s6020_s0 + $0x1b] sm:$0x1] }
  0x13   :  { %v155_v11 = vand.u32 4294901760, %v5319_v3  ;;  %v5331_v14 = vand.u32 4294901760, %v666_v12  ;;  %v1818_v41 = vrot.slane %v1803_v31, 7  ;;  %v1239_v43 = vrot.slane %v1222_v34, 5  ;;  %v5604_v31 = vld [vmem:[%s6021_s2] ss:$0 sm:$0xff] }
  0x14   :  { %v5352_v29 = vpack.c.bf16 %v189_v20, %v182_v19  ;;  %v1238_v46 = vsel %vm64_vm1, %v1237_v35, %v1236_v36  ;;  %v1820_v48 = vrot.slane %v1804_v39, 6  ;;  %v5394_v49 = vpack.c.bf16 %v5292_v44, %v5280_v38  ;;  %v1809_v19 = vld [vmem:[%s6020_s0 + $0x1f] sm:$0x1] }
  0x15   :  { %v156_v15 = vsub.f32 %v5319_v3, %v155_v11  ;;  %v5339_v18 = vsub.f32 %v666_v12, %v5331_v14  ;;  %v1241_v51 = vrot.slane %v1223_v42, 4  ;;  %v1819_v52 = vsel %vm61_vm0, %v1818_v41, %v1802_v45 }
  0x16   :  { %v1240_v53 = vsel %vm67_vm2, %v1239_v43, %v1238_v46  ;;  %v1822_v55 = vrot.slane %v1805_v47, 5  ;;  %v1243_v57 = vrot.slane %v1224_v50, 3  ;;  %v1821_v58 = vsel %vm64_vm1, %v1820_v48, %v1819_v52 }
  0x17   :  { %v157_v23 = vand.u32 4294901760, %v156_v15  ;;  %v739_v24 = vand.u32 4294901760, %v5339_v18  ;;  %v1242_v59 = vsel %vm70_vm3, %v1241_v51, %v1240_v53  ;;  %v1824_v62 = vrot.slane %v1806_v54, 4 }
  0x18   :  { %v1245_v4 = vrot.slane %v1225_v56, 2  ;;  %v1823_v5 = vsel %vm67_vm2, %v1822_v55, %v1821_v58  ;;  %v1244_v6 = vsel %vm73_vm5, %v1243_v57, %v1242_v59  ;;  %v1826_v9 = vrot.slane %v1807_v60, 3 }
  0x19   :  { %4580 = vmatmul.mubr.f32.vlgmr.msra.gmra.mrb[0].mxu0 %v157_v23  ;;  %v740_v28 = vsub.f32 %v5339_v18, %v739_v24  ;;  %v1247_v10 = vrot.slane %v1226_v2, 1  ;;  %v1825_v12 = vsel %vm70_vm3, %v1824_v62, %v1823_v5  ;;  %v1828_v20 = vrot.slane %v1808_v7, 2 }
  0x1a   :  { %4963 = vmatpush3.bf16.msra.mxu0 %v5336_v16  ;;  %4590 = vmatprep.mubr.msk.f32.mxu0 %vm5153_vm4, %v5154_v8  ;;  %v1246_v15 = vsel %vm76_vm6, %v1245_v4, %v1244_v6  ;;  %v5450_v21 = vpack.c.bf16 %v173_v40, %v166_v33  ;;  %v1827_v23 = vsel %vm73_vm5, %v1826_v9, %v1825_v12  ;;  %v1830_v27 = vrot.slane %v1809_v19, 1 }
  0x1b   :  { %4964 = vmatprep.subr.bf16.mxu0 %v5152_v0  ;;  %v741_v32 = vand.u32 4294901760, %v740_v28  ;;  %v1248_v26 = vsel %vm79_vm7, %v1247_v10, %v1246_v15  ;;  %v1829_v17 = vsel %vm76_vm6, %v1828_v20, %v1827_v23  ;;  %v5467_v25 = vpack.c.bf16 %v187_v1, %v180_v63 }
  0x1c   :  { %v1249_v33 = vsel %vm81_vm8, %v1248_v26, 0  ;;  %v1831_v40 = vsel %vm79_vm7, %v1830_v27, %v1829_v17  ;;  %vm2385_vm9 = vcmask 64512   ;;  %vm627_vm10 = vcmask 57344  }
  0x1d   :  { %4646 = vmatmul.mubr.f32.vlgmr.msra.gmra.mrb[0].mxu1 %v741_v32  ;;  %v1832_v38 = vsel %vm81_vm8, %v1831_v40, 0  ;;  %vm3413_vm11 = vcmask 253952  }
  0x1e   :  { %4966 = vmatpush3.bf16.msra.mxu0 %v5352_v29  ;;  %4999 = vmatpush3.bf16.msra.mxu1 %v5336_v16  ;;  %v5494_v63 = vand.u32 4294901760, %v1832_v38 }
  0x1f   :  { %4967 = vmatprep.subr.bf16.mxu0 %v5152_v0  ;;  %5000 = vmatprep.subr.bf16.mxu1 %v5152_v0 }
  0x20   :  { %4656 = vmatprep.mubr.msk.f32.mxu1 %vm5153_vm4, %v5154_v8 }
  0x21   :  { %4591 = vmatmul.mubr.f32.vlgmr.msra.gmra.mrb[0].mxu0 %v5312_v61 }
  0x22   :  { %4969 = vmatpush3.bf16.msra.mxu0 %v5370_v37  ;;  %4601 = vmatprep.mubr.msk.f32.mxu0 %vm5153_vm4, %v5154_v8 }
  0x23   :  { %5002 = vmatpush3.bf16.msra.mxu1 %v5352_v29  ;;  %4970 = vmatprep.subr.bf16.mxu0 %v5152_v0 }
  0x24   :  { %5003 = vmatprep.subr.bf16.mxu1 %v5152_v0 }
  0x26   :  { %4657 = vmatmul.mubr.f32.vlgmr.msra.gmra.mrb[0].mxu1 %v5331_v14  ;;  %4972 = vmatpush3.bf16.msra.mxu0 %v5394_v49 }
  0x27   :  { %5005 = vmatpush3.bf16.msra.mxu1 %v5370_v37  ;;  %4973 = vmatprep.subr.bf16.mxu0 %v5152_v0 }
  0x28   :  { %5006 = vmatprep.subr.bf16.mxu1 %v5152_v0  ;;  %4667 = vmatprep.mubr.msk.f32.mxu1 %vm5153_vm4, %v5154_v8 }
  0x29   :  { %4602 = vmatmul.mubr.f32.vlgmr.msra.gmra.mrb[0].mxu0 %v5319_v3  ;;  %v5476_v3 = vand.u32 4294901760, %v1249_v33 }
  0x2a   :  { %4975 = vmatpush3.bf16.msra.mxu0 %v5234_v13  ;;  %4612 = vmatprep.mubr.msk.f32.mxu0 %vm5153_vm4, %v5154_v8 }
  0x2b   :  { %5008 = vmatpush3.bf16.msra.mxu1 %v5394_v49  ;;  %4976 = vmatprep.subr.bf16.mxu0 %v5152_v0  ;;  %v5489_v44 = vsub.f32 %v1249_v33, %v5476_v3 }
  0x2c   :  { %5009 = vmatprep.subr.bf16.mxu1 %v5152_v0 }
  0x2d   :  { %v1322_v1 = vand.u32 4294901760, %v5489_v44 }
  0x2e   :  { %4668 = vmatmul.mubr.f32.vlgmr.msra.gmra.mrb[0].mxu1 %v5339_v18  ;;  %4978 = vmatpush3.bf16.msra.mxu0 %v5255_v22 }
  0x2f   :  { %5011 = vmatpush3.bf16.msra.mxu1 %v5234_v13  ;;  %4979 = vmatprep.subr.bf16.mxu0 %v5152_v0  ;;  %v1323_v18 = vsub.f32 %v5489_v44, %v1322_v1 }
  0x30   :  { %5012 = vmatprep.subr.bf16.mxu1 %v5152_v0  ;;  %4678 = vmatprep.mubr.msk.f32.mxu1 %vm5153_vm4, %v5154_v8 }
  0x31   :  { %4613 = vmatmul.mubr.f32.vlgmr.msra.gmra.mrb[0].mxu0 %v155_v11  ;;  %v5503_v11 = vsub.f32 %v1832_v38, %v5494_v63  ;;  %v1324_v28 = vand.u32 4294901760, %v1323_v18 }
  0x32   :  { %4981 = vmatpush3.bf16.msra.mxu0 %v5450_v21  ;;  %4623 = vmatprep.mubr.msk.f32.mxu0 %vm5153_vm4, %v5154_v8 }
  0x33   :  { %5014 = vmatpush3.bf16.msra.mxu1 %v5255_v22  ;;  %4982 = vmatprep.subr.bf16.mxu0 %v5152_v0 }
  0x34   :  { %5015 = vmatprep.subr.bf16.mxu1 %v5152_v0 }
  0x36   :  { %4679 = vmatmul.mubr.f32.vlgmr.msra.gmra.mrb[0].mxu1 %v739_v24  ;;  %4984 = vmatpush3.bf16.msra.mxu0 %v5467_v25  ;;  %v1905_v24 = vand.u32 4294901760, %v5503_v11 }
  0x37   :  { %5017 = vmatpush3.bf16.msra.mxu1 %v5450_v21  ;;  %4985 = vmatprep.subr.bf16.mxu0 %v5152_v0 }
  0x38   :  { %5018 = vmatprep.subr.bf16.mxu1 %v5152_v0  ;;  %4689 = vmatprep.mubr.msk.f32.mxu1 %vm5153_vm4, %v5154_v8 }
  0x39   :  { %4624 = vmatmul.mubr.f32.vlgmr.msra.gmra.mrb[0].mxu0 %v5312_v61 }
  0x3a   :  { %4987 = vmatpush3.bf16.msra.mxu0 %v5234_v13  ;;  %4634 = vmatprep.mubr.msk.f32.mxu0 %vm5153_vm4, %v5154_v8 }
  0x3b   :  { %5020 = vmatpush3.bf16.msra.mxu1 %v5467_v25  ;;  %4988 = vmatprep.subr.bf16.mxu0 %v5152_v0 }
  0x3c   :  { %5021 = vmatprep.subr.bf16.mxu1 %v5152_v0 }
  0x3e   :  { %4690 = vmatmul.mubr.f32.vlgmr.msra.gmra.mrb[0].mxu1 %v5331_v14  ;;  %4990 = vmatpush3.bf16.msra.mxu0 %v5255_v22 }
  0x3f   :  { %5023 = vmatpush3.bf16.msra.mxu1 %v5234_v13  ;;  %4700 = vmatprep.mubr.msk.f32.mxu1 %vm5153_vm4, %v5154_v8 }
  0x40   :  { %5024 = vmatprep.subr.bf16.mxu1 %v5152_v0  ;;  %5027 = vmatprep.subr.bf16.mxu0 %v5152_v0 }
  0x41   :  { %4635 = vmatmul.mubr.f32.vlgmr.msra.gmra.mrb[0].mxu0 %v5312_v61  ;;  %v1906_v61 = vsub.f32 %v5503_v11, %v1905_v24 }
  0x42   :  { %5029 = vmatpush3.bf16.msra.mxu0 %v5234_v13  ;;  %4711 = vmatprep.mubr.msk.f32.mxu0 %vm5153_vm4, %v5154_v8 }
  0x43   :  { %5026 = vmatpush3.bf16.msra.mxu1 %v5255_v22  ;;  %5030 = vmatprep.subr.bf16.mxu0 %v5152_v0  ;;  %v1907_v30 = vand.u32 4294901760, %v1906_v61 }
  0x44   :  { %5063 = vmatprep.subr.bf16.mxu1 %v5152_v0 }
  0x46   :  { %4701 = vmatmul.mubr.f32.vlgmr.msra.gmra.mrb[0].mxu1 %v5331_v14  ;;  %5032 = vmatpush3.bf16.msra.mxu0 %v5255_v22 }
  0x47   :  { %5065 = vmatpush3.bf16.msra.mxu1 %v5234_v13  ;;  %4777 = vmatprep.mubr.msk.f32.mxu1 %vm5153_vm4, %v5154_v8 }
  0x48   :  { %5066 = vmatprep.subr.bf16.mxu1 %v5152_v0  ;;  %5033 = vmatprep.subr.bf16.mxu0 %v5152_v0 }
  0x49   :  { %4712 = vmatmul.mubr.f32.vlgmr.msra.gmra.mrb[2].mxu0 %v1324_v28 }
  0x4a   :  { %5035 = vmatpush3.bf16.msra.mxu0 %v5336_v16  ;;  %4722 = vmatprep.mubr.msk.f32.mxu0 %vm5153_vm4, %v5154_v8 }
  0x4b   :  { %5068 = vmatpush3.bf16.msra.mxu1 %v5255_v22  ;;  %5036 = vmatprep.subr.bf16.mxu0 %v5152_v0 }
  0x4c   :  { %5069 = vmatprep.subr.bf16.mxu1 %v5152_v0 }
  0x4e   :  { %4778 = vmatmul.mubr.f32.vlgmr.msra.gmra.mrb[2].mxu1 %v1907_v30  ;;  %5038 = vmatpush3.bf16.msra.mxu0 %v5352_v29 }
  0x4f   :  { %5071 = vmatpush3.bf16.msra.mxu1 %v5336_v16  ;;  %4788 = vmatprep.mubr.msk.f32.mxu1 %vm5153_vm4, %v5154_v8  ;;  %v574_v16 = vlaneseq }
  0x50   :  { %5072 = vmatprep.subr.bf16.mxu1 %v5152_v0  ;;  %5039 = vmatprep.subr.bf16.mxu0 %v5152_v0 }
  0x51   :  { %4723 = vmatmul.mubr.f32.vlgmr.msra.gmra.mrb[2].mxu0 %v5476_v3 }
  0x52   :  { %5041 = vmatpush3.bf16.msra.mxu0 %v5370_v37  ;;  %4733 = vmatprep.mubr.msk.f32.mxu0 %vm5153_vm4, %v5154_v8 }
  0x53   :  { %5074 = vmatpush3.bf16.msra.mxu1 %v5352_v29  ;;  %5042 = vmatprep.subr.bf16.mxu0 %v5152_v0  ;;  %v575_v29 = vshrl.u32 %v574_v16, 7 }
  0x54   :  { %5075 = vmatprep.subr.bf16.mxu1 %v5152_v0 }
  0x56   :  { %4789 = vmatmul.mubr.f32.vlgmr.msra.gmra.mrb[2].mxu1 %v5494_v63  ;;  %5044 = vmatpush3.bf16.msra.mxu0 %v5394_v49 }
  0x57   :  { %5077 = vmatpush3.bf16.msra.mxu1 %v5370_v37  ;;  %4799 = vmatprep.mubr.msk.f32.mxu1 %vm5153_vm4, %v5154_v8 }
  0x58   :  { %5078 = vmatprep.subr.bf16.mxu1 %v5152_v0  ;;  %5045 = vmatprep.subr.bf16.mxu0 %v5152_v0 }
  0x59   :  { %4734 = vmatmul.mubr.f32.vlgmr.msra.gmra.mrb[2].mxu0 %v5489_v44 }
  0x5a   :  { %5047 = vmatpush3.bf16.msra.mxu0 %v5234_v13  ;;  %4744 = vmatprep.mubr.msk.f32.mxu0 %vm5153_vm4, %v5154_v8 }
  0x5b   :  { %5080 = vmatpush3.bf16.msra.mxu1 %v5394_v49  ;;  %5048 = vmatprep.subr.bf16.mxu0 %v5152_v0 }
  0x5c   :  { %5081 = vmatprep.subr.bf16.mxu1 %v5152_v0 }
  0x5e   :  { %4800 = vmatmul.mubr.f32.vlgmr.msra.gmra.mrb[2].mxu1 %v5503_v11  ;;  %5050 = vmatpush3.bf16.msra.mxu0 %v5255_v22 }
  0x5f   :  { %5083 = vmatpush3.bf16.msra.mxu1 %v5234_v13  ;;  %4810 = vmatprep.mubr.msk.f32.mxu1 %vm5153_vm4, %v5154_v8 }
  0x60   :  { %5084 = vmatprep.subr.bf16.mxu1 %v5152_v0  ;;  %5051 = vmatprep.subr.bf16.mxu0 %v5152_v0 }
  0x61   :  { %4745 = vmatmul.mubr.f32.vlgmr.msra.gmra.mrb[2].mxu0 %v1322_v1 }
  0x62   :  { %5053 = vmatpush3.bf16.msra.mxu0 %v5450_v21  ;;  %4755 = vmatprep.mubr.msk.f32.mxu0 %vm5153_vm4, %v5154_v8 }
  0x63   :  { %5086 = vmatpush3.bf16.msra.mxu1 %v5255_v22  ;;  %5054 = vmatprep.subr.bf16.mxu0 %v5152_v0 }
  0x64   :  { %5087 = vmatprep.subr.bf16.mxu1 %v5152_v0 }
  0x66   :  { %4811 = vmatmul.mubr.f32.vlgmr.msra.gmra.mrb[2].mxu1 %v1905_v24  ;;  %5056 = vmatpush3.bf16.msra.mxu0 %v5467_v25 }
  0x67   :  { %5089 = vmatpush3.bf16.msra.mxu1 %v5450_v21  ;;  %4821 = vmatprep.mubr.msk.f32.mxu1 %vm5153_vm4, %v5154_v8 }
  0x68   :  { %5090 = vmatprep.subr.bf16.mxu1 %v5152_v0  ;;  %5057 = vmatprep.subr.bf16.mxu0 %v5152_v0 }
  0x69   :  { %4756 = vmatmul.mubr.f32.vlgmr.msra.gmra.mrb[2].mxu0 %v5476_v3 }
  0x6a   :  { %5059 = vmatpush3.bf16.msra.mxu0 %v5234_v13  ;;  %4766 = vmatprep.mubr.msk.f32.mxu0 %vm5153_vm4, %v5154_v8 }
  0x6b   :  { %5092 = vmatpush3.bf16.msra.mxu1 %v5467_v25  ;;  %5060 = vmatprep.subr.bf16.mxu0 %v5152_v0 }
  0x6c   :  { %5093 = vmatprep.subr.bf16.mxu1 %v5152_v0 }
  0x6e   :  { %4822 = vmatmul.mubr.f32.vlgmr.msra.gmra.mrb[2].mxu1 %v5494_v63  ;;  %5062 = vmatpush3.bf16.msra.mxu0 %v5255_v22 }
  0x6f   :  { %5095 = vmatpush3.bf16.msra.mxu1 %v5234_v13  ;;  %4832 = vmatprep.mubr.msk.f32.mxu1 %vm5153_vm4, %v5154_v8  ;;  %v5155_v13 = vmov 1966171168  }
  0x70   :  { %5096 = vmatprep.subr.bf16.mxu1 %v5152_v0  ;;  %4835 = vmatprep.subr.mxu0 %v5154_v8  ;;  %v572_v14 = vunpack.c.l.s4 %v5155_v13 }
  0x71   :  { %4767 = vmatmul.mubr.f32.vlgmr.msra.gmra.mrb[2].mxu0 %v5476_v3 }
  0x72   :  { %4837 = vmatprep.mubr.msk.f32.mxu0 %vm5153_vm4, %v5154_v8  ;;  %v573_v0 = vunpack.c.0.s8 %v572_v14 }
  0x73   :  { %5098 = vmatpush3.bf16.msra.mxu1 %v5255_v22 }
  0x74   :  { %4840 = vmatprep.subr.mxu1 %v5154_v8  ;;  %v5606_v32 = vsub.s32 %v573_v0, %v575_v29 }
  0x76   :  { %4833 = vmatmul.mubr.f32.vlgmr.msra.gmra.mrb[2].mxu1 %v5494_v63 }
  0x77   :  { %4842 = vmatprep.mubr.msk.f32.mxu1 %vm5153_vm4, %v5154_v8 }
 0x114   :  { %v565_v22 = vpop.f32.mrb[0].mxu0 }
 0x115   :  { %v5609_v34 = vadd.f32 %v5604_v31, %v565_v22  ;;  %v4636_v35 = vpop.f32.mrb[1].mxu0 }
 0x117   :  { %v570_v36 = vcombine.high %v5609_v34, %v5609_v34  ;;  %v577_v37 = vrot.slane %v5609_v34, %v5606_v32  ;;  %v2386_v39 = vsel %vm2385_vm9, %v5609_v34, 0.0 }
 0x118   :  { %2387 = vadd.xlane.f32.xlu0 %v2386_v39 }
 0x119   :  { %v584_v41 = vrot.slane %v570_v36, %v5606_v32  ;;  %v585_v42 = vcombine.high %v577_v37, %v577_v37  ;;  %v593_v43 = vrot.slane %v577_v37, %v5606_v32  ;;  %v1149_v45 = vpop.f32.mrb[0].mxu1 }
 0x11a   :  { %v5620_v46 = vadd.f32 %v5604_v31, %v1149_v45  ;;  %v4702_v47 = vpop.f32.mrb[1].mxu1 }
 0x11b   :  { %v586_v48 = vcombine.high %v584_v41, %v584_v41  ;;  %v600_v49 = vrot.slane %v584_v41, %v5606_v32  ;;  %v607_v50 = vrot.slane %v585_v42, %v5606_v32  ;;  %v615_v51 = vcombine.high %v593_v43, %v593_v43  ;;  %628 = vst.msk [vmem:[%s6022_s8] sm:$0x1] %vm627_vm10, %v593_v43 }
 0x11c   :  { %v1154_v52 = vcombine.high %v5620_v46, %v5620_v46  ;;  %v1161_v53 = vrot.slane %v5620_v46, %v5606_v32  ;;  %v2390_v54 = vsel %vm2385_vm9, %v5620_v46, 0.0  ;;  %v5156_v42 = vmov 0  }
 0x11d   :  { %v614_v55 = vrot.slane %v586_v48, %v5606_v32  ;;  %v616_v56 = vcombine.high %v600_v49, %v600_v49  ;;  %v617_v57 = vcombine.high %v607_v50, %v607_v50  ;;  %629 = vst.msk [vmem:[%s6022_s8 + $0x4] sm:$0x1] %vm627_vm10, %v607_v50  ;;  %630 = vst.msk [vmem:[%s6022_s8 + $0x8] sm:$0x1] %vm627_vm10, %v615_v51  ;;  %2391 = vadd.xlane.f32.xlu0 %v2390_v54 }
 0x11e   :  { %632 = vst.msk [vmem:[%s6022_s8 + $0x10] sm:$0x1] %vm627_vm10, %v600_v49  ;;  %v1168_v58 = vrot.slane %v1154_v52, %v5606_v32  ;;  %v1169_v59 = vcombine.high %v1161_v53, %v1161_v53  ;;  %v1177_v60 = vrot.slane %v1161_v53, %v5606_v32  ;;  %5148 = vset.pattern.permute.xlu0 %v5156_v42 }
 0x11f   :  { %v618_v62 = vcombine.high %v614_v55, %v614_v55  ;;  %631 = vst.msk [vmem:[%s6022_s8 + $0xc] sm:$0x1] %vm627_vm10, %v617_v57  ;;  %633 = vst.msk [vmem:[%s6022_s8 + $0x14] sm:$0x1] %vm627_vm10, %v614_v55  ;;  %5149 = vset.pattern.permute.xlu1 %v5156_v42 }
 0x120   :  { %634 = vst.msk [vmem:[%s6022_s8 + $0x18] sm:$0x1] %vm627_vm10, %v616_v56  ;;  %v1170_v2 = vcombine.high %v1168_v58, %v1168_v58  ;;  %v1184_v4 = vrot.slane %v1168_v58, %v5606_v32  ;;  %v1191_v5 = vrot.slane %v1169_v59, %v5606_v32  ;;  %v1199_v6 = vcombine.high %v1177_v60, %v1177_v60 }
 0x121   :  { %1211 = vst.msk [vmem:[%s6022_s8 + $0x1] sm:$0x1] %vm627_vm10, %v1177_v60  ;;  %635 = vst.msk [vmem:[%s6022_s8 + $0x1c] sm:$0x1] %vm627_vm10, %v618_v62 }
 0x122   :  { %v1198_v7 = vrot.slane %v1170_v2, %v5606_v32  ;;  %v1200_v9 = vcombine.high %v1184_v4, %v1184_v4  ;;  %v1201_v10 = vcombine.high %v1191_v5, %v1191_v5  ;;  %1212 = vst.msk [vmem:[%s6022_s8 + $0x5] sm:$0x1] %vm627_vm10, %v1191_v5  ;;  %1213 = vst.msk [vmem:[%s6022_s8 + $0x9] sm:$0x1] %vm627_vm10, %v1199_v6  ;;  %v36_v5 = vld [vmem:[%s6024_s6] sm:$0xff] }
 0x123   :  { %1215 = vst.msk [vmem:[%s6022_s8 + $0x11] sm:$0x1] %vm627_vm10, %v1184_v4  ;;  %v37_v4 = vld [vmem:[%s6023_s7] sm:$0xff] }
 0x124   :  { %v1202_v12 = vcombine.high %v1198_v7, %v1198_v7  ;;  %1214 = vst.msk [vmem:[%s6022_s8 + $0xd] sm:$0x1] %vm627_vm10, %v1201_v10  ;;  %1216 = vst.msk [vmem:[%s6022_s8 + $0x15] sm:$0x1] %vm627_vm10, %v1198_v7  ;;  %v2432_v6 = vld [vmem:[%s6025_s4] sm:$0xff] }
 0x125   :  { %1217 = vst.msk [vmem:[%s6022_s8 + $0x19] sm:$0x1] %vm627_vm10, %v1200_v9  ;;  %v5806_v7 = vand.u32 4294901760, %v2432_v6 }
 0x126   :  { %1218 = vst.msk [vmem:[%s6022_s8 + $0x1d] sm:$0x1] %vm627_vm10, %v1202_v12 }
 0x127   :  { %v5809_v9 = vsub.f32 %v2432_v6, %v5806_v7  ;;  %4836 = vmatpush3.msra.mxu0 %v5806_v7 }
 0x128   :  { %4845 = vmatprep.subr.mxu0 %v5154_v8 }
 0x129   :  { %v5814_v10 = vand.u32 4294901760, %v5809_v9 }
 0x12b   :  { %v2533_v12 = vsub.f32 %v5809_v9, %v5814_v10 }
 0x144   :  { %v1732_v15 = vpop.f32.mrb[2].mxu0 }
 0x145   :  { %v5701_v19 = vadd.f32 %v5604_v31, %v1732_v15  ;;  %v4768_v20 = vpop.f32.mrb[3].mxu0  ;;  %v5818_v15 = vand.u32 4294901760, %v2533_v12 }
 0x147   :  { %v1737_v21 = vcombine.high %v5701_v19, %v5701_v19  ;;  %v1744_v23 = vrot.slane %v5701_v19, %v5606_v32  ;;  %v2394_v26 = vsel %vm2385_vm9, %v5701_v19, 0.0  ;;  %4841 = vmatpush3.msra.mxu1 %v5818_v15 }
 0x148   :  { %2395 = vadd.xlane.f32.xlu1 %v2394_v26  ;;  %4850 = vmatprep.subr.mxu1 %v5154_v8 }
 0x149   :  { %v1751_v27 = vrot.slane %v1737_v21, %v5606_v32  ;;  %v1752_v17 = vcombine.high %v1744_v23, %v1744_v23  ;;  %v1760_v25 = vrot.slane %v1744_v23, %v5606_v32  ;;  %v2315_v33 = vpop.f32.mrb[2].mxu1 }
 0x14a   :  { %v5102_v40 = vadd.f32 %v5604_v31, %v2315_v33  ;;  %v4834_v3 = vpop.f32.mrb[3].mxu1 }
 0x14b   :  { %v1753_v38 = vcombine.high %v1751_v27, %v1751_v27  ;;  %v1767_v44 = vrot.slane %v1751_v27, %v5606_v32  ;;  %v1774_v63 = vrot.slane %v1752_v17, %v5606_v32  ;;  %v1782_v1 = vcombine.high %v1760_v25, %v1760_v25  ;;  %1794 = vst.msk [vmem:[%s6022_s8 + $0x2] sm:$0x1] %vm627_vm10, %v1760_v25 }
 0x14c   :  { %v2320_v11 = vcombine.high %v5102_v40, %v5102_v40  ;;  %v2327_v18 = vrot.slane %v5102_v40, %v5606_v32  ;;  %v2398_v24 = vsel %vm2385_vm9, %v5102_v40, 0.0 }
 0x14d   :  { %v1781_v28 = vrot.slane %v1753_v38, %v5606_v32  ;;  %v1783_v61 = vcombine.high %v1767_v44, %v1767_v44  ;;  %v1784_v30 = vcombine.high %v1774_v63, %v1774_v63  ;;  %1795 = vst.msk [vmem:[%s6022_s8 + $0x6] sm:$0x1] %vm627_vm10, %v1774_v63  ;;  %1796 = vst.msk [vmem:[%s6022_s8 + $0xa] sm:$0x1] %vm627_vm10, %v1782_v1  ;;  %2399 = vadd.xlane.f32.xlu1 %v2398_v24 }
 0x14e   :  { %1798 = vst.msk [vmem:[%s6022_s8 + $0x12] sm:$0x1] %vm627_vm10, %v1767_v44  ;;  %v2334_v13 = vrot.slane %v2320_v11, %v5606_v32  ;;  %v2335_v14 = vcombine.high %v2327_v18, %v2327_v18  ;;  %v2343_v16 = vrot.slane %v2327_v18, %v5606_v32 }
 0x14f   :  { %v1785_v0 = vcombine.high %v1781_v28, %v1781_v28  ;;  %1797 = vst.msk [vmem:[%s6022_s8 + $0xe] sm:$0x1] %vm627_vm10, %v1784_v30  ;;  %1799 = vst.msk [vmem:[%s6022_s8 + $0x16] sm:$0x1] %vm627_vm10, %v1781_v28 }
 0x150   :  { %1800 = vst.msk [vmem:[%s6022_s8 + $0x1a] sm:$0x1] %vm627_vm10, %v1783_v61  ;;  %v2336_v29 = vcombine.high %v2334_v13, %v2334_v13  ;;  %v2350_v31 = vrot.slane %v2334_v13, %v5606_v32  ;;  %v2357_v22 = vrot.slane %v2335_v14, %v5606_v32  ;;  %v2365_v35 = vcombine.high %v2343_v16, %v2343_v16 }
 0x151   :  { %2377 = vst.msk [vmem:[%s6022_s8 + $0x3] sm:$0x1] %vm627_vm10, %v2343_v16  ;;  %1801 = vst.msk [vmem:[%s6022_s8 + $0x1e] sm:$0x1] %vm627_vm10, %v1785_v0 }
 0x152   :  { %v2364_v36 = vrot.slane %v2336_v29, %v5606_v32  ;;  %v2366_v37 = vcombine.high %v2350_v31, %v2350_v31  ;;  %v2367_v39 = vcombine.high %v2357_v22, %v2357_v22  ;;  %2378 = vst.msk [vmem:[%s6022_s8 + $0x7] sm:$0x1] %vm627_vm10, %v2357_v22  ;;  %2379 = vst.msk [vmem:[%s6022_s8 + $0xb] sm:$0x1] %vm627_vm10, %v2365_v35 }
 0x153   :  { %2381 = vst.msk [vmem:[%s6022_s8 + $0x13] sm:$0x1] %vm627_vm10, %v2350_v31 }
 0x154   :  { %v2368_v41 = vcombine.high %v2364_v36, %v2364_v36  ;;  %2380 = vst.msk [vmem:[%s6022_s8 + $0xf] sm:$0x1] %vm627_vm10, %v2367_v39  ;;  %2382 = vst.msk [vmem:[%s6022_s8 + $0x17] sm:$0x1] %vm627_vm10, %v2364_v36 }
 0x155   :  { %2383 = vst.msk [vmem:[%s6022_s8 + $0x1b] sm:$0x1] %vm627_vm10, %v2366_v37 }
 0x156   :  { %2384 = vst.msk [vmem:[%s6022_s8 + $0x1f] sm:$0x1] %vm627_vm10, %v2368_v41 }
 0x1a5   :  { %v2388_v43 = vpop.xlane.xlu0 %2387 }
 0x1aa   :  { %v2392_v45 = vpop.xlane.xlu0 %2391 }
 0x1ab   :  { %v2393_v48 = vadd.f32 %v2392_v45, %v2388_v43 }
 0x1d5   :  { %v2396_v47 = vpop.xlane.xlu1 %2395 }
 0x1d6   :  { %v2397_v49 = vadd.f32 %v2396_v47, %v2393_v48 }
 0x1da   :  { %v2400_v50 = vpop.xlane.xlu1 %2399 }
 0x1db   :  { %v2401_v51 = vadd.f32 %v2400_v50, %v2397_v49 }
 0x1dd   :  { %v2403_v52 = vmul.f32 0.03125, %v2401_v51 }
 0x1df   :  { %v2410_v53 = vsub.f32 %v5620_v46, %v2403_v52  ;;  %v2404_v54 = vsub.f32 %v5609_v34, %v2403_v52  ;;  %v2422_v55 = vsub.f32 %v5102_v40, %v2403_v52  ;;  %v5789_v56 = vsub.f32 %v5701_v19, %v2403_v52  ;;  %v2431_v40 = vld [vmem:[%s6026_s3] sm:$0xff] }
 0x1e0   :  { %v5825_v44 = vand.u32 4294901760, %v2431_v40 }
 0x1e1   :  { %v2411_v57 = vmul.f32 %v2410_v53, %v2410_v53  ;;  %v2405_v58 = vmul.f32 %v2404_v54, %v2404_v54  ;;  %v2423_v62 = vmul.f32 %v2422_v55, %v2422_v55  ;;  %v2417_v2 = vmul.f32 %v5789_v56, %v5789_v56 }
 0x1e2   :  { %v5828_v28 = vsub.f32 %v2431_v40, %v5825_v44 }
 0x1e3   :  { %v2412_v59 = vsel %vm2385_vm9, %v2411_v57, 0.0  ;;  %v2406_v60 = vsel %vm2385_vm9, %v2405_v58, 0.0  ;;  %v2424_v46 = vsel %vm2385_vm9, %v2423_v62, 0.0  ;;  %v2418_v34 = vsel %vm2385_vm9, %v2417_v2, 0.0 }
 0x1e4   :  { %2413 = vadd.xlane.f32.xlu1 %v2412_v59  ;;  %2407 = vadd.xlane.f32.xlu0 %v2406_v60  ;;  %v5832_v16 = vand.u32 4294901760, %v5828_v28 }
 0x1e6   :  { %v2982_v36 = vsub.f32 %v5828_v28, %v5832_v16 }
 0x1e8   :  { %2425 = vadd.xlane.f32.xlu1 %v2424_v46  ;;  %2419 = vadd.xlane.f32.xlu0 %v2418_v34  ;;  %v5848_v43 = vand.u32 4294901760, %v2982_v36  ;;  %v4402_v36 = vld [vmem:[%s6027_s5] ss:$0 sm:$0xff] }
 0x1f9   :  { %2443 = vperm.xlu1 %5149, %v37_v4  }
 0x1fe   :  { %2437 = vperm.xlu0 %5148, %v36_v5  }
 0x271   :  { %v2414_v19 = vpop.xlane.xlu1 %2413  ;;  %v2408_v20 = vpop.xlane.xlu0 %2407 }
 0x272   :  { %v2415_v21 = vadd.f32 %v2414_v19, %v2408_v20 }
 0x275   :  { %v2420_v23 = vpop.xlane.xlu0 %2419  ;;  %v2426_v27 = vpop.xlane.xlu1 %2425 }
 0x276   :  { %v2421_v26 = vadd.f32 %v2420_v23, %v2415_v21 }
 0x278   :  { %v2427_v17 = vadd.f32 %v2426_v27, %v2421_v26 }
 0x279   :  { %v2444_v11 = vpop.permute.xlu1 %2443 }
 0x27a   :  { %v2428_v25 = vmul.f32 0.03125, %v2427_v17 }
 0x27c   :  { %v2429_v33 = vadd.f32 1e-05, %v2428_v25 }
 0x27d   :  { %v2438_v38 = vpop.permute.xlu0 %2437 }
 0x27e   :  { %5150 = vrsqrt.f32 %v2429_v33 }
 0x288   :  { %v5151_v3 = vpop.eup %5150 }
 0x289   :  { %v2434_v63 = vmul.f32 %v5151_v3, %v2404_v54  ;;  %v2447_v1 = vmul.f32 %v5151_v3, %v2410_v53  ;;  %v3425_v0 = vmul.f32 %v5151_v3, %v2422_v55  ;;  %v3422_v48 = vmul.f32 %v5151_v3, %v5789_v56 }
 0x28b   :  { %v2440_v18 = vmul.f32 %v2438_v38, %v2434_v63  ;;  %v2448_v24 = vmul.f32 %v2447_v1, %v2438_v38  ;;  %v3426_v37 = vmul.f32 %v3425_v0, %v2438_v38  ;;  %v3423_v52 = vmul.f32 %v3422_v48, %v2438_v38 }
 0x28d   :  { %v2446_v61 = vadd.f32 %v2444_v11, %v2440_v18  ;;  %v2449_v30 = vadd.f32 %v2448_v24, %v2444_v11  ;;  %v3427_v45 = vadd.f32 %v3426_v37, %v2444_v11  ;;  %v3424_v55 = vadd.f32 %v3423_v52, %v2444_v11 }
 0x28f   :  { %v2451_v13 = vsel %vm2385_vm9, %v2449_v30, 0  ;;  %v2900_v29 = vsel %vm2385_vm9, %v2446_v61, 0  ;;  %v3429_v49 = vsel %vm2385_vm9, %v3427_v45, 0  ;;  %v3878_v57 = vsel %vm2385_vm9, %v3424_v55, 0 }
 0x290   :  { %v2519_v14 = vand.u32 4294901760, %v2451_v13  ;;  %v5838_v22 = vand.u32 4294901760, %v2900_v29  ;;  %v5864_v50 = vand.u32 4294901760, %v3429_v49  ;;  %v3946_v58 = vand.u32 4294901760, %v3878_v57 }
 0x292   :  { %v2520_v31 = vsub.f32 %v2451_v13, %v2519_v14  ;;  %4843 = vmatmul.mubr.f32.vlgmr.msra.gmra.mrb[4].mxu1 %v2519_v14  ;;  %v2969_v41 = vsub.f32 %v2900_v29, %v5838_v22  ;;  %v3498_v53 = vsub.f32 %v3429_v49, %v5864_v50  ;;  %v3947_v60 = vsub.f32 %v3878_v57, %v3946_v58 }
 0x293   :  { %4851 = vmatpush3.msra.mxu1 %v5806_v7  ;;  %4852 = vmatprep.mubr.msk.f32.mxu1 %vm5153_vm4, %v5154_v8 }
 0x294   :  { %v2521_v35 = vand.u32 4294901760, %v2520_v31  ;;  %4860 = vmatprep.subr.mxu1 %v5154_v8  ;;  %v2970_v47 = vand.u32 4294901760, %v2969_v41  ;;  %v3499_v56 = vand.u32 4294901760, %v3498_v53  ;;  %v3948_v2 = vand.u32 4294901760, %v3947_v60 }
 0x296   :  { %4853 = vmatmul.mubr.f32.vlgmr.msra.gmra.mrb[6].mxu1 %v2521_v35  ;;  %v2522_v39 = vsub.f32 %v2520_v31, %v2521_v35  ;;  %v2971_v51 = vsub.f32 %v2969_v41, %v2970_v47  ;;  %v3500_v59 = vsub.f32 %v3498_v53, %v3499_v56  ;;  %v3949_v46 = vsub.f32 %v3947_v60, %v3948_v2 }
 0x297   :  { %4861 = vmatpush3.msra.mxu1 %v5806_v7  ;;  %4862 = vmatprep.mubr.msk.f32.mxu1 %vm5153_vm4, %v5154_v8 }
 0x298   :  { %v2523_v42 = vand.u32 4294901760, %v2522_v39  ;;  %4870 = vmatprep.subr.mxu1 %v5154_v8  ;;  %v2972_v54 = vand.u32 4294901760, %v2971_v51  ;;  %v3501_v62 = vand.u32 4294901760, %v3500_v59  ;;  %v3950_v34 = vand.u32 4294901760, %v3949_v46 }
 0x29a   :  { %4838 = vmatmul.mubr.f32.vlgmr.msra.gmra.mrb[4].mxu0 %v2523_v42  ;;  %4863 = vmatmul.mubr.f32.vlgmr.msra.gmra.mrb[8].mxu1 %v2519_v14 }
 0x29b   :  { %4846 = vmatpush3.msra.mxu0 %v5809_v9  ;;  %4847 = vmatprep.mubr.msk.f32.mxu0 %vm5153_vm4, %v5154_v8 }
 0x29c   :  { %4871 = vmatpush3.msra.mxu1 %v5848_v43  ;;  %4872 = vmatprep.mubr.msk.f32.mxu1 %vm5153_vm4, %v5154_v8 }
 0x29d   :  { %4855 = vmatprep.subr.mxu0 %v5154_v8  ;;  %4880 = vmatprep.subr.mxu1 %v5154_v8 }
 0x29e   :  { %4848 = vmatmul.mubr.f32.vlgmr.msra.gmra.mrb[6].mxu0 %v2520_v31  ;;  %4873 = vmatmul.mubr.f32.vlgmr.msra.gmra.mrb[10].mxu1 %v5838_v22 }
 0x29f   :  { %4856 = vmatpush3.msra.mxu0 %v5814_v10  ;;  %4857 = vmatprep.mubr.msk.f32.mxu0 %vm5153_vm4, %v5154_v8 }
 0x2a0   :  { %4881 = vmatpush3.msra.mxu1 %v5825_v44  ;;  %4882 = vmatprep.mubr.msk.f32.mxu1 %vm5153_vm4, %v5154_v8 }
 0x2a1   :  { %4865 = vmatprep.subr.mxu0 %v5154_v8  ;;  %4890 = vmatprep.subr.mxu1 %v5154_v8 }
 0x2a2   :  { %4858 = vmatmul.mubr.f32.vlgmr.msra.gmra.mrb[8].mxu0 %v2519_v14  ;;  %4883 = vmatmul.mubr.f32.vlgmr.msra.gmra.mrb[12].mxu1 %v2970_v47 }
 0x2a3   :  { %4866 = vmatpush3.msra.mxu0 %v5825_v44  ;;  %4867 = vmatprep.mubr.msk.f32.mxu0 %vm5153_vm4, %v5154_v8 }
 0x2a4   :  { %4891 = vmatpush3.msra.mxu1 %v5825_v44  ;;  %4892 = vmatprep.mubr.msk.f32.mxu1 %vm5153_vm4, %v5154_v8 }
 0x2a5   :  { %4875 = vmatprep.subr.mxu0 %v5154_v8  ;;  %4900 = vmatprep.subr.mxu1 %v5154_v8 }
 0x2a6   :  { %4868 = vmatmul.mubr.f32.vlgmr.msra.gmra.mrb[10].mxu0 %v2972_v54  ;;  %4893 = vmatmul.mubr.f32.vlgmr.msra.gmra.mrb[14].mxu1 %v5838_v22 }
 0x2a7   :  { %4876 = vmatpush3.msra.mxu0 %v5828_v28  ;;  %4877 = vmatprep.mubr.msk.f32.mxu0 %vm5153_vm4, %v5154_v8 }
 0x2a8   :  { %4901 = vmatpush3.msra.mxu1 %v5818_v15  ;;  %4902 = vmatprep.mubr.msk.f32.mxu1 %vm5153_vm4, %v5154_v8 }
 0x2a9   :  { %4885 = vmatprep.subr.mxu0 %v5154_v8  ;;  %4910 = vmatprep.subr.mxu1 %v5154_v8 }
 0x2aa   :  { %4878 = vmatmul.mubr.f32.vlgmr.msra.gmra.mrb[12].mxu0 %v2969_v41  ;;  %4903 = vmatmul.mubr.f32.vlgmr.msra.gmra.mrb[16].mxu1 %v5864_v50 }
 0x2ab   :  { %4886 = vmatpush3.msra.mxu0 %v5832_v16  ;;  %4887 = vmatprep.mubr.msk.f32.mxu0 %vm5153_vm4, %v5154_v8 }
 0x2ac   :  { %4911 = vmatpush3.msra.mxu1 %v5806_v7  ;;  %4912 = vmatprep.mubr.msk.f32.mxu1 %vm5153_vm4, %v5154_v8 }
 0x2ad   :  { %4895 = vmatprep.subr.mxu0 %v5154_v8  ;;  %4920 = vmatprep.subr.mxu1 %v5154_v8 }
 0x2ae   :  { %4888 = vmatmul.mubr.f32.vlgmr.msra.gmra.mrb[14].mxu0 %v5838_v22  ;;  %4913 = vmatmul.mubr.f32.vlgmr.msra.gmra.mrb[18].mxu1 %v3499_v56 }
 0x2af   :  { %4896 = vmatpush3.msra.mxu0 %v5806_v7  ;;  %4897 = vmatprep.mubr.msk.f32.mxu0 %vm5153_vm4, %v5154_v8 }
 0x2b0   :  { %4921 = vmatpush3.msra.mxu1 %v5806_v7  ;;  %4922 = vmatprep.mubr.msk.f32.mxu1 %vm5153_vm4, %v5154_v8 }
 0x2b1   :  { %4905 = vmatprep.subr.mxu0 %v5154_v8  ;;  %4930 = vmatprep.subr.mxu1 %v5154_v8 }
 0x2b2   :  { %4898 = vmatmul.mubr.f32.vlgmr.msra.gmra.mrb[16].mxu0 %v3501_v62  ;;  %4923 = vmatmul.mubr.f32.vlgmr.msra.gmra.mrb[20].mxu1 %v5864_v50 }
 0x2b3   :  { %4906 = vmatpush3.msra.mxu0 %v5809_v9  ;;  %4907 = vmatprep.mubr.msk.f32.mxu0 %vm5153_vm4, %v5154_v8 }
 0x2b4   :  { %4931 = vmatpush3.msra.mxu1 %v5848_v43  ;;  %4932 = vmatprep.mubr.msk.f32.mxu1 %vm5153_vm4, %v5154_v8 }
 0x2b5   :  { %4915 = vmatprep.subr.mxu0 %v5154_v8  ;;  %4940 = vmatprep.subr.mxu1 %v5154_v8 }
 0x2b6   :  { %4908 = vmatmul.mubr.f32.vlgmr.msra.gmra.mrb[18].mxu0 %v3498_v53  ;;  %4933 = vmatmul.mubr.f32.vlgmr.msra.gmra.mrb[22].mxu1 %v3946_v58 }
 0x2b7   :  { %4916 = vmatpush3.msra.mxu0 %v5814_v10  ;;  %4917 = vmatprep.mubr.msk.f32.mxu0 %vm5153_vm4, %v5154_v8 }
 0x2b8   :  { %4941 = vmatpush3.msra.mxu1 %v5825_v44  ;;  %4942 = vmatprep.mubr.msk.f32.mxu1 %vm5153_vm4, %v5154_v8 }
 0x2b9   :  { %4925 = vmatprep.subr.mxu0 %v5154_v8  ;;  %4950 = vmatprep.subr.mxu1 %v5154_v8 }
 0x2ba   :  { %4918 = vmatmul.mubr.f32.vlgmr.msra.gmra.mrb[20].mxu0 %v5864_v50  ;;  %4943 = vmatmul.mubr.f32.vlgmr.msra.gmra.mrb[24].mxu1 %v3948_v2 }
 0x2bb   :  { %4926 = vmatpush3.msra.mxu0 %v5825_v44  ;;  %4927 = vmatprep.mubr.msk.f32.mxu0 %vm5153_vm4, %v5154_v8 }
 0x2bc   :  { %4951 = vmatpush3.msra.mxu1 %v5825_v44  ;;  %4952 = vmatprep.mubr.msk.f32.mxu1 %vm5153_vm4, %v5154_v8 }
 0x2bd   :  { %4935 = vmatprep.subr.mxu0 %v5154_v8 }
 0x2be   :  { %4928 = vmatmul.mubr.f32.vlgmr.msra.gmra.mrb[22].mxu0 %v3950_v34  ;;  %4953 = vmatmul.mubr.f32.vlgmr.msra.gmra.mrb[26].mxu1 %v3946_v58 }
 0x2bf   :  { %4936 = vmatpush3.msra.mxu0 %v5828_v28  ;;  %4937 = vmatprep.mubr.msk.f32.mxu0 %vm5153_vm4, %v5154_v8 }
 0x2c0   :  { %4945 = vmatprep.subr.mxu0 %v5154_v8 }
 0x2c2   :  { %4938 = vmatmul.mubr.f32.vlgmr.msra.gmra.mrb[24].mxu0 %v3947_v60 }
 0x2c3   :  { %4946 = vmatpush3.msra.mxu0 %v5832_v16  ;;  %4947 = vmatprep.mubr.msk.f32.mxu0 %vm5153_vm4, %v5154_v8 }
 0x2c6   :  { %4948 = vmatmul.mubr.f32.vlgmr.msra.gmra.mrb[26].mxu0 %v3946_v58 }
 0x365   :  { %v2601_v4 = vpop.f32.mrb[4].mxu1 }
 0x366   :  { %v4844_v5 = vpop.f32.mrb[5].mxu1 }
 0x369   :  { %v2749_v6 = vpop.f32.mrb[6].mxu1 }
 0x36a   :  { %v4854_v7 = vpop.f32.mrb[7].mxu1 }
 0x36d   :  { %v2525_v9 = vpop.f32.mrb[4].mxu0  ;;  %v2895_v10 = vpop.f32.mrb[8].mxu1 }
 0x36e   :  { %v2602_v12 = vadd.f32 %v2601_v4, %v2525_v9  ;;  %v4839_v15 = vpop.f32.mrb[5].mxu0  ;;  %v4864_v19 = vpop.f32.mrb[9].mxu1 }
 0x371   :  { %v2675_v20 = vpop.f32.mrb[6].mxu0  ;;  %v3050_v21 = vpop.f32.mrb[10].mxu1 }
 0x372   :  { %v2676_v23 = vadd.f32 %v2675_v20, %v2602_v12  ;;  %v4849_v26 = vpop.f32.mrb[7].mxu0  ;;  %v4874_v27 = vpop.f32.mrb[11].mxu1 }
 0x374   :  { %v2750_v17 = vadd.f32 %v2749_v6, %v2676_v23 }
 0x375   :  { %v2823_v25 = vpop.f32.mrb[8].mxu0  ;;  %v3198_v33 = vpop.f32.mrb[12].mxu1 }
 0x376   :  { %v2824_v40 = vadd.f32 %v2823_v25, %v2750_v17  ;;  %v4859_v8 = vpop.f32.mrb[9].mxu0  ;;  %v4884_v3 = vpop.f32.mrb[13].mxu1 }
 0x378   :  { %v2896_v38 = vadd.f32 %v2895_v10, %v2824_v40 }
 0x379   :  { %v2974_v44 = vpop.f32.mrb[10].mxu0  ;;  %v3344_v63 = vpop.f32.mrb[14].mxu1 }
 0x37a   :  { %v2975_v1 = vadd.f32 %v2974_v44, %v2896_v38  ;;  %v4869_v11 = vpop.f32.mrb[11].mxu0  ;;  %v4894_v18 = vpop.f32.mrb[15].mxu1 }
 0x37c   :  { %v3051_v24 = vadd.f32 %v3050_v21, %v2975_v1 }
 0x37d   :  { %v3124_v28 = vpop.f32.mrb[12].mxu0  ;;  %v3579_v61 = vpop.f32.mrb[16].mxu1 }
 0x37e   :  { %v3125_v30 = vadd.f32 %v3124_v28, %v3051_v24  ;;  %v4879_v13 = vpop.f32.mrb[13].mxu0  ;;  %v4904_v14 = vpop.f32.mrb[17].mxu1 }
 0x380   :  { %v3199_v16 = vadd.f32 %v3198_v33, %v3125_v30 }
 0x381   :  { %v3272_v0 = vpop.f32.mrb[14].mxu0  ;;  %v3727_v29 = vpop.f32.mrb[18].mxu1 }
 0x382   :  { %v3273_v31 = vadd.f32 %v3272_v0, %v3199_v16  ;;  %v4889_v22 = vpop.f32.mrb[15].mxu0  ;;  %v4914_v35 = vpop.f32.mrb[19].mxu1 }
 0x384   :  { %v3345_v37 = vadd.f32 %v3344_v63, %v3273_v31 }
 0x385   :  { %v3503_v39 = vpop.f32.mrb[16].mxu0  ;;  %v3873_v41 = vpop.f32.mrb[20].mxu1 }
 0x386   :  { %v3354_v42 = vadd.f32 %v4402_v36, %v3345_v37  ;;  %v3580_v43 = vadd.f32 %v3579_v61, %v3503_v39  ;;  %v4899_v45 = vpop.f32.mrb[17].mxu0  ;;  %v4924_v47 = vpop.f32.mrb[21].mxu1 }
 0x388   :  { %v3356_v48 = vcombine.high %v3354_v42, %v3354_v42  ;;  %v3363_v49 = vrot.slane %v3354_v42, %v5606_v32 }
 0x389   :  { %v3653_v50 = vpop.f32.mrb[18].mxu0  ;;  %v4028_v51 = vpop.f32.mrb[22].mxu1 }
 0x38a   :  { %v3370_v52 = vrot.slane %v3356_v48, %v5606_v32  ;;  %v3371_v53 = vcombine.high %v3363_v49, %v3363_v49  ;;  %v3379_v54 = vrot.slane %v3363_v49, %v5606_v32  ;;  %v3654_v55 = vadd.f32 %v3653_v50, %v3580_v43  ;;  %v4909_v56 = vpop.f32.mrb[19].mxu0  ;;  %v4934_v57 = vpop.f32.mrb[23].mxu1 }
 0x38c   :  { %v3372_v58 = vcombine.high %v3370_v52, %v3370_v52  ;;  %v3386_v59 = vrot.slane %v3370_v52, %v5606_v32  ;;  %v3393_v60 = vrot.slane %v3371_v53, %v5606_v32  ;;  %v3401_v62 = vcombine.high %v3379_v54, %v3379_v54  ;;  %3414 = vst.msk [vmem:[%s6028_s9] sm:$0x1] %vm3413_vm11, %v3379_v54 }
 0x38d   :  { %v3728_v2 = vadd.f32 %v3727_v29, %v3654_v55  ;;  %v3801_v46 = vpop.f32.mrb[20].mxu0  ;;  %v4176_v34 = vpop.f32.mrb[24].mxu1 }
 0x38e   :  { %v3400_v4 = vrot.slane %v3372_v58, %v5606_v32  ;;  %v3402_v5 = vcombine.high %v3386_v59, %v3386_v59  ;;  %v3403_v6 = vcombine.high %v3393_v60, %v3393_v60  ;;  %3415 = vst.msk [vmem:[%s6028_s9 + $0x2] sm:$0x1] %vm3413_vm11, %v3393_v60  ;;  %3416 = vst.msk [vmem:[%s6028_s9 + $0x4] sm:$0x1] %vm3413_vm11, %v3401_v62  ;;  %v4919_v7 = vpop.f32.mrb[21].mxu0  ;;  %v4944_v9 = vpop.f32.mrb[25].mxu1 }
 0x38f   :  { %3418 = vst.msk [vmem:[%s6028_s9 + $0x8] sm:$0x1] %vm3413_vm11, %v3386_v59  ;;  %v3802_v10 = vadd.f32 %v3801_v46, %v3728_v2 }
 0x390   :  { %v3404_v12 = vcombine.high %v3400_v4, %v3400_v4  ;;  %3417 = vst.msk [vmem:[%s6028_s9 + $0x6] sm:$0x1] %vm3413_vm11, %v3403_v6  ;;  %3419 = vst.msk [vmem:[%s6028_s9 + $0xa] sm:$0x1] %vm3413_vm11, %v3400_v4 }
 0x391   :  { %3420 = vst.msk [vmem:[%s6028_s9 + $0xc] sm:$0x1] %vm3413_vm11, %v3402_v5  ;;  %v3874_v15 = vadd.f32 %v3873_v41, %v3802_v10  ;;  %v3952_v19 = vpop.f32.mrb[22].mxu0  ;;  %v4322_v20 = vpop.f32.mrb[26].mxu1 }
 0x392   :  { %3421 = vst.msk [vmem:[%s6028_s9 + $0xe] sm:$0x1] %vm3413_vm11, %v3404_v12  ;;  %v4929_v21 = vpop.f32.mrb[23].mxu0  ;;  %v4954_v23 = vpop.f32.mrb[27].mxu1 }
 0x393   :  { %v3953_v26 = vadd.f32 %v3952_v19, %v3874_v15 }
 0x395   :  { %v4029_v27 = vadd.f32 %v4028_v51, %v3953_v26  ;;  %v4102_v17 = vpop.f32.mrb[24].mxu0 }
 0x396   :  { %v4939_v25 = vpop.f32.mrb[25].mxu0 }
 0x397   :  { %v4103_v33 = vadd.f32 %v4102_v17, %v4029_v27 }
 0x399   :  { %v4177_v40 = vadd.f32 %v4176_v34, %v4103_v33  ;;  %v4250_v8 = vpop.f32.mrb[26].mxu0 }
 0x39a   :  { %v4949_v3 = vpop.f32.mrb[27].mxu0 }
 0x39b   :  { %v4251_v38 = vadd.f32 %v4250_v8, %v4177_v40 }
 0x39d   :  { %v4323_v44 = vadd.f32 %v4322_v20, %v4251_v38 }
 0x39f   :  { %v4326_v63 = vadd.f32 %v4402_v36, %v4323_v44 }
 0x3a1   :  { %v4328_v1 = vcombine.high %v4326_v63, %v4326_v63  ;;  %v4335_v11 = vrot.slane %v4326_v63, %v5606_v32 }
 0x3a3   :  { %v4342_v18 = vrot.slane %v4328_v1, %v5606_v32  ;;  %v4343_v24 = vcombine.high %v4335_v11, %v4335_v11  ;;  %v4351_v28 = vrot.slane %v4335_v11, %v5606_v32 }
 0x3a5   :  { %v4344_v61 = vcombine.high %v4342_v18, %v4342_v18  ;;  %v4358_v30 = vrot.slane %v4342_v18, %v5606_v32  ;;  %v4365_v13 = vrot.slane %v4343_v24, %v5606_v32  ;;  %v4373_v14 = vcombine.high %v4351_v28, %v4351_v28  ;;  %4385 = vst.msk [vmem:[%s6028_s9 + $0x1] sm:$0x1] %vm3413_vm11, %v4351_v28 }
 0x3a7   :  { %v4372_v16 = vrot.slane %v4344_v61, %v5606_v32  ;;  %v4374_v0 = vcombine.high %v4358_v30, %v4358_v30  ;;  %v4375_v29 = vcombine.high %v4365_v13, %v4365_v13  ;;  %4386 = vst.msk [vmem:[%s6028_s9 + $0x3] sm:$0x1] %vm3413_vm11, %v4365_v13  ;;  %4387 = vst.msk [vmem:[%s6028_s9 + $0x5] sm:$0x1] %vm3413_vm11, %v4373_v14 }
 0x3a8   :  { %4389 = vst.msk [vmem:[%s6028_s9 + $0x9] sm:$0x1] %vm3413_vm11, %v4358_v30 }
 0x3a9   :  { %v4376_v31 = vcombine.high %v4372_v16, %v4372_v16  ;;  %4388 = vst.msk [vmem:[%s6028_s9 + $0x7] sm:$0x1] %vm3413_vm11, %v4375_v29  ;;  %4390 = vst.msk [vmem:[%s6028_s9 + $0xb] sm:$0x1] %vm3413_vm11, %v4372_v16 }
 0x3aa   :  { %4391 = vst.msk [vmem:[%s6028_s9 + $0xd] sm:$0x1] %vm3413_vm11, %v4374_v0 }
 0x3ab   :  { %4392 = vst.msk [vmem:[%s6028_s9 + $0xf] sm:$0x1] %vm3413_vm11, %v4376_v31 }

// kernel: encoder_process_forward.3
= control target key start
LH: loop header
LB: loop body
LE: loop exit
PB: predicated region body
PF: predicated region fallthrough
CT: control target
= control target key end

     0   :  { %vm61_vm0 = vcmask 1041409   ;;  %v10213_v0 = vmov 0.0|0.0   ;;  %vm64_vm1 = vcmask 1042434   ;;  %vm67_vm2 = vcmask 1043459   ;;  %s11911_s1 = inlined_call_operand.vmem [shape: f32[32,4], index: 1, kind: input, shape index: {}]   ;;  %s11912_s0 = inlined_call_operand.vmem [shape: f32[8,8,32], index: 0, kind: input, shape index: {}]   ;;  %s11913_s2 = inlined_call_operand.vmem [shape: f32[1,4], index: 2, kind: input, shape index: {}]   ;;  %s11914_s8 = inlined_call_operand.vmem [shape: f32[8,8,4], index: 8, kind: output, shape index: {0}]   ;;  %s11915_s7 = inlined_call_operand.vmem [shape: f32[8,1], index: 7, kind: input, shape index: {}]   ;;  %s11916_s6 = inlined_call_operand.vmem [shape: f32[8,1], index: 6, kind: input, shape index: {}]   ;;  %s11917_s4 = inlined_call_operand.vmem [shape: f32[4,32], index: 4, kind: input, shape index: {}]   ;;  %s11918_s3 = inlined_call_operand.vmem [shape: f32[4,32], index: 3, kind: input, shape index: {}]   ;;  %s11919_s5 = inlined_call_operand.vmem [shape: f32[1,32], index: 5, kind: input, shape index: {}]   ;;  %s11920_s9 = inlined_call_operand.vmem [shape: f32[8,4,32], index: 9, kind: output, shape index: {1}]  }
   0x1   :  { %9828 = vmatprep.subr.bf16.mxu0 %v10213_v0  ;;  %9864 = vmatprep.subr.bf16.mxu1 %v10213_v0  ;;  %v31_v1 = vld [vmem:[%s11911_s1] sm:$0xff]  ;;  %v32_v2 = vld [vmem:[%s11911_s1 + $0x8] sm:$0xff]  ;;  %v33_v3 = vld [vmem:[%s11911_s1 + $0x10] sm:$0xff]  ;;  %vm70_vm3 = vcmask 1044484   ;;  %vm10214_vm4 = vmmov 0   ;;  %v10215_v8 = vmov 0.0  }
   0x2   :  { %v85_v4 = vand.u32 4294901760, %v31_v1  ;;  %v88_v5 = vand.u32 4294901760, %v32_v2  ;;  %v34_v6 = vld [vmem:[%s11911_s1 + $0x18] sm:$0xff]  ;;  %v91_v7 = vand.u32 4294901760, %v33_v3  ;;  %9068 = vmatprep.mubr.msk.f32.mxu0 %vm10214_vm4, %v10215_v8  ;;  %9134 = vmatprep.mubr.msk.f32.mxu1 %vm10214_vm4, %v10215_v8  ;;  %v38_v9 = vld [vmem:[%s11912_s0] sm:$0x1] }
   0x3   :  { %v94_v10 = vand.u32 4294901760, %v34_v6  ;;  %v39_v11 = vld [vmem:[%s11912_s0 + $0x8] sm:$0x1]  ;;  %v40_v12 = vld [vmem:[%s11912_s0 + $0x10] sm:$0x1]  ;;  %vm73_vm5 = vcmask 1045509  }
   0x4   :  { %v10295_v13 = vpack.c.bf16 %v88_v5, %v85_v4  ;;  %v41_v14 = vld [vmem:[%s11912_s0 + $0x18] sm:$0x1]  ;;  %v42_v15 = vld [vmem:[%s11912_s0 + $0x20] sm:$0x1]  ;;  %v43_v16 = vld [vmem:[%s11912_s0 + $0x28] sm:$0x1]  ;;  %v10306_v17 = vsub.f32 %v31_v1, %v85_v4  ;;  %v10318_v25 = vsub.f32 %v32_v2, %v88_v5  ;;  %v10341_v38 = vsub.f32 %v33_v3, %v91_v7 }
   0x5   :  { %v44_v18 = vld [vmem:[%s11912_s0 + $0x30] sm:$0x1]  ;;  %v45_v19 = vld [vmem:[%s11912_s0 + $0x38] sm:$0x1]  ;;  %v60_v20 = vrot.slane %v39_v11, 7  ;;  %v63_v21 = vrot.slane %v40_v12, 6  ;;  %v10316_v22 = vpack.c.bf16 %v94_v10, %v91_v7  ;;  %v10353_v44 = vsub.f32 %v34_v6, %v94_v10 }
   0x6   :  { %9830 = vmatpush3.bf16.msra.mxu0 %v10295_v13  ;;  %9866 = vmatpush3.bf16.msra.mxu1 %v10295_v13  ;;  %v66_v23 = vrot.slane %v41_v14, 5  ;;  %v69_v24 = vrot.slane %v42_v15, 4  ;;  %v72_v27 = vrot.slane %v43_v16, 3  ;;  %v75_v28 = vrot.slane %v44_v18, 2  ;;  %v636_v29 = vld [vmem:[%s11912_s0 + $0x1] sm:$0x1] }
   0x7   :  { %9831 = vmatprep.subr.bf16.mxu0 %v10213_v0  ;;  %9867 = vmatprep.subr.bf16.mxu1 %v10213_v0  ;;  %v62_v26 = vsel %vm61_vm0, %v60_v20, %v38_v9  ;;  %v637_v30 = vld [vmem:[%s11912_s0 + $0x9] sm:$0x1]  ;;  %vm76_vm6 = vcmask 1046534   ;;  %v78_v32 = vrot.slane %v45_v19, 1  ;;  %v166_v33 = vand.u32 4294901760, %v10306_v17 }
   0x8   :  { %v65_v31 = vsel %vm64_vm1, %v63_v21, %v62_v26  ;;  %v638_v34 = vld [vmem:[%s11912_s0 + $0x11] sm:$0x1]  ;;  %vm79_vm7 = vcmask 1047559   ;;  %vm81_vm8 = vcmask 261120   ;;  %v639_v36 = vld [vmem:[%s11912_s0 + $0x19] sm:$0x1] }
   0x9   :  { %v68_v35 = vsel %vm67_vm2, %v66_v23, %v65_v31  ;;  %v640_v37 = vld [vmem:[%s11912_s0 + $0x21] sm:$0x1]  ;;  %v173_v40 = vand.u32 4294901760, %v10318_v25  ;;  %v641_v41 = vld [vmem:[%s11912_s0 + $0x29] sm:$0x1]  ;;  %v652_v43 = vrot.slane %v637_v30, 7  ;;  %v167_v51 = vsub.f32 %v10306_v17, %v166_v33 }
   0xa   :  { %9833 = vmatpush3.bf16.msra.mxu0 %v10316_v22  ;;  %9869 = vmatpush3.bf16.msra.mxu1 %v10316_v22  ;;  %v71_v39 = vsel %vm70_vm3, %v69_v24, %v68_v35  ;;  %v642_v42 = vld [vmem:[%s11912_s0 + $0x31] sm:$0x1]  ;;  %v643_v46 = vld [vmem:[%s11912_s0 + $0x39] sm:$0x1]  ;;  %v654_v47 = vrot.slane %v638_v34, 6  ;;  %v656_v48 = vrot.slane %v639_v36, 5 }
   0xb   :  { %9834 = vmatprep.subr.bf16.mxu0 %v10213_v0  ;;  %9870 = vmatprep.subr.bf16.mxu1 %v10213_v0  ;;  %v74_v45 = vsel %vm73_vm5, %v72_v27, %v71_v39  ;;  %v658_v49 = vrot.slane %v640_v37, 4  ;;  %v653_v52 = vsel %vm61_vm0, %v652_v43, %v636_v29  ;;  %v660_v55 = vrot.slane %v641_v41, 3  ;;  %v1220_v6 = vld [vmem:[%s11912_s0 + $0xa] sm:$0x1]  ;;  %v1221_v16 = vld [vmem:[%s11912_s0 + $0x12] sm:$0x1] }
   0xc   :  { %v77_v50 = vsel %vm76_vm6, %v75_v28, %v74_v45  ;;  %v655_v54 = vsel %vm64_vm1, %v654_v47, %v653_v52  ;;  %v662_v56 = vrot.slane %v642_v42, 2  ;;  %v174_v58 = vsub.f32 %v10318_v25, %v173_v40  ;;  %v1219_v20 = vld [vmem:[%s11912_s0 + $0x2] sm:$0x1]  ;;  %v1222_v28 = vld [vmem:[%s11912_s0 + $0x1a] sm:$0x1] }
   0xd   :  { %v80_v53 = vsel %vm79_vm7, %v78_v32, %v77_v50  ;;  %v657_v59 = vsel %vm67_vm2, %v656_v48, %v655_v54  ;;  %v664_v60 = vrot.slane %v643_v46, 1  ;;  %v180_v63 = vand.u32 4294901760, %v10341_v38  ;;  %v10417_v29 = vld [vmem:[%s11912_s0 + $0x22] sm:$0x1]  ;;  %v10423_v32 = vld [vmem:[%s11912_s0 + $0x2a] sm:$0x1] }
   0xe   :  { %v82_v57 = vsel %vm81_vm8, %v80_v53, 0  ;;  %v659_v62 = vsel %vm70_vm3, %v658_v49, %v657_v59  ;;  %v187_v1 = vand.u32 4294901760, %v10353_v44  ;;  %v168_v4 = vand.u32 4294901760, %v167_v51  ;;  %v2386_v35 = vld [vmem:[%s11912_s0 + $0xc] sm:$0x1] }
   0xf   :  { %v10373_v61 = vand.u32 4294901760, %v82_v57  ;;  %v661_v2 = vsel %vm73_vm5, %v660_v55, %v659_v62  ;;  %v175_v7 = vand.u32 4294901760, %v174_v58  ;;  %v181_v10 = vsub.f32 %v10341_v38, %v180_v63  ;;  %v2387_v36 = vld [vmem:[%s11912_s0 + $0x14] sm:$0x1]  ;;  %v10435_v37 = vld [vmem:[%s11912_s0 + $0xb] sm:$0x1] }
  0x10   :  { %v663_v5 = vsel %vm76_vm6, %v662_v56, %v661_v2  ;;  %v188_v11 = vsub.f32 %v10353_v44, %v187_v1  ;;  %v1235_v18 = vrot.slane %v1220_v6, 7  ;;  %v1237_v30 = vrot.slane %v1221_v16, 6  ;;  %v2388_v39 = vld [vmem:[%s11912_s0 + $0x1c] sm:$0x1]  ;;  %v2389_v41 = vld [vmem:[%s11912_s0 + $0x24] sm:$0x1] }
  0x11   :  { %v10380_v3 = vsub.f32 %v82_v57, %v10373_v61  ;;  %v665_v9 = vsel %vm79_vm7, %v664_v60, %v663_v5  ;;  %v10406_v21 = vpack.c.bf16 %v175_v7, %v168_v4  ;;  %v182_v24 = vand.u32 4294901760, %v181_v10  ;;  %v2385_v46 = vld [vmem:[%s11912_s0 + $0x4] sm:$0x1]  ;;  %v2390_v47 = vld [vmem:[%s11912_s0 + $0x2c] sm:$0x1] }
  0x12   :  { %v666_v14 = vsel %vm81_vm8, %v665_v9, 0  ;;  %v189_v26 = vand.u32 4294901760, %v188_v11  ;;  %v1236_v34 = vsel %vm61_vm0, %v1235_v18, %v1219_v20  ;;  %v1239_v45 = vrot.slane %v1222_v28, 5  ;;  %v10461_v48 = vld [vmem:[%s11912_s0 + $0x32] sm:$0x1] }
  0x13   :  { %v155_v12 = vand.u32 4294901760, %v10380_v3  ;;  %v10395_v15 = vand.u32 4294901760, %v666_v14  ;;  %v1238_v49 = vsel %vm64_vm1, %v1237_v30, %v1236_v34  ;;  %v2391_v50 = vld [vmem:[%s11912_s0 + $0x34] sm:$0x1]  ;;  %v2392_v51 = vld [vmem:[%s11912_s0 + $0x3c] sm:$0x1]  ;;  %v10481_v60 = vpack.c.bf16 %v10318_v25, %v10306_v17 }
  0x14   :  { %v10447_v43 = vpack.c.bf16 %v189_v26, %v182_v24  ;;  %v2401_v52 = vrot.slane %v2386_v35, 7  ;;  %v2403_v53 = vrot.slane %v2387_v36, 6  ;;  %v1241_v55 = vrot.slane %v10417_v29, 4  ;;  %v10474_v56 = vld [vmem:[%s11912_s0 + $0x13] sm:$0x1] }
  0x15   :  { %v156_v19 = vsub.f32 %v10380_v3, %v155_v12  ;;  %v10409_v23 = vsub.f32 %v666_v14, %v10395_v15  ;;  %v2405_v57 = vrot.slane %v2388_v39, 5  ;;  %v2407_v58 = vrot.slane %v2389_v41, 4  ;;  %v2969_v59 = vld [vmem:[%s11912_s0 + $0xd] sm:$0x1]  ;;  %v1802_v2 = vld [vmem:[%s11912_s0 + $0x3] sm:$0x1] }
  0x16   :  { %v1243_v62 = vrot.slane %v10423_v32, 3  ;;  %v2402_v4 = vsel %vm61_vm0, %v2401_v52, %v2385_v46  ;;  %v2409_v5 = vrot.slane %v2390_v47, 3  ;;  %v2970_v6 = vld [vmem:[%s11912_s0 + $0x15] sm:$0x1]  ;;  %v2971_v7 = vld [vmem:[%s11912_s0 + $0x1d] sm:$0x1]  ;;  %v10497_v9 = vpack.c.bf16 %v10353_v44, %v10341_v38 }
  0x17   :  { %v157_v27 = vand.u32 4294901760, %v156_v19  ;;  %v739_v31 = vand.u32 4294901760, %v10409_v23  ;;  %v1818_v10 = vrot.slane %v10435_v37, 7  ;;  %v2404_v11 = vsel %vm64_vm1, %v2403_v53, %v2402_v4  ;;  %v2968_v16 = vld [vmem:[%s11912_s0 + $0x5] sm:$0x1] }
  0x18   :  { %v2411_v14 = vrot.slane %v2391_v50, 2  ;;  %v2972_v18 = vld [vmem:[%s11912_s0 + $0x25] sm:$0x1]  ;;  %v1240_v19 = vsel %vm67_vm2, %v1239_v45, %v1238_v49  ;;  %v10513_v20 = vld [vmem:[%s11912_s0 + $0x1b] sm:$0x1]  ;;  %v2406_v24 = vsel %vm67_vm2, %v2405_v57, %v2404_v11  ;;  %v2413_v26 = vrot.slane %v2392_v51, 1 }
  0x19   :  { %9069 = vmatmul.mubr.f32.vlgmr.msra.gmra.mrb[0].mxu0 %v157_v27  ;;  %v740_v42 = vsub.f32 %v10409_v23, %v739_v31  ;;  %v2973_v27 = vld [vmem:[%s11912_s0 + $0x2d] sm:$0x1]  ;;  %v2984_v28 = vrot.slane %v2969_v59, 7  ;;  %v1245_v30 = vrot.slane %v10461_v48, 2  ;;  %v2408_v34 = vsel %vm70_vm3, %v2407_v58, %v2406_v24  ;;  %v2974_v35 = vld [vmem:[%s11912_s0 + $0x35] sm:$0x1] }
  0x1a   :  { %9836 = vmatpush3.bf16.msra.mxu0 %v10406_v21  ;;  %9079 = vmatprep.mubr.msk.f32.mxu0 %vm10214_vm4, %v10215_v8  ;;  %v2986_v36 = vrot.slane %v2970_v6, 6  ;;  %v2988_v37 = vrot.slane %v2971_v7, 5  ;;  %v1820_v39 = vrot.slane %v10474_v56, 6  ;;  %v2410_v41 = vsel %vm73_vm5, %v2409_v5, %v2408_v34  ;;  %v10540_v47 = vld [vmem:[%s11912_s0 + $0x23] sm:$0x1] }
  0x1b   :  { %9837 = vmatprep.subr.bf16.mxu0 %v10213_v0  ;;  %v741_v54 = vand.u32 4294901760, %v740_v42  ;;  %v2975_v42 = vld [vmem:[%s11912_s0 + $0x3d] sm:$0x1]  ;;  %v2985_v45 = vsel %vm61_vm0, %v2984_v28, %v2968_v16  ;;  %v2990_v46 = vrot.slane %v2972_v18, 4  ;;  %v1819_v49 = vsel %vm61_vm0, %v1818_v10, %v1802_v2  ;;  %v3552_v53 = vld [vmem:[%s11912_s0 + $0xe] sm:$0x1] }
  0x1c   :  { %v2412_v50 = vsel %vm76_vm6, %v2411_v14, %v2410_v41  ;;  %v2987_v51 = vsel %vm64_vm1, %v2986_v36, %v2985_v45  ;;  %v2992_v52 = vrot.slane %v2973_v27, 3  ;;  %v1822_v56 = vrot.slane %v10513_v20, 5  ;;  %v3554_v2 = vld [vmem:[%s11912_s0 + $0x1e] sm:$0x1]  ;;  %v3555_v4 = vld [vmem:[%s11912_s0 + $0x26] sm:$0x1] }
  0x1d   :  { %9135 = vmatmul.mubr.f32.vlgmr.msra.gmra.mrb[0].mxu1 %v741_v54  ;;  %v3553_v54 = vld [vmem:[%s11912_s0 + $0x16] sm:$0x1]  ;;  %v2414_v57 = vsel %vm79_vm7, %v2413_v26, %v2412_v50  ;;  %v2989_v58 = vsel %vm67_vm2, %v2988_v37, %v2987_v51  ;;  %v2994_v59 = vrot.slane %v2974_v35, 2  ;;  %v10567_v5 = vpack.c.bf16 %v173_v40, %v166_v33  ;;  %v3551_v11 = vld [vmem:[%s11912_s0 + $0x6] sm:$0x1] }
  0x1e   :  { %9839 = vmatpush3.bf16.msra.mxu0 %v10447_v43  ;;  %9872 = vmatpush3.bf16.msra.mxu1 %v10406_v21  ;;  %v10570_v6 = vsel %vm81_vm8, %v2414_v57, 0  ;;  %v2991_v7 = vsel %vm70_vm3, %v2990_v46, %v2989_v58  ;;  %v2996_v10 = vrot.slane %v2975_v42, 1  ;;  %v3556_v14 = vld [vmem:[%s11912_s0 + $0x2e] sm:$0x1]  ;;  %v10582_v17 = vld [vmem:[%s11912_s0 + $0x2b] sm:$0x1]  ;;  %v1821_v25 = vsel %vm64_vm1, %v1820_v39, %v1819_v49 }
  0x1f   :  { %9840 = vmatprep.subr.bf16.mxu0 %v10213_v0  ;;  %9873 = vmatprep.subr.bf16.mxu1 %v10213_v0  ;;  %v2993_v33 = vsel %vm73_vm5, %v2992_v52, %v2991_v7  ;;  %v3557_v40 = vld [vmem:[%s11912_s0 + $0x36] sm:$0x1]  ;;  %v3567_v16 = vrot.slane %v3552_v53, 7  ;;  %v3569_v18 = vrot.slane %v3553_v54, 6  ;;  %v10594_v20 = vld [vmem:[%s11912_s0 + $0x3a] sm:$0x1]  ;;  %v1242_v24 = vsel %vm70_vm3, %v1241_v55, %v1240_v19 }
  0x20   :  { %9145 = vmatprep.mubr.msk.f32.mxu1 %vm10214_vm4, %v10215_v8  ;;  %v2995_v26 = vsel %vm76_vm6, %v2994_v59, %v2993_v33  ;;  %v3558_v27 = vld [vmem:[%s11912_s0 + $0x3e] sm:$0x1]  ;;  %v3571_v28 = vrot.slane %v3554_v2, 5  ;;  %v3573_v34 = vrot.slane %v3555_v4, 4  ;;  %v4135_v35 = vld [vmem:[%s11912_s0 + $0xf] sm:$0x1]  ;;  %v1823_v42 = vsel %vm67_vm2, %v1822_v56, %v1821_v25 }
  0x21   :  { %9080 = vmatmul.mubr.f32.vlgmr.msra.gmra.mrb[0].mxu0 %v10373_v61  ;;  %v1824_v29 = vrot.slane %v10540_v47, 4  ;;  %v2997_v55 = vsel %vm79_vm7, %v2996_v10, %v2995_v26  ;;  %v3568_v19 = vsel %vm61_vm0, %v3567_v16, %v3551_v11  ;;  %v3575_v36 = vrot.slane %v3556_v14, 3  ;;  %v4136_v37 = vld [vmem:[%s11912_s0 + $0x17] sm:$0x1]  ;;  %v4137_v39 = vld [vmem:[%s11912_s0 + $0x1f] sm:$0x1] }
  0x22   :  { %9842 = vmatpush3.bf16.msra.mxu0 %v10481_v60  ;;  %9090 = vmatprep.mubr.msk.f32.mxu0 %vm10214_vm4, %v10215_v8  ;;  %v1808_v41 = vld [vmem:[%s11912_s0 + $0x33] sm:$0x1]  ;;  %v10625_v45 = vsel %vm81_vm8, %v2997_v55, 0  ;;  %v3570_v46 = vsel %vm64_vm1, %v3569_v18, %v3568_v19  ;;  %v3577_v47 = vrot.slane %v3557_v40, 2  ;;  %v4138_v49 = vld [vmem:[%s11912_s0 + $0x27] sm:$0x1]  ;;  %v1244_v50 = vsel %vm73_vm5, %v1243_v62, %v1242_v24 }
  0x23   :  { %9875 = vmatpush3.bf16.msra.mxu1 %v10447_v43  ;;  %9843 = vmatprep.subr.bf16.mxu0 %v10213_v0  ;;  %v1826_v51 = vrot.slane %v10582_v17, 3  ;;  %v3572_v52 = vsel %vm67_vm2, %v3571_v28, %v3570_v46  ;;  %v3579_v53 = vrot.slane %v3558_v27, 1  ;;  %v4134_v54 = vld [vmem:[%s11912_s0 + $0x7] sm:$0x1]  ;;  %v4139_v56 = vld [vmem:[%s11912_s0 + $0x2f] sm:$0x1]  ;;  %v1825_v4 = vsel %vm70_vm3, %v1824_v29, %v1823_v42 }
  0x24   :  { %9876 = vmatprep.subr.bf16.mxu1 %v10213_v0  ;;  %v3574_v32 = vsel %vm70_vm3, %v3573_v34, %v3572_v52  ;;  %v4140_v62 = vld [vmem:[%s11912_s0 + $0x37] sm:$0x1]  ;;  %v4150_v57 = vrot.slane %v4135_v35, 7  ;;  %v4152_v58 = vrot.slane %v4136_v37, 6  ;;  %v4154_v59 = vrot.slane %v4137_v39, 5 }
  0x25   :  { %v1247_v2 = vrot.slane %v10594_v20, 1  ;;  %v3576_v7 = vsel %vm73_vm5, %v3575_v36, %v3574_v32  ;;  %v4141_v10 = vld [vmem:[%s11912_s0 + $0x3f] sm:$0x1]  ;;  %v4156_v11 = vrot.slane %v4138_v49, 4  ;;  %v1246_v14 = vsel %vm76_vm6, %v1245_v30, %v1244_v50  ;;  %v1809_v40 = vld [vmem:[%s11912_s0 + $0x3b] sm:$0x1] }
  0x26   :  { %9146 = vmatmul.mubr.f32.vlgmr.msra.gmra.mrb[0].mxu1 %v10395_v15  ;;  %9845 = vmatpush3.bf16.msra.mxu0 %v10497_v9  ;;  %v3578_v17 = vsel %vm76_vm6, %v3577_v47, %v3576_v7  ;;  %v4151_v25 = vsel %vm61_vm0, %v4150_v57, %v4134_v54  ;;  %v4158_v33 = vrot.slane %v4139_v56, 3  ;;  %v1828_v16 = vrot.slane %v1808_v41, 2 }
  0x27   :  { %9878 = vmatpush3.bf16.msra.mxu1 %v10481_v60  ;;  %9846 = vmatprep.subr.bf16.mxu0 %v10213_v0  ;;  %v3580_v18 = vsel %vm79_vm7, %v3579_v53, %v3578_v17  ;;  %v4153_v20 = vsel %vm64_vm1, %v4152_v58, %v4151_v25  ;;  %v4160_v24 = vrot.slane %v4140_v62, 2  ;;  %v1827_v48 = vsel %vm73_vm5, %v1826_v51, %v1825_v4 }
  0x28   :  { %9879 = vmatprep.subr.bf16.mxu1 %v10213_v0  ;;  %9156 = vmatprep.mubr.msk.f32.mxu1 %vm10214_vm4, %v10215_v8  ;;  %v10673_v30 = vsel %vm81_vm8, %v3580_v18, 0  ;;  %v4155_v26 = vsel %vm67_vm2, %v4154_v59, %v4153_v20  ;;  %v4162_v27 = vrot.slane %v4141_v10, 1  ;;  %v1248_v28 = vsel %vm79_vm7, %v1247_v2, %v1246_v14 }
  0x29   :  { %9091 = vmatmul.mubr.f32.vlgmr.msra.gmra.mrb[0].mxu0 %v10380_v3  ;;  %v4157_v34 = vsel %vm70_vm3, %v4156_v11, %v4155_v26  ;;  %v1830_v35 = vrot.slane %v1809_v40, 1  ;;  %v1829_v55 = vsel %vm76_vm6, %v1828_v16, %v1827_v48  ;;  %v10693_v36 = vpack.c.bf16 %v187_v1, %v180_v63 }
  0x2a   :  { %9848 = vmatpush3.bf16.msra.mxu0 %v10295_v13  ;;  %9101 = vmatprep.mubr.msk.f32.mxu0 %vm10214_vm4, %v10215_v8  ;;  %v4159_v29 = vsel %vm73_vm5, %v4158_v33, %v4157_v34  ;;  %v1249_v37 = vsel %vm81_vm8, %v1248_v28, 0  ;;  %v10821_v50 = vand.u32 4294901760, %v10625_v45  ;;  %v10902_v32 = vand.u32 4294901760, %v10673_v30 }
  0x2b   :  { %9881 = vmatpush3.bf16.msra.mxu1 %v10497_v9  ;;  %9849 = vmatprep.subr.bf16.mxu0 %v10213_v0  ;;  %v4161_v19 = vsel %vm76_vm6, %v4160_v24, %v4159_v29  ;;  %v1831_v38 = vsel %vm79_vm7, %v1830_v35, %v1829_v55  ;;  %v10706_v44 = vand.u32 4294901760, %v1249_v37  ;;  %vm4717_vm9 = vcmask 31744  }
  0x2c   :  { %9882 = vmatprep.subr.bf16.mxu1 %v10213_v0  ;;  %v4163_v3 = vsel %vm79_vm7, %v4162_v27, %v4161_v19  ;;  %v1832_v63 = vsel %vm81_vm8, %v1831_v38, 0  ;;  %v10913_v62 = vsub.f32 %v10673_v30, %v10902_v32  ;;  %vm627_vm10 = vcmask 24576  }
  0x2d   :  { %v10719_v1 = vsub.f32 %v1249_v37, %v10706_v44  ;;  %vm4825_vm11 = vcmask 1043456   ;;  %vm5792_vm12 = vcmask 253952  }
  0x2e   :  { %9157 = vmatmul.mubr.f32.vlgmr.msra.gmra.mrb[0].mxu1 %v10409_v23  ;;  %9851 = vmatpush3.bf16.msra.mxu0 %v10316_v22  ;;  %v10724_v23 = vand.u32 4294901760, %v1832_v63  ;;  %v3654_v58 = vand.u32 4294901760, %v10913_v62 }
  0x2f   :  { %9884 = vmatpush3.bf16.msra.mxu1 %v10295_v13  ;;  %9852 = vmatprep.subr.bf16.mxu0 %v10213_v0 }
  0x30   :  { %9885 = vmatprep.subr.bf16.mxu1 %v10213_v0  ;;  %9167 = vmatprep.mubr.msk.f32.mxu1 %vm10214_vm4, %v10215_v8  ;;  %v10733_v39 = vsub.f32 %v1832_v63, %v10724_v23  ;;  %v3655_v2 = vsub.f32 %v10913_v62, %v3654_v58 }
  0x31   :  { %9102 = vmatmul.mubr.f32.vlgmr.msra.gmra.mrb[0].mxu0 %v155_v12  ;;  %v10702_v12 = vsel %vm81_vm8, %v4163_v3, 0 }
  0x32   :  { %9854 = vmatpush3.bf16.msra.mxu0 %v10567_v5  ;;  %9112 = vmatprep.mubr.msk.f32.mxu0 %vm10214_vm4, %v10215_v8  ;;  %v1905_v42 = vand.u32 4294901760, %v10733_v39  ;;  %v10919_v57 = vand.u32 4294901760, %v10702_v12  ;;  %v3656_v7 = vand.u32 4294901760, %v3655_v2 }
  0x33   :  { %9887 = vmatpush3.bf16.msra.mxu1 %v10316_v22  ;;  %9855 = vmatprep.subr.bf16.mxu0 %v10213_v0 }
  0x34   :  { %9888 = vmatprep.subr.bf16.mxu1 %v10213_v0  ;;  %v10929_v59 = vsub.f32 %v10702_v12, %v10919_v57 }
  0x36   :  { %9168 = vmatmul.mubr.f32.vlgmr.msra.gmra.mrb[0].mxu1 %v739_v31  ;;  %9857 = vmatpush3.bf16.msra.mxu0 %v10693_v36  ;;  %v1322_v31 = vand.u32 4294901760, %v10719_v1  ;;  %v4237_v4 = vand.u32 4294901760, %v10929_v59 }
  0x37   :  { %9890 = vmatpush3.bf16.msra.mxu1 %v10567_v5  ;;  %9858 = vmatprep.subr.bf16.mxu0 %v10213_v0 }
  0x38   :  { %9891 = vmatprep.subr.bf16.mxu1 %v10213_v0  ;;  %9178 = vmatprep.mubr.msk.f32.mxu1 %vm10214_vm4, %v10215_v8  ;;  %v1323_v41 = vsub.f32 %v10719_v1, %v1322_v31  ;;  %v4238_v10 = vsub.f32 %v10929_v59, %v4237_v4 }
  0x39   :  { %9113 = vmatmul.mubr.f32.vlgmr.msra.gmra.mrb[0].mxu0 %v10373_v61 }
  0x3a   :  { %9860 = vmatpush3.bf16.msra.mxu0 %v10295_v13  ;;  %9123 = vmatprep.mubr.msk.f32.mxu0 %vm10214_vm4, %v10215_v8  ;;  %v1324_v46 = vand.u32 4294901760, %v1323_v41  ;;  %v4239_v11 = vand.u32 4294901760, %v4238_v10 }
  0x3b   :  { %9893 = vmatpush3.bf16.msra.mxu1 %v10693_v36  ;;  %9861 = vmatprep.subr.bf16.mxu0 %v10213_v0 }
  0x3c   :  { %9894 = vmatprep.subr.bf16.mxu1 %v10213_v0 }
  0x3e   :  { %9179 = vmatmul.mubr.f32.vlgmr.msra.gmra.mrb[0].mxu1 %v10395_v15  ;;  %9863 = vmatpush3.bf16.msra.mxu0 %v10316_v22 }
  0x3f   :  { %9896 = vmatpush3.bf16.msra.mxu1 %v10295_v13  ;;  %9189 = vmatprep.mubr.msk.f32.mxu1 %vm10214_vm4, %v10215_v8 }
  0x40   :  { %9897 = vmatprep.subr.bf16.mxu1 %v10213_v0  ;;  %9900 = vmatprep.subr.bf16.mxu0 %v10213_v0 }
  0x41   :  { %9124 = vmatmul.mubr.f32.vlgmr.msra.gmra.mrb[0].mxu0 %v10373_v61  ;;  %v1906_v61 = vsub.f32 %v10733_v39, %v1905_v42 }
  0x42   :  { %9902 = vmatpush3.bf16.msra.mxu0 %v10295_v13  ;;  %9200 = vmatprep.mubr.msk.f32.mxu0 %vm10214_vm4, %v10215_v8 }
  0x43   :  { %9899 = vmatpush3.bf16.msra.mxu1 %v10316_v22  ;;  %9903 = vmatprep.subr.bf16.mxu0 %v10213_v0  ;;  %v1907_v47 = vand.u32 4294901760, %v1906_v61 }
  0x44   :  { %9936 = vmatprep.subr.bf16.mxu1 %v10213_v0 }
  0x46   :  { %9190 = vmatmul.mubr.f32.vlgmr.msra.gmra.mrb[0].mxu1 %v10395_v15  ;;  %9905 = vmatpush3.bf16.msra.mxu0 %v10316_v22  ;;  %v10804_v15 = vand.u32 4294901760, %v10570_v6 }
  0x47   :  { %9938 = vmatpush3.bf16.msra.mxu1 %v10295_v13  ;;  %9266 = vmatprep.mubr.msk.f32.mxu1 %vm10214_vm4, %v10215_v8 }
  0x48   :  { %9939 = vmatprep.subr.bf16.mxu1 %v10213_v0  ;;  %9906 = vmatprep.subr.bf16.mxu0 %v10213_v0  ;;  %v10815_v49 = vsub.f32 %v10570_v6, %v10804_v15  ;;  %v10831_v6 = vsub.f32 %v10625_v45, %v10821_v50 }
  0x49   :  { %9201 = vmatmul.mubr.f32.vlgmr.msra.gmra.mrb[2].mxu0 %v1324_v46 }
  0x4a   :  { %9908 = vmatpush3.bf16.msra.mxu0 %v10406_v21  ;;  %9211 = vmatprep.mubr.msk.f32.mxu0 %vm10214_vm4, %v10215_v8  ;;  %v2488_v51 = vand.u32 4294901760, %v10815_v49  ;;  %v3071_v45 = vand.u32 4294901760, %v10831_v6 }
  0x4b   :  { %9941 = vmatpush3.bf16.msra.mxu1 %v10316_v22  ;;  %9909 = vmatprep.subr.bf16.mxu0 %v10213_v0 }
  0x4c   :  { %9942 = vmatprep.subr.bf16.mxu1 %v10213_v0  ;;  %v2489_v52 = vsub.f32 %v10815_v49, %v2488_v51  ;;  %v3072_v54 = vsub.f32 %v10831_v6, %v3071_v45 }
  0x4e   :  { %9267 = vmatmul.mubr.f32.vlgmr.msra.gmra.mrb[2].mxu1 %v1907_v47  ;;  %9911 = vmatpush3.bf16.msra.mxu0 %v10447_v43  ;;  %v2490_v53 = vand.u32 4294901760, %v2489_v52  ;;  %v3073_v56 = vand.u32 4294901760, %v3072_v54 }
  0x4f   :  { %9944 = vmatpush3.bf16.msra.mxu1 %v10406_v21  ;;  %9277 = vmatprep.mubr.msk.f32.mxu1 %vm10214_vm4, %v10215_v8 }
  0x50   :  { %9945 = vmatprep.subr.bf16.mxu1 %v10213_v0  ;;  %9912 = vmatprep.subr.bf16.mxu0 %v10213_v0 }
  0x51   :  { %9212 = vmatmul.mubr.f32.vlgmr.msra.gmra.mrb[2].mxu0 %v10706_v44 }
  0x52   :  { %9914 = vmatpush3.bf16.msra.mxu0 %v10481_v60  ;;  %9222 = vmatprep.mubr.msk.f32.mxu0 %vm10214_vm4, %v10215_v8 }
  0x53   :  { %9947 = vmatpush3.bf16.msra.mxu1 %v10447_v43  ;;  %9915 = vmatprep.subr.bf16.mxu0 %v10213_v0 }
  0x54   :  { %9948 = vmatprep.subr.bf16.mxu1 %v10213_v0 }
  0x56   :  { %9278 = vmatmul.mubr.f32.vlgmr.msra.gmra.mrb[2].mxu1 %v10724_v23  ;;  %9917 = vmatpush3.bf16.msra.mxu0 %v10497_v9 }
  0x57   :  { %9950 = vmatpush3.bf16.msra.mxu1 %v10481_v60  ;;  %9288 = vmatprep.mubr.msk.f32.mxu1 %vm10214_vm4, %v10215_v8 }
  0x58   :  { %9951 = vmatprep.subr.bf16.mxu1 %v10213_v0  ;;  %9918 = vmatprep.subr.bf16.mxu0 %v10213_v0 }
  0x59   :  { %9223 = vmatmul.mubr.f32.vlgmr.msra.gmra.mrb[2].mxu0 %v10719_v1 }
  0x5a   :  { %9920 = vmatpush3.bf16.msra.mxu0 %v10295_v13  ;;  %9233 = vmatprep.mubr.msk.f32.mxu0 %vm10214_vm4, %v10215_v8 }
  0x5b   :  { %9953 = vmatpush3.bf16.msra.mxu1 %v10497_v9  ;;  %9921 = vmatprep.subr.bf16.mxu0 %v10213_v0 }
  0x5c   :  { %9954 = vmatprep.subr.bf16.mxu1 %v10213_v0 }
  0x5e   :  { %9289 = vmatmul.mubr.f32.vlgmr.msra.gmra.mrb[2].mxu1 %v10733_v39  ;;  %9923 = vmatpush3.bf16.msra.mxu0 %v10316_v22 }
  0x5f   :  { %9956 = vmatpush3.bf16.msra.mxu1 %v10295_v13  ;;  %9299 = vmatprep.mubr.msk.f32.mxu1 %vm10214_vm4, %v10215_v8 }
  0x60   :  { %9957 = vmatprep.subr.bf16.mxu1 %v10213_v0  ;;  %9924 = vmatprep.subr.bf16.mxu0 %v10213_v0 }
  0x61   :  { %9234 = vmatmul.mubr.f32.vlgmr.msra.gmra.mrb[2].mxu0 %v1322_v31 }
  0x62   :  { %9926 = vmatpush3.bf16.msra.mxu0 %v10567_v5  ;;  %9244 = vmatprep.mubr.msk.f32.mxu0 %vm10214_vm4, %v10215_v8 }
  0x63   :  { %9959 = vmatpush3.bf16.msra.mxu1 %v10316_v22  ;;  %9927 = vmatprep.subr.bf16.mxu0 %v10213_v0 }
  0x64   :  { %9960 = vmatprep.subr.bf16.mxu1 %v10213_v0 }
  0x66   :  { %9300 = vmatmul.mubr.f32.vlgmr.msra.gmra.mrb[2].mxu1 %v1905_v42  ;;  %9929 = vmatpush3.bf16.msra.mxu0 %v10693_v36 }
  0x67   :  { %9962 = vmatpush3.bf16.msra.mxu1 %v10567_v5  ;;  %9310 = vmatprep.mubr.msk.f32.mxu1 %vm10214_vm4, %v10215_v8 }
  0x68   :  { %9963 = vmatprep.subr.bf16.mxu1 %v10213_v0  ;;  %9930 = vmatprep.subr.bf16.mxu0 %v10213_v0 }
  0x69   :  { %9245 = vmatmul.mubr.f32.vlgmr.msra.gmra.mrb[2].mxu0 %v10706_v44 }
  0x6a   :  { %9932 = vmatpush3.bf16.msra.mxu0 %v10295_v13  ;;  %9255 = vmatprep.mubr.msk.f32.mxu0 %vm10214_vm4, %v10215_v8 }
  0x6b   :  { %9965 = vmatpush3.bf16.msra.mxu1 %v10693_v36  ;;  %9933 = vmatprep.subr.bf16.mxu0 %v10213_v0 }
  0x6c   :  { %9966 = vmatprep.subr.bf16.mxu1 %v10213_v0 }
  0x6e   :  { %9311 = vmatmul.mubr.f32.vlgmr.msra.gmra.mrb[2].mxu1 %v10724_v23  ;;  %9935 = vmatpush3.bf16.msra.mxu0 %v10316_v22 }
  0x6f   :  { %9968 = vmatpush3.bf16.msra.mxu1 %v10295_v13  ;;  %9321 = vmatprep.mubr.msk.f32.mxu1 %vm10214_vm4, %v10215_v8 }
  0x70   :  { %9969 = vmatprep.subr.bf16.mxu1 %v10213_v0  ;;  %9972 = vmatprep.subr.bf16.mxu0 %v10213_v0 }
  0x71   :  { %9256 = vmatmul.mubr.f32.vlgmr.msra.gmra.mrb[2].mxu0 %v10706_v44 }
  0x72   :  { %9974 = vmatpush3.bf16.msra.mxu0 %v10295_v13  ;;  %9332 = vmatprep.mubr.msk.f32.mxu0 %vm10214_vm4, %v10215_v8 }
  0x73   :  { %9971 = vmatpush3.bf16.msra.mxu1 %v10316_v22  ;;  %9975 = vmatprep.subr.bf16.mxu0 %v10213_v0 }
  0x74   :  { %10008 = vmatprep.subr.bf16.mxu1 %v10213_v0 }
  0x76   :  { %9322 = vmatmul.mubr.f32.vlgmr.msra.gmra.mrb[2].mxu1 %v10724_v23  ;;  %9977 = vmatpush3.bf16.msra.mxu0 %v10316_v22 }
  0x77   :  { %10010 = vmatpush3.bf16.msra.mxu1 %v10295_v13  ;;  %9398 = vmatprep.mubr.msk.f32.mxu1 %vm10214_vm4, %v10215_v8 }
  0x78   :  { %10011 = vmatprep.subr.bf16.mxu1 %v10213_v0  ;;  %9978 = vmatprep.subr.bf16.mxu0 %v10213_v0 }
  0x79   :  { %9333 = vmatmul.mubr.f32.vlgmr.msra.gmra.mrb[4].mxu0 %v2490_v53 }
  0x7a   :  { %9980 = vmatpush3.bf16.msra.mxu0 %v10406_v21  ;;  %9343 = vmatprep.mubr.msk.f32.mxu0 %vm10214_vm4, %v10215_v8 }
  0x7b   :  { %10013 = vmatpush3.bf16.msra.mxu1 %v10316_v22  ;;  %9981 = vmatprep.subr.bf16.mxu0 %v10213_v0 }
  0x7c   :  { %10014 = vmatprep.subr.bf16.mxu1 %v10213_v0 }
  0x7e   :  { %9399 = vmatmul.mubr.f32.vlgmr.msra.gmra.mrb[4].mxu1 %v3073_v56  ;;  %9983 = vmatpush3.bf16.msra.mxu0 %v10447_v43 }
  0x7f   :  { %10016 = vmatpush3.bf16.msra.mxu1 %v10406_v21  ;;  %9409 = vmatprep.mubr.msk.f32.mxu1 %vm10214_vm4, %v10215_v8 }
  0x80   :  { %10017 = vmatprep.subr.bf16.mxu1 %v10213_v0  ;;  %9984 = vmatprep.subr.bf16.mxu0 %v10213_v0 }
  0x81   :  { %9344 = vmatmul.mubr.f32.vlgmr.msra.gmra.mrb[4].mxu0 %v10804_v15 }
  0x82   :  { %9986 = vmatpush3.bf16.msra.mxu0 %v10481_v60  ;;  %9354 = vmatprep.mubr.msk.f32.mxu0 %vm10214_vm4, %v10215_v8 }
  0x83   :  { %10019 = vmatpush3.bf16.msra.mxu1 %v10447_v43  ;;  %9987 = vmatprep.subr.bf16.mxu0 %v10213_v0 }
  0x84   :  { %10020 = vmatprep.subr.bf16.mxu1 %v10213_v0 }
  0x86   :  { %9410 = vmatmul.mubr.f32.vlgmr.msra.gmra.mrb[4].mxu1 %v10821_v50  ;;  %9989 = vmatpush3.bf16.msra.mxu0 %v10497_v9 }
  0x87   :  { %10022 = vmatpush3.bf16.msra.mxu1 %v10481_v60  ;;  %9420 = vmatprep.mubr.msk.f32.mxu1 %vm10214_vm4, %v10215_v8 }
  0x88   :  { %10023 = vmatprep.subr.bf16.mxu1 %v10213_v0  ;;  %9990 = vmatprep.subr.bf16.mxu0 %v10213_v0 }
  0x89   :  { %9355 = vmatmul.mubr.f32.vlgmr.msra.gmra.mrb[4].mxu0 %v10815_v49 }
  0x8a   :  { %9992 = vmatpush3.bf16.msra.mxu0 %v10295_v13  ;;  %9365 = vmatprep.mubr.msk.f32.mxu0 %vm10214_vm4, %v10215_v8 }
  0x8b   :  { %10025 = vmatpush3.bf16.msra.mxu1 %v10497_v9  ;;  %9993 = vmatprep.subr.bf16.mxu0 %v10213_v0 }
  0x8c   :  { %10026 = vmatprep.subr.bf16.mxu1 %v10213_v0 }
  0x8e   :  { %9421 = vmatmul.mubr.f32.vlgmr.msra.gmra.mrb[4].mxu1 %v10831_v6  ;;  %9995 = vmatpush3.bf16.msra.mxu0 %v10316_v22 }
  0x8f   :  { %10028 = vmatpush3.bf16.msra.mxu1 %v10295_v13  ;;  %9431 = vmatprep.mubr.msk.f32.mxu1 %vm10214_vm4, %v10215_v8 }
  0x90   :  { %10029 = vmatprep.subr.bf16.mxu1 %v10213_v0  ;;  %9996 = vmatprep.subr.bf16.mxu0 %v10213_v0 }
  0x91   :  { %9366 = vmatmul.mubr.f32.vlgmr.msra.gmra.mrb[4].mxu0 %v2488_v51 }
  0x92   :  { %9998 = vmatpush3.bf16.msra.mxu0 %v10567_v5  ;;  %9376 = vmatprep.mubr.msk.f32.mxu0 %vm10214_vm4, %v10215_v8 }
  0x93   :  { %10031 = vmatpush3.bf16.msra.mxu1 %v10316_v22  ;;  %9999 = vmatprep.subr.bf16.mxu0 %v10213_v0 }
  0x94   :  { %10032 = vmatprep.subr.bf16.mxu1 %v10213_v0 }
  0x96   :  { %9432 = vmatmul.mubr.f32.vlgmr.msra.gmra.mrb[4].mxu1 %v3071_v45  ;;  %10001 = vmatpush3.bf16.msra.mxu0 %v10693_v36 }
  0x97   :  { %10034 = vmatpush3.bf16.msra.mxu1 %v10567_v5  ;;  %9442 = vmatprep.mubr.msk.f32.mxu1 %vm10214_vm4, %v10215_v8 }
  0x98   :  { %10035 = vmatprep.subr.bf16.mxu1 %v10213_v0  ;;  %10002 = vmatprep.subr.bf16.mxu0 %v10213_v0 }
  0x99   :  { %9377 = vmatmul.mubr.f32.vlgmr.msra.gmra.mrb[4].mxu0 %v10804_v15 }
  0x9a   :  { %10004 = vmatpush3.bf16.msra.mxu0 %v10295_v13  ;;  %9387 = vmatprep.mubr.msk.f32.mxu0 %vm10214_vm4, %v10215_v8 }
  0x9b   :  { %10037 = vmatpush3.bf16.msra.mxu1 %v10693_v36  ;;  %10005 = vmatprep.subr.bf16.mxu0 %v10213_v0 }
  0x9c   :  { %10038 = vmatprep.subr.bf16.mxu1 %v10213_v0 }
  0x9e   :  { %9443 = vmatmul.mubr.f32.vlgmr.msra.gmra.mrb[4].mxu1 %v10821_v50  ;;  %10007 = vmatpush3.bf16.msra.mxu0 %v10316_v22 }
  0x9f   :  { %10040 = vmatpush3.bf16.msra.mxu1 %v10295_v13  ;;  %9453 = vmatprep.mubr.msk.f32.mxu1 %vm10214_vm4, %v10215_v8 }
  0xa0   :  { %10041 = vmatprep.subr.bf16.mxu1 %v10213_v0  ;;  %10044 = vmatprep.subr.bf16.mxu0 %v10213_v0 }
  0xa1   :  { %9388 = vmatmul.mubr.f32.vlgmr.msra.gmra.mrb[4].mxu0 %v10804_v15 }
  0xa2   :  { %10046 = vmatpush3.bf16.msra.mxu0 %v10295_v13  ;;  %9464 = vmatprep.mubr.msk.f32.mxu0 %vm10214_vm4, %v10215_v8 }
  0xa3   :  { %10043 = vmatpush3.bf16.msra.mxu1 %v10316_v22  ;;  %10047 = vmatprep.subr.bf16.mxu0 %v10213_v0 }
  0xa4   :  { %10080 = vmatprep.subr.bf16.mxu1 %v10213_v0 }
  0xa6   :  { %9454 = vmatmul.mubr.f32.vlgmr.msra.gmra.mrb[4].mxu1 %v10821_v50  ;;  %10049 = vmatpush3.bf16.msra.mxu0 %v10316_v22 }
  0xa7   :  { %10082 = vmatpush3.bf16.msra.mxu1 %v10295_v13  ;;  %9530 = vmatprep.mubr.msk.f32.mxu1 %vm10214_vm4, %v10215_v8 }
  0xa8   :  { %10083 = vmatprep.subr.bf16.mxu1 %v10213_v0  ;;  %10050 = vmatprep.subr.bf16.mxu0 %v10213_v0 }
  0xa9   :  { %9465 = vmatmul.mubr.f32.vlgmr.msra.gmra.mrb[6].mxu0 %v3656_v7 }
  0xaa   :  { %10052 = vmatpush3.bf16.msra.mxu0 %v10406_v21  ;;  %9475 = vmatprep.mubr.msk.f32.mxu0 %vm10214_vm4, %v10215_v8 }
  0xab   :  { %10085 = vmatpush3.bf16.msra.mxu1 %v10316_v22  ;;  %10053 = vmatprep.subr.bf16.mxu0 %v10213_v0 }
  0xac   :  { %10086 = vmatprep.subr.bf16.mxu1 %v10213_v0 }
  0xae   :  { %9531 = vmatmul.mubr.f32.vlgmr.msra.gmra.mrb[6].mxu1 %v4239_v11  ;;  %10055 = vmatpush3.bf16.msra.mxu0 %v10447_v43 }
  0xaf   :  { %10088 = vmatpush3.bf16.msra.mxu1 %v10406_v21  ;;  %9541 = vmatprep.mubr.msk.f32.mxu1 %vm10214_vm4, %v10215_v8 }
  0xb0   :  { %10089 = vmatprep.subr.bf16.mxu1 %v10213_v0  ;;  %10056 = vmatprep.subr.bf16.mxu0 %v10213_v0 }
  0xb1   :  { %9476 = vmatmul.mubr.f32.vlgmr.msra.gmra.mrb[6].mxu0 %v10902_v32 }
  0xb2   :  { %10058 = vmatpush3.bf16.msra.mxu0 %v10481_v60  ;;  %9486 = vmatprep.mubr.msk.f32.mxu0 %vm10214_vm4, %v10215_v8 }
  0xb3   :  { %10091 = vmatpush3.bf16.msra.mxu1 %v10447_v43  ;;  %10059 = vmatprep.subr.bf16.mxu0 %v10213_v0  ;;  %v574_v43 = vlaneseq }
  0xb4   :  { %10092 = vmatprep.subr.bf16.mxu1 %v10213_v0 }
  0xb6   :  { %9542 = vmatmul.mubr.f32.vlgmr.msra.gmra.mrb[6].mxu1 %v10919_v57  ;;  %10061 = vmatpush3.bf16.msra.mxu0 %v10497_v9 }
  0xb7   :  { %10094 = vmatpush3.bf16.msra.mxu1 %v10481_v60  ;;  %9552 = vmatprep.mubr.msk.f32.mxu1 %vm10214_vm4, %v10215_v8  ;;  %v575_v60 = vshrl.u32 %v574_v43, 7 }
  0xb8   :  { %10095 = vmatprep.subr.bf16.mxu1 %v10213_v0  ;;  %10062 = vmatprep.subr.bf16.mxu0 %v10213_v0 }
  0xb9   :  { %9487 = vmatmul.mubr.f32.vlgmr.msra.gmra.mrb[6].mxu0 %v10913_v62 }
  0xba   :  { %10064 = vmatpush3.bf16.msra.mxu0 %v10295_v13  ;;  %9497 = vmatprep.mubr.msk.f32.mxu0 %vm10214_vm4, %v10215_v8 }
  0xbb   :  { %10097 = vmatpush3.bf16.msra.mxu1 %v10497_v9  ;;  %10065 = vmatprep.subr.bf16.mxu0 %v10213_v0  ;;  %v11030_v9 = vld [vmem:[%s11913_s2] ss:$0 sm:$0xff] }
  0xbc   :  { %10098 = vmatprep.subr.bf16.mxu1 %v10213_v0 }
  0xbe   :  { %9553 = vmatmul.mubr.f32.vlgmr.msra.gmra.mrb[6].mxu1 %v10929_v59  ;;  %10067 = vmatpush3.bf16.msra.mxu0 %v10316_v22 }
  0xbf   :  { %10100 = vmatpush3.bf16.msra.mxu1 %v10295_v13  ;;  %9563 = vmatprep.mubr.msk.f32.mxu1 %vm10214_vm4, %v10215_v8 }
  0xc0   :  { %10101 = vmatprep.subr.bf16.mxu1 %v10213_v0  ;;  %10068 = vmatprep.subr.bf16.mxu0 %v10213_v0 }
  0xc1   :  { %9498 = vmatmul.mubr.f32.vlgmr.msra.gmra.mrb[6].mxu0 %v3654_v58 }
  0xc2   :  { %10070 = vmatpush3.bf16.msra.mxu0 %v10567_v5  ;;  %9508 = vmatprep.mubr.msk.f32.mxu0 %vm10214_vm4, %v10215_v8 }
  0xc3   :  { %10103 = vmatpush3.bf16.msra.mxu1 %v10316_v22  ;;  %10071 = vmatprep.subr.bf16.mxu0 %v10213_v0 }
  0xc4   :  { %10104 = vmatprep.subr.bf16.mxu1 %v10213_v0 }
  0xc6   :  { %9564 = vmatmul.mubr.f32.vlgmr.msra.gmra.mrb[6].mxu1 %v4237_v4  ;;  %10073 = vmatpush3.bf16.msra.mxu0 %v10693_v36 }
  0xc7   :  { %10106 = vmatpush3.bf16.msra.mxu1 %v10567_v5  ;;  %9574 = vmatprep.mubr.msk.f32.mxu1 %vm10214_vm4, %v10215_v8 }
  0xc8   :  { %10107 = vmatprep.subr.bf16.mxu1 %v10213_v0  ;;  %10074 = vmatprep.subr.bf16.mxu0 %v10213_v0 }
  0xc9   :  { %9509 = vmatmul.mubr.f32.vlgmr.msra.gmra.mrb[6].mxu0 %v10902_v32 }
  0xca   :  { %10076 = vmatpush3.bf16.msra.mxu0 %v10295_v13  ;;  %9519 = vmatprep.mubr.msk.f32.mxu0 %vm10214_vm4, %v10215_v8 }
  0xcb   :  { %10109 = vmatpush3.bf16.msra.mxu1 %v10693_v36  ;;  %10077 = vmatprep.subr.bf16.mxu0 %v10213_v0 }
  0xcc   :  { %10110 = vmatprep.subr.bf16.mxu1 %v10213_v0 }
  0xce   :  { %9575 = vmatmul.mubr.f32.vlgmr.msra.gmra.mrb[6].mxu1 %v10919_v57  ;;  %10079 = vmatpush3.bf16.msra.mxu0 %v10316_v22 }
  0xcf   :  { %10112 = vmatpush3.bf16.msra.mxu1 %v10295_v13  ;;  %9585 = vmatprep.mubr.msk.f32.mxu1 %vm10214_vm4, %v10215_v8  ;;  %v10216_v13 = vmov 1966171168  }
  0xd0   :  { %10113 = vmatprep.subr.bf16.mxu1 %v10213_v0  ;;  %9588 = vmatprep.subr.mxu0 %v10215_v8  ;;  %v572_v21 = vunpack.c.l.s4 %v10216_v13 }
  0xd1   :  { %9520 = vmatmul.mubr.f32.vlgmr.msra.gmra.mrb[6].mxu0 %v10902_v32 }
  0xd2   :  { %9590 = vmatprep.mubr.msk.f32.mxu0 %vm10214_vm4, %v10215_v8  ;;  %v573_v0 = vunpack.c.0.s8 %v572_v21 }
  0xd3   :  { %10115 = vmatpush3.bf16.msra.mxu1 %v10316_v22 }
  0xd4   :  { %9593 = vmatprep.subr.mxu1 %v10215_v8  ;;  %v11032_v5 = vsub.s32 %v573_v0, %v575_v60 }
  0xd6   :  { %9586 = vmatmul.mubr.f32.vlgmr.msra.gmra.mrb[6].mxu1 %v10919_v57 }
  0xd7   :  { %9595 = vmatprep.mubr.msk.f32.mxu1 %vm10214_vm4, %v10215_v8 }
 0x114   :  { %v565_v22 = vpop.f32.mrb[0].mxu0 }
 0x115   :  { %v11035_v14 = vadd.f32 %v11030_v9, %v565_v22  ;;  %v9125_v17 = vpop.f32.mrb[1].mxu0 }
 0x117   :  { %v570_v25 = vcombine.high %v11035_v14, %v11035_v14  ;;  %v577_v33 = vrot.slane %v11035_v14, %v11032_v5  ;;  %v4718_v40 = vsel %vm4717_vm9, %v11035_v14, 0.0 }
 0x118   :  { %4719 = vadd.xlane.f32.xlu0 %v4718_v40 }
 0x119   :  { %v584_v16 = vrot.slane %v570_v25, %v11032_v5  ;;  %v585_v18 = vcombine.high %v577_v33, %v577_v33  ;;  %v593_v20 = vrot.slane %v577_v33, %v11032_v5  ;;  %v1149_v24 = vpop.f32.mrb[0].mxu1 }
 0x11a   :  { %v11046_v48 = vadd.f32 %v11030_v9, %v1149_v24  ;;  %v9191_v30 = vpop.f32.mrb[1].mxu1 }
 0x11b   :  { %v586_v26 = vcombine.high %v584_v16, %v584_v16  ;;  %v600_v27 = vrot.slane %v584_v16, %v11032_v5  ;;  %v607_v28 = vrot.slane %v585_v18, %v11032_v5  ;;  %v615_v34 = vcombine.high %v593_v20, %v593_v20  ;;  %628 = vst.msk [vmem:[%s11914_s8] sm:$0x1] %vm627_vm10, %v593_v20 }
 0x11c   :  { %v1154_v35 = vcombine.high %v11046_v48, %v11046_v48  ;;  %v1161_v29 = vrot.slane %v11046_v48, %v11032_v5  ;;  %v4722_v55 = vsel %vm4717_vm9, %v11046_v48, 0.0 }
 0x11d   :  { %v614_v19 = vrot.slane %v586_v26, %v11032_v5  ;;  %v616_v36 = vcombine.high %v600_v27, %v600_v27  ;;  %v617_v37 = vcombine.high %v607_v28, %v607_v28  ;;  %629 = vst.msk [vmem:[%s11914_s8 + $0x8] sm:$0x1] %vm627_vm10, %v607_v28  ;;  %630 = vst.msk [vmem:[%s11914_s8 + $0x10] sm:$0x1] %vm627_vm10, %v615_v34  ;;  %4723 = vadd.xlane.f32.xlu0 %v4722_v55 }
 0x11e   :  { %632 = vst.msk [vmem:[%s11914_s8 + $0x20] sm:$0x1] %vm627_vm10, %v600_v27  ;;  %v1168_v3 = vrot.slane %v1154_v35, %v11032_v5  ;;  %v1169_v12 = vcombine.high %v1161_v29, %v1161_v29  ;;  %v1177_v38 = vrot.slane %v1161_v29, %v11032_v5 }
 0x11f   :  { %v618_v44 = vcombine.high %v614_v19, %v614_v19  ;;  %631 = vst.msk [vmem:[%s11914_s8 + $0x18] sm:$0x1] %vm627_vm10, %v617_v37  ;;  %633 = vst.msk [vmem:[%s11914_s8 + $0x28] sm:$0x1] %vm627_vm10, %v614_v19 }
 0x120   :  { %634 = vst.msk [vmem:[%s11914_s8 + $0x30] sm:$0x1] %vm627_vm10, %v616_v36  ;;  %v1170_v63 = vcombine.high %v1168_v3, %v1168_v3  ;;  %v1184_v1 = vrot.slane %v1168_v3, %v11032_v5  ;;  %v1191_v23 = vrot.slane %v1169_v12, %v11032_v5  ;;  %v1199_v31 = vcombine.high %v1177_v38, %v1177_v38 }
 0x121   :  { %1211 = vst.msk [vmem:[%s11914_s8 + $0x1] sm:$0x1] %vm627_vm10, %v1177_v38  ;;  %635 = vst.msk [vmem:[%s11914_s8 + $0x38] sm:$0x1] %vm627_vm10, %v618_v44 }
 0x122   :  { %v1198_v39 = vrot.slane %v1170_v63, %v11032_v5  ;;  %v1200_v41 = vcombine.high %v1184_v1, %v1184_v1  ;;  %v1201_v42 = vcombine.high %v1191_v23, %v1191_v23  ;;  %1212 = vst.msk [vmem:[%s11914_s8 + $0x9] sm:$0x1] %vm627_vm10, %v1191_v23  ;;  %1213 = vst.msk [vmem:[%s11914_s8 + $0x11] sm:$0x1] %vm627_vm10, %v1199_v31 }
 0x123   :  { %1215 = vst.msk [vmem:[%s11914_s8 + $0x21] sm:$0x1] %vm627_vm10, %v1184_v1 }
 0x124   :  { %v1202_v46 = vcombine.high %v1198_v39, %v1198_v39  ;;  %1214 = vst.msk [vmem:[%s11914_s8 + $0x19] sm:$0x1] %vm627_vm10, %v1201_v42  ;;  %1216 = vst.msk [vmem:[%s11914_s8 + $0x29] sm:$0x1] %vm627_vm10, %v1198_v39 }
 0x125   :  { %1217 = vst.msk [vmem:[%s11914_s8 + $0x31] sm:$0x1] %vm627_vm10, %v1200_v41 }
 0x126   :  { %1218 = vst.msk [vmem:[%s11914_s8 + $0x39] sm:$0x1] %vm627_vm10, %v1202_v46 }
 0x144   :  { %v1732_v61 = vpop.f32.mrb[2].mxu0 }
 0x145   :  { %v11127_v47 = vadd.f32 %v11030_v9, %v1732_v61  ;;  %v9257_v15 = vpop.f32.mrb[3].mxu0 }
 0x147   :  { %v1737_v49 = vcombine.high %v11127_v47, %v11127_v47  ;;  %v1744_v50 = vrot.slane %v11127_v47, %v11032_v5  ;;  %v4726_v51 = vsel %vm4717_vm9, %v11127_v47, 0.0 }
 0x148   :  { %4727 = vadd.xlane.f32.xlu1 %v4726_v51 }
 0x149   :  { %v1751_v6 = vrot.slane %v1737_v49, %v11032_v5  ;;  %v1752_v52 = vcombine.high %v1744_v50, %v1744_v50  ;;  %v1760_v45 = vrot.slane %v1744_v50, %v11032_v5  ;;  %v2315_v53 = vpop.f32.mrb[2].mxu1 }
 0x14a   :  { %v11138_v54 = vadd.f32 %v11030_v9, %v2315_v53  ;;  %v9323_v56 = vpop.f32.mrb[3].mxu1 }
 0x14b   :  { %v1753_v32 = vcombine.high %v1751_v6, %v1751_v6  ;;  %v1767_v62 = vrot.slane %v1751_v6, %v11032_v5  ;;  %v1774_v57 = vrot.slane %v1752_v52, %v11032_v5  ;;  %v1782_v58 = vcombine.high %v1760_v45, %v1760_v45  ;;  %1794 = vst.msk [vmem:[%s11914_s8 + $0x2] sm:$0x1] %vm627_vm10, %v1760_v45 }
 0x14c   :  { %v2320_v59 = vcombine.high %v11138_v54, %v11138_v54  ;;  %v2327_v2 = vrot.slane %v11138_v54, %v11032_v5  ;;  %v4730_v4 = vsel %vm4717_vm9, %v11138_v54, 0.0 }
 0x14d   :  { %v1781_v7 = vrot.slane %v1753_v32, %v11032_v5  ;;  %v1783_v10 = vcombine.high %v1767_v62, %v1767_v62  ;;  %v1784_v11 = vcombine.high %v1774_v57, %v1774_v57  ;;  %1795 = vst.msk [vmem:[%s11914_s8 + $0xa] sm:$0x1] %vm627_vm10, %v1774_v57  ;;  %1796 = vst.msk [vmem:[%s11914_s8 + $0x12] sm:$0x1] %vm627_vm10, %v1782_v58  ;;  %4731 = vadd.xlane.f32.xlu1 %v4730_v4 }
 0x14e   :  { %1798 = vst.msk [vmem:[%s11914_s8 + $0x22] sm:$0x1] %vm627_vm10, %v1767_v62  ;;  %v2334_v13 = vrot.slane %v2320_v59, %v11032_v5  ;;  %v2335_v21 = vcombine.high %v2327_v2, %v2327_v2  ;;  %v2343_v43 = vrot.slane %v2327_v2, %v11032_v5 }
 0x14f   :  { %v1785_v0 = vcombine.high %v1781_v7, %v1781_v7  ;;  %1797 = vst.msk [vmem:[%s11914_s8 + $0x1a] sm:$0x1] %vm627_vm10, %v1784_v11  ;;  %1799 = vst.msk [vmem:[%s11914_s8 + $0x2a] sm:$0x1] %vm627_vm10, %v1781_v7 }
 0x150   :  { %1800 = vst.msk [vmem:[%s11914_s8 + $0x32] sm:$0x1] %vm627_vm10, %v1783_v10  ;;  %v2336_v60 = vcombine.high %v2334_v13, %v2334_v13  ;;  %v2350_v22 = vrot.slane %v2334_v13, %v11032_v5  ;;  %v2357_v17 = vrot.slane %v2335_v21, %v11032_v5  ;;  %v2365_v25 = vcombine.high %v2343_v43, %v2343_v43 }
 0x151   :  { %2377 = vst.msk [vmem:[%s11914_s8 + $0x3] sm:$0x1] %vm627_vm10, %v2343_v43  ;;  %1801 = vst.msk [vmem:[%s11914_s8 + $0x3a] sm:$0x1] %vm627_vm10, %v1785_v0 }
 0x152   :  { %v2364_v33 = vrot.slane %v2336_v60, %v11032_v5  ;;  %v2366_v40 = vcombine.high %v2350_v22, %v2350_v22  ;;  %v2367_v16 = vcombine.high %v2357_v17, %v2357_v17  ;;  %2378 = vst.msk [vmem:[%s11914_s8 + $0xb] sm:$0x1] %vm627_vm10, %v2357_v17  ;;  %2379 = vst.msk [vmem:[%s11914_s8 + $0x13] sm:$0x1] %vm627_vm10, %v2365_v25 }
 0x153   :  { %2381 = vst.msk [vmem:[%s11914_s8 + $0x23] sm:$0x1] %vm627_vm10, %v2350_v22 }
 0x154   :  { %v2368_v18 = vcombine.high %v2364_v33, %v2364_v33  ;;  %2380 = vst.msk [vmem:[%s11914_s8 + $0x1b] sm:$0x1] %vm627_vm10, %v2367_v16  ;;  %2382 = vst.msk [vmem:[%s11914_s8 + $0x2b] sm:$0x1] %vm627_vm10, %v2364_v33 }
 0x155   :  { %2383 = vst.msk [vmem:[%s11914_s8 + $0x33] sm:$0x1] %vm627_vm10, %v2366_v40 }
 0x156   :  { %2384 = vst.msk [vmem:[%s11914_s8 + $0x3b] sm:$0x1] %vm627_vm10, %v2368_v18 }
 0x174   :  { %v2898_v20 = vpop.f32.mrb[4].mxu0 }
 0x175   :  { %v11219_v24 = vadd.f32 %v11030_v9, %v2898_v20  ;;  %v9389_v30 = vpop.f32.mrb[5].mxu0 }
 0x177   :  { %v2903_v26 = vcombine.high %v11219_v24, %v11219_v24  ;;  %v2910_v27 = vrot.slane %v11219_v24, %v11032_v5  ;;  %v4734_v28 = vsel %vm4717_vm9, %v11219_v24, 0.0 }
 0x178   :  { %4735 = vadd.xlane.f32.xlu0 %v4734_v28 }
 0x179   :  { %v2917_v34 = vrot.slane %v2903_v26, %v11032_v5  ;;  %v2918_v35 = vcombine.high %v2910_v27, %v2910_v27  ;;  %v2926_v29 = vrot.slane %v2910_v27, %v11032_v5  ;;  %v3481_v55 = vpop.f32.mrb[4].mxu1 }
 0x17a   :  { %v11230_v19 = vadd.f32 %v11030_v9, %v3481_v55  ;;  %v9455_v36 = vpop.f32.mrb[5].mxu1 }
 0x17b   :  { %v2919_v37 = vcombine.high %v2917_v34, %v2917_v34  ;;  %v2933_v3 = vrot.slane %v2917_v34, %v11032_v5  ;;  %v2940_v12 = vrot.slane %v2918_v35, %v11032_v5  ;;  %v2948_v38 = vcombine.high %v2926_v29, %v2926_v29  ;;  %2960 = vst.msk [vmem:[%s11914_s8 + $0x4] sm:$0x1] %vm627_vm10, %v2926_v29 }
 0x17c   :  { %v3486_v44 = vcombine.high %v11230_v19, %v11230_v19  ;;  %v3493_v63 = vrot.slane %v11230_v19, %v11032_v5  ;;  %v4738_v1 = vsel %vm4717_vm9, %v11230_v19, 0.0 }
 0x17d   :  { %v2947_v23 = vrot.slane %v2919_v37, %v11032_v5  ;;  %v2949_v31 = vcombine.high %v2933_v3, %v2933_v3  ;;  %v2950_v39 = vcombine.high %v2940_v12, %v2940_v12  ;;  %2961 = vst.msk [vmem:[%s11914_s8 + $0xc] sm:$0x1] %vm627_vm10, %v2940_v12  ;;  %2962 = vst.msk [vmem:[%s11914_s8 + $0x14] sm:$0x1] %vm627_vm10, %v2948_v38  ;;  %4739 = vadd.xlane.f32.xlu1 %v4738_v1  ;;  %v10217_v37 = vmov 0  }
 0x17e   :  { %2964 = vst.msk [vmem:[%s11914_s8 + $0x24] sm:$0x1] %vm627_vm10, %v2933_v3  ;;  %v3500_v41 = vrot.slane %v3486_v44, %v11032_v5  ;;  %v3501_v42 = vcombine.high %v3493_v63, %v3493_v63  ;;  %v3509_v46 = vrot.slane %v3493_v63, %v11032_v5  ;;  %10209 = vset.pattern.permute.xlu0 %v10217_v37 }
 0x17f   :  { %v2951_v61 = vcombine.high %v2947_v23, %v2947_v23  ;;  %2963 = vst.msk [vmem:[%s11914_s8 + $0x1c] sm:$0x1] %vm627_vm10, %v2950_v39  ;;  %2965 = vst.msk [vmem:[%s11914_s8 + $0x2c] sm:$0x1] %vm627_vm10, %v2947_v23  ;;  %10210 = vset.pattern.permute.xlu1 %v10217_v37 }
 0x180   :  { %2966 = vst.msk [vmem:[%s11914_s8 + $0x34] sm:$0x1] %vm627_vm10, %v2949_v31  ;;  %v3502_v15 = vcombine.high %v3500_v41, %v3500_v41  ;;  %v3516_v49 = vrot.slane %v3500_v41, %v11032_v5  ;;  %v3523_v50 = vrot.slane %v3501_v42, %v11032_v5  ;;  %v3531_v51 = vcombine.high %v3509_v46, %v3509_v46 }
 0x181   :  { %3543 = vst.msk [vmem:[%s11914_s8 + $0x5] sm:$0x1] %vm627_vm10, %v3509_v46  ;;  %2967 = vst.msk [vmem:[%s11914_s8 + $0x3c] sm:$0x1] %vm627_vm10, %v2951_v61 }
 0x182   :  { %v3530_v6 = vrot.slane %v3502_v15, %v11032_v5  ;;  %v3532_v52 = vcombine.high %v3516_v49, %v3516_v49  ;;  %v3533_v45 = vcombine.high %v3523_v50, %v3523_v50  ;;  %3544 = vst.msk [vmem:[%s11914_s8 + $0xd] sm:$0x1] %vm627_vm10, %v3523_v50  ;;  %3545 = vst.msk [vmem:[%s11914_s8 + $0x15] sm:$0x1] %vm627_vm10, %v3531_v51 }
 0x183   :  { %3547 = vst.msk [vmem:[%s11914_s8 + $0x25] sm:$0x1] %vm627_vm10, %v3516_v49 }
 0x184   :  { %v3534_v53 = vcombine.high %v3530_v6, %v3530_v6  ;;  %3546 = vst.msk [vmem:[%s11914_s8 + $0x1d] sm:$0x1] %vm627_vm10, %v3533_v45  ;;  %3548 = vst.msk [vmem:[%s11914_s8 + $0x2d] sm:$0x1] %vm627_vm10, %v3530_v6 }
 0x185   :  { %3549 = vst.msk [vmem:[%s11914_s8 + $0x35] sm:$0x1] %vm627_vm10, %v3532_v52 }
 0x186   :  { %3550 = vst.msk [vmem:[%s11914_s8 + $0x3d] sm:$0x1] %vm627_vm10, %v3534_v53 }
 0x1a4   :  { %v4064_v56 = vpop.f32.mrb[6].mxu0 }
 0x1a5   :  { %v11311_v32 = vadd.f32 %v11030_v9, %v4064_v56  ;;  %v9521_v62 = vpop.f32.mrb[7].mxu0  ;;  %v4720_v3 = vpop.xlane.xlu0 %4719 }
 0x1a7   :  { %v4069_v57 = vcombine.high %v11311_v32, %v11311_v32  ;;  %v4076_v58 = vrot.slane %v11311_v32, %v11032_v5  ;;  %v4742_v59 = vsel %vm4717_vm9, %v11311_v32, 0.0 }
 0x1a8   :  { %4743 = vadd.xlane.f32.xlu0 %v4742_v59 }
 0x1a9   :  { %v4083_v2 = vrot.slane %v4069_v57, %v11032_v5  ;;  %v4084_v4 = vcombine.high %v4076_v58, %v4076_v58  ;;  %v4092_v7 = vrot.slane %v4076_v58, %v11032_v5  ;;  %v4647_v10 = vpop.f32.mrb[6].mxu1 }
 0x1aa   :  { %v11322_v11 = vadd.f32 %v11030_v9, %v4647_v10  ;;  %v9587_v13 = vpop.f32.mrb[7].mxu1  ;;  %v4724_v38 = vpop.xlane.xlu0 %4723 }
 0x1ab   :  { %v4085_v21 = vcombine.high %v4083_v2, %v4083_v2  ;;  %v4099_v43 = vrot.slane %v4083_v2, %v11032_v5  ;;  %v4106_v0 = vrot.slane %v4084_v4, %v11032_v5  ;;  %v4114_v60 = vcombine.high %v4092_v7, %v4092_v7  ;;  %4126 = vst.msk [vmem:[%s11914_s8 + $0x6] sm:$0x1] %vm627_vm10, %v4092_v7 }
 0x1ac   :  { %v4652_v22 = vcombine.high %v11322_v11, %v11322_v11  ;;  %v4659_v17 = vrot.slane %v11322_v11, %v11032_v5  ;;  %v4746_v9 = vsel %vm4717_vm9, %v11322_v11, 0.0  ;;  %v4725_v44 = vadd.f32 %v4724_v38, %v4720_v3 }
 0x1ad   :  { %v4113_v25 = vrot.slane %v4085_v21, %v11032_v5  ;;  %v4115_v33 = vcombine.high %v4099_v43, %v4099_v43  ;;  %v4116_v40 = vcombine.high %v4106_v0, %v4106_v0  ;;  %4127 = vst.msk [vmem:[%s11914_s8 + $0xe] sm:$0x1] %vm627_vm10, %v4106_v0  ;;  %4128 = vst.msk [vmem:[%s11914_s8 + $0x16] sm:$0x1] %vm627_vm10, %v4114_v60  ;;  %4747 = vadd.xlane.f32.xlu1 %v4746_v9  ;;  %v36_v0 = vld [vmem:[%s11916_s6] sm:$0xff] }
 0x1ae   :  { %4130 = vst.msk [vmem:[%s11914_s8 + $0x26] sm:$0x1] %vm627_vm10, %v4099_v43  ;;  %v4666_v16 = vrot.slane %v4652_v22, %v11032_v5  ;;  %v4667_v18 = vcombine.high %v4659_v17, %v4659_v17  ;;  %v4675_v20 = vrot.slane %v4659_v17, %v11032_v5  ;;  %v37_v43 = vld [vmem:[%s11915_s7] sm:$0xff] }
 0x1af   :  { %v4117_v30 = vcombine.high %v4113_v25, %v4113_v25  ;;  %4129 = vst.msk [vmem:[%s11914_s8 + $0x1e] sm:$0x1] %vm627_vm10, %v4116_v40  ;;  %4131 = vst.msk [vmem:[%s11914_s8 + $0x2e] sm:$0x1] %vm627_vm10, %v4113_v25  ;;  %v4804_v60 = vld [vmem:[%s11917_s4] sm:$0xf] }
 0x1b0   :  { %4132 = vst.msk [vmem:[%s11914_s8 + $0x36] sm:$0x1] %vm627_vm10, %v4115_v33  ;;  %v4668_v26 = vcombine.high %v4666_v16, %v4666_v16  ;;  %v4682_v27 = vrot.slane %v4666_v16, %v11032_v5  ;;  %v4689_v28 = vrot.slane %v4667_v18, %v11032_v5  ;;  %v4697_v34 = vcombine.high %v4675_v20, %v4675_v20 }
 0x1b1   :  { %4709 = vst.msk [vmem:[%s11914_s8 + $0x7] sm:$0x1] %vm627_vm10, %v4675_v20  ;;  %4133 = vst.msk [vmem:[%s11914_s8 + $0x3e] sm:$0x1] %vm627_vm10, %v4117_v30  ;;  %v4827_v22 = vsel %vm4825_vm11, %v4804_v60, 0 }
 0x1b2   :  { %v4696_v35 = vrot.slane %v4668_v26, %v11032_v5  ;;  %v4698_v29 = vcombine.high %v4682_v27, %v4682_v27  ;;  %v4699_v55 = vcombine.high %v4689_v28, %v4689_v28  ;;  %4710 = vst.msk [vmem:[%s11914_s8 + $0xf] sm:$0x1] %vm627_vm10, %v4689_v28  ;;  %4711 = vst.msk [vmem:[%s11914_s8 + $0x17] sm:$0x1] %vm627_vm10, %v4697_v34  ;;  %v11460_v17 = vand.u32 4294901760, %v4827_v22 }
 0x1b3   :  { %4713 = vst.msk [vmem:[%s11914_s8 + $0x27] sm:$0x1] %vm627_vm10, %v4682_v27 }
 0x1b4   :  { %v4700_v36 = vcombine.high %v4696_v35, %v4696_v35  ;;  %4712 = vst.msk [vmem:[%s11914_s8 + $0x1f] sm:$0x1] %vm627_vm10, %v4699_v55  ;;  %4714 = vst.msk [vmem:[%s11914_s8 + $0x2f] sm:$0x1] %vm627_vm10, %v4696_v35  ;;  %v11463_v9 = vsub.f32 %v4827_v22, %v11460_v17  ;;  %9589 = vmatpush3.msra.mxu0 %v11460_v17 }
 0x1b5   :  { %4715 = vst.msk [vmem:[%s11914_s8 + $0x37] sm:$0x1] %vm627_vm10, %v4698_v29  ;;  %9598 = vmatprep.subr.mxu0 %v10215_v8 }
 0x1b6   :  { %4716 = vst.msk [vmem:[%s11914_s8 + $0x3f] sm:$0x1] %vm627_vm10, %v4700_v36  ;;  %v11468_v25 = vand.u32 4294901760, %v11463_v9 }
 0x1b8   :  { %v4909_v33 = vsub.f32 %v11463_v9, %v11468_v25 }
 0x1ba   :  { %v11472_v40 = vand.u32 4294901760, %v4909_v33 }
 0x1bc   :  { %9594 = vmatpush3.msra.mxu1 %v11472_v40 }
 0x1bd   :  { %9603 = vmatprep.subr.mxu1 %v10215_v8 }
 0x1d5   :  { %v4728_v12 = vpop.xlane.xlu1 %4727 }
 0x1d6   :  { %v4729_v1 = vadd.f32 %v4728_v12, %v4725_v44 }
 0x1da   :  { %v4732_v63 = vpop.xlane.xlu1 %4731 }
 0x1db   :  { %v4733_v31 = vadd.f32 %v4732_v63, %v4729_v1  ;;  %v4803_v63 = vld [vmem:[%s11918_s3] sm:$0xf] }
 0x1dc   :  { %v5279_v1 = vsel %vm4825_vm11, %v4803_v63, 0 }
 0x205   :  { %v4736_v23 = vpop.xlane.xlu0 %4735 }
 0x206   :  { %v4737_v39 = vadd.f32 %v4736_v23, %v4733_v31 }
 0x20a   :  { %v4740_v41 = vpop.xlane.xlu1 %4739 }
 0x20b   :  { %v4741_v42 = vadd.f32 %v4740_v41, %v4737_v39  ;;  %v11484_v39 = vand.u32 4294901760, %v5279_v1 }
 0x235   :  { %v4744_v46 = vpop.xlane.xlu0 %4743 }
 0x236   :  { %v4745_v61 = vadd.f32 %v4744_v46, %v4741_v42 }
 0x23a   :  { %v4748_v15 = vpop.xlane.xlu1 %4747 }
 0x23b   :  { %v4749_v49 = vadd.f32 %v4748_v15, %v4745_v61 }
 0x23d   :  { %v4751_v50 = vmul.f32 0.03125, %v4749_v49 }
 0x23f   :  { %v11403_v51 = vsub.f32 %v11046_v48, %v4751_v50  ;;  %v11406_v6 = vsub.f32 %v11035_v14, %v4751_v50  ;;  %v11409_v52 = vsub.f32 %v11138_v54, %v4751_v50  ;;  %v11412_v45 = vsub.f32 %v11127_v47, %v4751_v50 }
 0x240   :  { %v11419_v62 = vsub.f32 %v11230_v19, %v4751_v50  ;;  %v11422_v48 = vsub.f32 %v11219_v24, %v4751_v50  ;;  %v11431_v58 = vsub.f32 %v11322_v11, %v4751_v50  ;;  %v11434_v19 = vsub.f32 %v11311_v32, %v4751_v50 }
 0x241   :  { %v4759_v53 = vmul.f32 %v11403_v51, %v11403_v51  ;;  %v4753_v56 = vmul.f32 %v11406_v6, %v11406_v6  ;;  %v4771_v47 = vmul.f32 %v11409_v52, %v11409_v52  ;;  %v4765_v57 = vmul.f32 %v11412_v45, %v11412_v45 }
 0x242   :  { %v4783_v2 = vmul.f32 %v11419_v62, %v11419_v62  ;;  %v4777_v4 = vmul.f32 %v11422_v48, %v11422_v48  ;;  %v4795_v32 = vmul.f32 %v11431_v58, %v11431_v58  ;;  %v4789_v11 = vmul.f32 %v11434_v19, %v11434_v19 }
 0x243   :  { %v4760_v14 = vsel %vm4717_vm9, %v4759_v53, 0.0  ;;  %v4754_v54 = vsel %vm4717_vm9, %v4753_v56, 0.0  ;;  %v4772_v24 = vsel %vm4717_vm9, %v4771_v47, 0.0  ;;  %v4766_v59 = vsel %vm4717_vm9, %v4765_v57, 0.0 }
 0x244   :  { %4761 = vadd.xlane.f32.xlu1 %v4760_v14  ;;  %4755 = vadd.xlane.f32.xlu0 %v4754_v54  ;;  %v4784_v7 = vsel %vm4717_vm9, %v4783_v2, 0.0  ;;  %v4778_v10 = vsel %vm4717_vm9, %v4777_v4, 0.0  ;;  %v4796_v13 = vsel %vm4717_vm9, %v4795_v32, 0.0  ;;  %v4790_v21 = vsel %vm4717_vm9, %v4789_v11, 0.0 }
 0x245   :  { %v11499_v53 = vsub.f32 %v5279_v1, %v11484_v39 }
 0x248   :  { %4773 = vadd.xlane.f32.xlu1 %v4772_v24  ;;  %4767 = vadd.xlane.f32.xlu0 %v4766_v59 }
 0x24c   :  { %4785 = vadd.xlane.f32.xlu1 %v4784_v7  ;;  %4779 = vadd.xlane.f32.xlu0 %v4778_v10 }
 0x250   :  { %4797 = vadd.xlane.f32.xlu1 %v4796_v13  ;;  %4791 = vadd.xlane.f32.xlu0 %v4790_v21 }
 0x261   :  { %4815 = vperm.xlu1 %10210, %v37_v43  }
 0x266   :  { %4809 = vperm.xlu0 %10209, %v36_v0  }
 0x2d1   :  { %v4762_v16 = vpop.xlane.xlu1 %4761  ;;  %v4756_v18 = vpop.xlane.xlu0 %4755 }
 0x2d2   :  { %v4763_v20 = vadd.f32 %v4762_v16, %v4756_v18 }
 0x2d5   :  { %v4774_v30 = vpop.xlane.xlu1 %4773  ;;  %v4768_v26 = vpop.xlane.xlu0 %4767 }
 0x2d6   :  { %v4769_v27 = vadd.f32 %v4768_v26, %v4763_v20 }
 0x2d8   :  { %v4775_v28 = vadd.f32 %v4774_v30, %v4769_v27 }
 0x2d9   :  { %v4786_v34 = vpop.xlane.xlu1 %4785  ;;  %v4780_v35 = vpop.xlane.xlu0 %4779 }
 0x2da   :  { %v4781_v29 = vadd.f32 %v4780_v35, %v4775_v28 }
 0x2dc   :  { %v4787_v55 = vadd.f32 %v4786_v34, %v4781_v29 }
 0x2dd   :  { %v4792_v36 = vpop.xlane.xlu0 %4791  ;;  %v4798_v3 = vpop.xlane.xlu1 %4797 }
 0x2de   :  { %v4793_v37 = vadd.f32 %v4792_v36, %v4787_v55 }
 0x2e0   :  { %v4799_v12 = vadd.f32 %v4798_v3, %v4793_v37 }
 0x2e1   :  { %v11490_v46 = vpop.permute.xlu1 %4815 }
 0x2e2   :  { %v4800_v38 = vmul.f32 0.03125, %v4799_v12 }
 0x2e4   :  { %v4801_v44 = vadd.f32 1e-05, %v4800_v38 }
 0x2e5   :  { %v11482_v31 = vpop.permute.xlu0 %4809 }
 0x2e6   :  { %10211 = vrsqrt.f32 %v4801_v44 }
 0x2f0   :  { %v11480_v23 = vpop.eup %10211 }
 0x2f1   :  { %v4819_v41 = vmul.f32 %v11480_v23, %v11403_v51  ;;  %v4806_v42 = vmul.f32 %v11480_v23, %v11406_v6  ;;  %v7746_v61 = vmul.f32 %v11480_v23, %v11431_v58  ;;  %v7743_v15 = vmul.f32 %v11480_v23, %v11434_v19 }
 0x2f2   :  { %v11513_v19 = vand.u32 4294901760, %v11499_v53  ;;  %v5804_v59 = vmul.f32 %v11480_v23, %v11409_v52  ;;  %v5801_v22 = vmul.f32 %v11480_v23, %v11412_v45  ;;  %v6775_v28 = vmul.f32 %v11480_v23, %v11419_v62 }
 0x2f3   :  { %v4820_v49 = vmul.f32 %v4819_v41, %v11482_v31  ;;  %v4812_v50 = vmul.f32 %v11482_v31, %v4806_v42  ;;  %v7747_v51 = vmul.f32 %v7746_v61, %v11482_v31  ;;  %v7744_v56 = vmul.f32 %v7743_v15, %v11482_v31 }
 0x2f4   :  { %v5361_v7 = vsub.f32 %v11499_v53, %v11513_v19  ;;  %v5805_v32 = vmul.f32 %v5804_v59, %v11482_v31  ;;  %v5802_v45 = vmul.f32 %v5801_v22, %v11482_v31  ;;  %v6776_v62 = vmul.f32 %v6775_v28, %v11482_v31 }
 0x2f5   :  { %v4821_v6 = vadd.f32 %v4820_v49, %v11490_v46  ;;  %v4818_v14 = vadd.f32 %v11490_v46, %v4812_v50  ;;  %v11506_v54 = vadd.f32 %v7747_v51, %v11490_v46  ;;  %v11509_v47 = vadd.f32 %v7744_v56, %v11490_v46 }
 0x2f6   :  { %v11531_v13 = vand.u32 4294901760, %v5361_v7  ;;  %v5806_v43 = vadd.f32 %v5805_v32, %v11490_v46  ;;  %v5803_v30 = vadd.f32 %v5802_v45, %v11490_v46  ;;  %v6777_v36 = vadd.f32 %v6776_v62, %v11490_v46 }
 0x2f7   :  { %v4823_v57 = vsel %vm4717_vm9, %v4821_v6, 0  ;;  %v5276_v24 = vsel %vm4717_vm9, %v4818_v14, 0  ;;  %v6772_v12 = vmul.f32 %v11480_v23, %v11422_v48  ;;  %v7750_v50 = vsel %vm4717_vm9, %v11506_v54, 0 }
 0x2f8   :  { %v4895_v58 = vand.u32 4294901760, %v4823_v57  ;;  %v11524_v10 = vand.u32 4294901760, %v5276_v24  ;;  %v5808_v60 = vsel %vm4717_vm9, %v5806_v43, 0  ;;  %v6257_v27 = vsel %vm4717_vm9, %v5803_v30, 0 }
 0x2f9   :  { %v11553_v16 = vand.u32 4294901760, %v5808_v60  ;;  %v11587_v35 = vand.u32 4294901760, %v6257_v27  ;;  %v6779_v3 = vsel %vm4717_vm9, %v6777_v36, 0  ;;  %v6773_v48 = vmul.f32 %v6772_v12, %v11482_v31 }
 0x2fa   :  { %v4896_v2 = vsub.f32 %v4823_v57, %v4895_v58  ;;  %9596 = vmatmul.mubr.f32.vlgmr.msra.gmra.mrb[8].mxu1 %v4895_v58  ;;  %v5348_v21 = vsub.f32 %v5276_v24, %v11524_v10  ;;  %v11622_v44 = vand.u32 4294901760, %v6779_v3  ;;  %v7818_v56 = vand.u32 4294901760, %v7750_v50 }
 0x2fb   :  { %9604 = vmatpush3.msra.mxu1 %v11460_v17  ;;  %9605 = vmatprep.mubr.msk.f32.mxu1 %vm10214_vm4, %v10215_v8  ;;  %v5877_v20 = vsub.f32 %v5808_v60, %v11553_v16  ;;  %v6326_v55 = vsub.f32 %v6257_v27, %v11587_v35  ;;  %v6774_v23 = vadd.f32 %v6773_v48, %v11490_v46  ;;  %v8199_v57 = vsel %vm4717_vm9, %v11509_v47, 0  ;;  %v11753_v48 = vld [vmem:[%s11919_s5] ss:$0 sm:$0xff] }
 0x2fc   :  { %v4897_v4 = vand.u32 4294901760, %v4896_v2  ;;  %9613 = vmatprep.subr.mxu1 %v10215_v8  ;;  %v5349_v0 = vand.u32 4294901760, %v5348_v21  ;;  %v6848_v1 = vsub.f32 %v6779_v3, %v11622_v44  ;;  %v7819_v14 = vsub.f32 %v7750_v50, %v7818_v56 }
 0x2fd   :  { %v5878_v26 = vand.u32 4294901760, %v5877_v20  ;;  %v6327_v37 = vand.u32 4294901760, %v6326_v55  ;;  %v7228_v41 = vsel %vm4717_vm9, %v6774_v23, 0 }
 0x2fe   :  { %9606 = vmatmul.mubr.f32.vlgmr.msra.gmra.mrb[10].mxu1 %v4897_v4  ;;  %v4898_v11 = vsub.f32 %v4896_v2, %v4897_v4  ;;  %v5350_v33 = vsub.f32 %v5348_v21, %v5349_v0  ;;  %v6849_v31 = vand.u32 4294901760, %v6848_v1  ;;  %v7296_v46 = vand.u32 4294901760, %v7228_v41 }
 0x2ff   :  { %9614 = vmatpush3.msra.mxu1 %v11460_v17  ;;  %9615 = vmatprep.mubr.msk.f32.mxu1 %vm10214_vm4, %v10215_v8  ;;  %v5879_v34 = vsub.f32 %v5877_v20, %v5878_v26  ;;  %v6328_v38 = vsub.f32 %v6326_v55, %v6327_v37  ;;  %v7820_v54 = vand.u32 4294901760, %v7819_v14 }
 0x300   :  { %v4899_v52 = vand.u32 4294901760, %v4898_v11  ;;  %9623 = vmatprep.subr.mxu1 %v10215_v8  ;;  %v5351_v18 = vand.u32 4294901760, %v5350_v33  ;;  %v6850_v42 = vsub.f32 %v6848_v1, %v6849_v31  ;;  %v7297_v15 = vsub.f32 %v7228_v41, %v7296_v46 }
 0x301   :  { %v5880_v29 = vand.u32 4294901760, %v5879_v34  ;;  %v6329_v63 = vand.u32 4294901760, %v6328_v38 }
 0x302   :  { %9591 = vmatmul.mubr.f32.vlgmr.msra.gmra.mrb[8].mxu0 %v4899_v52  ;;  %9616 = vmatmul.mubr.f32.vlgmr.msra.gmra.mrb[12].mxu1 %v4895_v58  ;;  %v6851_v61 = vand.u32 4294901760, %v6850_v42  ;;  %v7298_v49 = vand.u32 4294901760, %v7297_v15 }
 0x303   :  { %9599 = vmatpush3.msra.mxu0 %v11463_v9  ;;  %9600 = vmatprep.mubr.msk.f32.mxu0 %vm10214_vm4, %v10215_v8 }
 0x304   :  { %9624 = vmatpush3.msra.mxu1 %v11531_v13  ;;  %9625 = vmatprep.mubr.msk.f32.mxu1 %vm10214_vm4, %v10215_v8  ;;  %v7299_v51 = vsub.f32 %v7297_v15, %v7298_v49 }
 0x305   :  { %9608 = vmatprep.subr.mxu0 %v10215_v8  ;;  %9633 = vmatprep.subr.mxu1 %v10215_v8 }
 0x306   :  { %9601 = vmatmul.mubr.f32.vlgmr.msra.gmra.mrb[10].mxu0 %v4896_v2  ;;  %9626 = vmatmul.mubr.f32.vlgmr.msra.gmra.mrb[14].mxu1 %v11524_v10  ;;  %v7300_v6 = vand.u32 4294901760, %v7299_v51 }
 0x307   :  { %9609 = vmatpush3.msra.mxu0 %v11468_v25  ;;  %9610 = vmatprep.mubr.msk.f32.mxu0 %vm10214_vm4, %v10215_v8 }
 0x308   :  { %9634 = vmatpush3.msra.mxu1 %v11484_v39  ;;  %9635 = vmatprep.mubr.msk.f32.mxu1 %vm10214_vm4, %v10215_v8 }
 0x309   :  { %9618 = vmatprep.subr.mxu0 %v10215_v8  ;;  %9643 = vmatprep.subr.mxu1 %v10215_v8 }
 0x30a   :  { %9611 = vmatmul.mubr.f32.vlgmr.msra.gmra.mrb[12].mxu0 %v4895_v58  ;;  %9636 = vmatmul.mubr.f32.vlgmr.msra.gmra.mrb[16].mxu1 %v5349_v0  ;;  %v8267_v58 = vand.u32 4294901760, %v8199_v57 }
 0x30b   :  { %9619 = vmatpush3.msra.mxu0 %v11484_v39  ;;  %9620 = vmatprep.mubr.msk.f32.mxu0 %vm10214_vm4, %v10215_v8 }
 0x30c   :  { %9644 = vmatpush3.msra.mxu1 %v11484_v39  ;;  %9645 = vmatprep.mubr.msk.f32.mxu1 %vm10214_vm4, %v10215_v8  ;;  %v8268_v24 = vsub.f32 %v8199_v57, %v8267_v58 }
 0x30d   :  { %9628 = vmatprep.subr.mxu0 %v10215_v8  ;;  %9653 = vmatprep.subr.mxu1 %v10215_v8 }
 0x30e   :  { %9621 = vmatmul.mubr.f32.vlgmr.msra.gmra.mrb[14].mxu0 %v5351_v18  ;;  %9646 = vmatmul.mubr.f32.vlgmr.msra.gmra.mrb[18].mxu1 %v11524_v10 }
 0x30f   :  { %9629 = vmatpush3.msra.mxu0 %v11499_v53  ;;  %9630 = vmatprep.mubr.msk.f32.mxu0 %vm10214_vm4, %v10215_v8 }
 0x310   :  { %9654 = vmatpush3.msra.mxu1 %v11472_v40  ;;  %9655 = vmatprep.mubr.msk.f32.mxu1 %vm10214_vm4, %v10215_v8 }
 0x311   :  { %9638 = vmatprep.subr.mxu0 %v10215_v8  ;;  %9663 = vmatprep.subr.mxu1 %v10215_v8 }
 0x312   :  { %9631 = vmatmul.mubr.f32.vlgmr.msra.gmra.mrb[16].mxu0 %v5348_v21  ;;  %9656 = vmatmul.mubr.f32.vlgmr.msra.gmra.mrb[20].mxu1 %v11553_v16 }
 0x313   :  { %9639 = vmatpush3.msra.mxu0 %v11513_v19  ;;  %9640 = vmatprep.mubr.msk.f32.mxu0 %vm10214_vm4, %v10215_v8 }
 0x314   :  { %9664 = vmatpush3.msra.mxu1 %v11460_v17  ;;  %9665 = vmatprep.mubr.msk.f32.mxu1 %vm10214_vm4, %v10215_v8 }
 0x315   :  { %9648 = vmatprep.subr.mxu0 %v10215_v8  ;;  %9673 = vmatprep.subr.mxu1 %v10215_v8 }
 0x316   :  { %9641 = vmatmul.mubr.f32.vlgmr.msra.gmra.mrb[18].mxu0 %v11524_v10  ;;  %9666 = vmatmul.mubr.f32.vlgmr.msra.gmra.mrb[22].mxu1 %v5878_v26 }
 0x317   :  { %9649 = vmatpush3.msra.mxu0 %v11460_v17  ;;  %9650 = vmatprep.mubr.msk.f32.mxu0 %vm10214_vm4, %v10215_v8 }
 0x318   :  { %9674 = vmatpush3.msra.mxu1 %v11460_v17  ;;  %9675 = vmatprep.mubr.msk.f32.mxu1 %vm10214_vm4, %v10215_v8 }
 0x319   :  { %9658 = vmatprep.subr.mxu0 %v10215_v8  ;;  %9683 = vmatprep.subr.mxu1 %v10215_v8 }
 0x31a   :  { %9651 = vmatmul.mubr.f32.vlgmr.msra.gmra.mrb[20].mxu0 %v5880_v29  ;;  %9676 = vmatmul.mubr.f32.vlgmr.msra.gmra.mrb[24].mxu1 %v11553_v16 }
 0x31b   :  { %9659 = vmatpush3.msra.mxu0 %v11463_v9  ;;  %9660 = vmatprep.mubr.msk.f32.mxu0 %vm10214_vm4, %v10215_v8 }
 0x31c   :  { %9684 = vmatpush3.msra.mxu1 %v11531_v13  ;;  %9685 = vmatprep.mubr.msk.f32.mxu1 %vm10214_vm4, %v10215_v8 }
 0x31d   :  { %9668 = vmatprep.subr.mxu0 %v10215_v8  ;;  %9693 = vmatprep.subr.mxu1 %v10215_v8 }
 0x31e   :  { %9661 = vmatmul.mubr.f32.vlgmr.msra.gmra.mrb[22].mxu0 %v5877_v20  ;;  %9686 = vmatmul.mubr.f32.vlgmr.msra.gmra.mrb[26].mxu1 %v11587_v35 }
 0x31f   :  { %9669 = vmatpush3.msra.mxu0 %v11468_v25  ;;  %9670 = vmatprep.mubr.msk.f32.mxu0 %vm10214_vm4, %v10215_v8 }
 0x320   :  { %9694 = vmatpush3.msra.mxu1 %v11484_v39  ;;  %9695 = vmatprep.mubr.msk.f32.mxu1 %vm10214_vm4, %v10215_v8 }
 0x321   :  { %9678 = vmatprep.subr.mxu0 %v10215_v8  ;;  %9703 = vmatprep.subr.mxu1 %v10215_v8 }
 0x322   :  { %9671 = vmatmul.mubr.f32.vlgmr.msra.gmra.mrb[24].mxu0 %v11553_v16  ;;  %9696 = vmatmul.mubr.f32.vlgmr.msra.gmra.mrb[28].mxu1 %v6327_v37 }
 0x323   :  { %9679 = vmatpush3.msra.mxu0 %v11484_v39  ;;  %9680 = vmatprep.mubr.msk.f32.mxu0 %vm10214_vm4, %v10215_v8 }
 0x324   :  { %9704 = vmatpush3.msra.mxu1 %v11484_v39  ;;  %9705 = vmatprep.mubr.msk.f32.mxu1 %vm10214_vm4, %v10215_v8 }
 0x325   :  { %9688 = vmatprep.subr.mxu0 %v10215_v8  ;;  %9713 = vmatprep.subr.mxu1 %v10215_v8 }
 0x326   :  { %9681 = vmatmul.mubr.f32.vlgmr.msra.gmra.mrb[26].mxu0 %v6329_v63  ;;  %9706 = vmatmul.mubr.f32.vlgmr.msra.gmra.mrb[30].mxu1 %v11587_v35 }
 0x327   :  { %9689 = vmatpush3.msra.mxu0 %v11499_v53  ;;  %9690 = vmatprep.mubr.msk.f32.mxu0 %vm10214_vm4, %v10215_v8 }
 0x328   :  { %9714 = vmatpush3.msra.mxu1 %v11472_v40  ;;  %9715 = vmatprep.mubr.msk.f32.mxu1 %vm10214_vm4, %v10215_v8 }
 0x329   :  { %9698 = vmatprep.subr.mxu0 %v10215_v8  ;;  %9723 = vmatprep.subr.mxu1 %v10215_v8 }
 0x32a   :  { %9691 = vmatmul.mubr.f32.vlgmr.msra.gmra.mrb[28].mxu0 %v6326_v55  ;;  %9716 = vmatmul.mubr.f32.vlgmr.msra.gmra.mrb[32].mxu1 %v11622_v44 }
 0x32b   :  { %9699 = vmatpush3.msra.mxu0 %v11513_v19  ;;  %9700 = vmatprep.mubr.msk.f32.mxu0 %vm10214_vm4, %v10215_v8 }
 0x32c   :  { %9724 = vmatpush3.msra.mxu1 %v11460_v17  ;;  %9725 = vmatprep.mubr.msk.f32.mxu1 %vm10214_vm4, %v10215_v8 }
 0x32d   :  { %9708 = vmatprep.subr.mxu0 %v10215_v8  ;;  %9733 = vmatprep.subr.mxu1 %v10215_v8 }
 0x32e   :  { %9701 = vmatmul.mubr.f32.vlgmr.msra.gmra.mrb[30].mxu0 %v11587_v35  ;;  %9726 = vmatmul.mubr.f32.vlgmr.msra.gmra.mrb[34].mxu1 %v6849_v31 }
 0x32f   :  { %9709 = vmatpush3.msra.mxu0 %v11460_v17  ;;  %9710 = vmatprep.mubr.msk.f32.mxu0 %vm10214_vm4, %v10215_v8 }
 0x330   :  { %9734 = vmatpush3.msra.mxu1 %v11460_v17  ;;  %9735 = vmatprep.mubr.msk.f32.mxu1 %vm10214_vm4, %v10215_v8 }
 0x331   :  { %9718 = vmatprep.subr.mxu0 %v10215_v8  ;;  %9743 = vmatprep.subr.mxu1 %v10215_v8 }
 0x332   :  { %9711 = vmatmul.mubr.f32.vlgmr.msra.gmra.mrb[32].mxu0 %v6851_v61  ;;  %9736 = vmatmul.mubr.f32.vlgmr.msra.gmra.mrb[36].mxu1 %v11622_v44 }
 0x333   :  { %9719 = vmatpush3.msra.mxu0 %v11463_v9  ;;  %9720 = vmatprep.mubr.msk.f32.mxu0 %vm10214_vm4, %v10215_v8 }
 0x334   :  { %9744 = vmatpush3.msra.mxu1 %v11531_v13  ;;  %9745 = vmatprep.mubr.msk.f32.mxu1 %vm10214_vm4, %v10215_v8 }
 0x335   :  { %9728 = vmatprep.subr.mxu0 %v10215_v8  ;;  %9753 = vmatprep.subr.mxu1 %v10215_v8 }
 0x336   :  { %9721 = vmatmul.mubr.f32.vlgmr.msra.gmra.mrb[34].mxu0 %v6848_v1  ;;  %9746 = vmatmul.mubr.f32.vlgmr.msra.gmra.mrb[38].mxu1 %v7296_v46 }
 0x337   :  { %9729 = vmatpush3.msra.mxu0 %v11468_v25  ;;  %9730 = vmatprep.mubr.msk.f32.mxu0 %vm10214_vm4, %v10215_v8 }
 0x338   :  { %9754 = vmatpush3.msra.mxu1 %v11484_v39  ;;  %9755 = vmatprep.mubr.msk.f32.mxu1 %vm10214_vm4, %v10215_v8 }
 0x339   :  { %9738 = vmatprep.subr.mxu0 %v10215_v8  ;;  %9763 = vmatprep.subr.mxu1 %v10215_v8 }
 0x33a   :  { %9731 = vmatmul.mubr.f32.vlgmr.msra.gmra.mrb[36].mxu0 %v11622_v44  ;;  %9756 = vmatmul.mubr.f32.vlgmr.msra.gmra.mrb[40].mxu1 %v7298_v49 }
 0x33b   :  { %9739 = vmatpush3.msra.mxu0 %v11484_v39  ;;  %9740 = vmatprep.mubr.msk.f32.mxu0 %vm10214_vm4, %v10215_v8 }
 0x33c   :  { %9764 = vmatpush3.msra.mxu1 %v11484_v39  ;;  %9765 = vmatprep.mubr.msk.f32.mxu1 %vm10214_vm4, %v10215_v8 }
 0x33d   :  { %9748 = vmatprep.subr.mxu0 %v10215_v8  ;;  %9773 = vmatprep.subr.mxu1 %v10215_v8 }
 0x33e   :  { %9741 = vmatmul.mubr.f32.vlgmr.msra.gmra.mrb[38].mxu0 %v7300_v6  ;;  %9766 = vmatmul.mubr.f32.vlgmr.msra.gmra.mrb[42].mxu1 %v7296_v46 }
 0x33f   :  { %9749 = vmatpush3.msra.mxu0 %v11499_v53  ;;  %9750 = vmatprep.mubr.msk.f32.mxu0 %vm10214_vm4, %v10215_v8 }
 0x340   :  { %9774 = vmatpush3.msra.mxu1 %v11472_v40  ;;  %9775 = vmatprep.mubr.msk.f32.mxu1 %vm10214_vm4, %v10215_v8  ;;  %v7821_v40 = vsub.f32 %v7819_v14, %v7820_v54 }
 0x341   :  { %9758 = vmatprep.subr.mxu0 %v10215_v8  ;;  %9783 = vmatprep.subr.mxu1 %v10215_v8 }
 0x342   :  { %9751 = vmatmul.mubr.f32.vlgmr.msra.gmra.mrb[40].mxu0 %v7297_v15  ;;  %9776 = vmatmul.mubr.f32.vlgmr.msra.gmra.mrb[44].mxu1 %v7818_v56  ;;  %v7822_v47 = vand.u32 4294901760, %v7821_v40 }
 0x343   :  { %9759 = vmatpush3.msra.mxu0 %v11513_v19  ;;  %9760 = vmatprep.mubr.msk.f32.mxu0 %vm10214_vm4, %v10215_v8 }
 0x344   :  { %9784 = vmatpush3.msra.mxu1 %v11460_v17  ;;  %9785 = vmatprep.mubr.msk.f32.mxu1 %vm10214_vm4, %v10215_v8 }
 0x345   :  { %9768 = vmatprep.subr.mxu0 %v10215_v8  ;;  %9793 = vmatprep.subr.mxu1 %v10215_v8 }
 0x346   :  { %9761 = vmatmul.mubr.f32.vlgmr.msra.gmra.mrb[42].mxu0 %v7296_v46  ;;  %9786 = vmatmul.mubr.f32.vlgmr.msra.gmra.mrb[46].mxu1 %v7820_v54 }
 0x347   :  { %9769 = vmatpush3.msra.mxu0 %v11460_v17  ;;  %9770 = vmatprep.mubr.msk.f32.mxu0 %vm10214_vm4, %v10215_v8 }
 0x348   :  { %9794 = vmatpush3.msra.mxu1 %v11460_v17  ;;  %9795 = vmatprep.mubr.msk.f32.mxu1 %vm10214_vm4, %v10215_v8  ;;  %v8269_v17 = vand.u32 4294901760, %v8268_v24 }
 0x349   :  { %9778 = vmatprep.subr.mxu0 %v10215_v8  ;;  %9803 = vmatprep.subr.mxu1 %v10215_v8 }
 0x34a   :  { %9771 = vmatmul.mubr.f32.vlgmr.msra.gmra.mrb[44].mxu0 %v7822_v47  ;;  %9796 = vmatmul.mubr.f32.vlgmr.msra.gmra.mrb[48].mxu1 %v7818_v56 }
 0x34b   :  { %9779 = vmatpush3.msra.mxu0 %v11463_v9  ;;  %9780 = vmatprep.mubr.msk.f32.mxu0 %vm10214_vm4, %v10215_v8  ;;  %v8270_v9 = vsub.f32 %v8268_v24, %v8269_v17 }
 0x34c   :  { %9804 = vmatpush3.msra.mxu1 %v11531_v13  ;;  %9805 = vmatprep.mubr.msk.f32.mxu1 %vm10214_vm4, %v10215_v8 }
 0x34d   :  { %9788 = vmatprep.subr.mxu0 %v10215_v8  ;;  %9813 = vmatprep.subr.mxu1 %v10215_v8 }
 0x34e   :  { %9781 = vmatmul.mubr.f32.vlgmr.msra.gmra.mrb[46].mxu0 %v7819_v14  ;;  %9806 = vmatmul.mubr.f32.vlgmr.msra.gmra.mrb[50].mxu1 %v8267_v58 }
 0x34f   :  { %9789 = vmatpush3.msra.mxu0 %v11468_v25  ;;  %9790 = vmatprep.mubr.msk.f32.mxu0 %vm10214_vm4, %v10215_v8  ;;  %v8271_v25 = vand.u32 4294901760, %v8270_v9 }
 0x350   :  { %9814 = vmatpush3.msra.mxu1 %v11484_v39  ;;  %9815 = vmatprep.mubr.msk.f32.mxu1 %vm10214_vm4, %v10215_v8 }
 0x351   :  { %9798 = vmatprep.subr.mxu0 %v10215_v8  ;;  %9823 = vmatprep.subr.mxu1 %v10215_v8 }
 0x352   :  { %9791 = vmatmul.mubr.f32.vlgmr.msra.gmra.mrb[48].mxu0 %v7818_v56  ;;  %9816 = vmatmul.mubr.f32.vlgmr.msra.gmra.mrb[52].mxu1 %v8269_v17 }
 0x353   :  { %9799 = vmatpush3.msra.mxu0 %v11484_v39  ;;  %9800 = vmatprep.mubr.msk.f32.mxu0 %vm10214_vm4, %v10215_v8 }
 0x354   :  { %9824 = vmatpush3.msra.mxu1 %v11484_v39  ;;  %9825 = vmatprep.mubr.msk.f32.mxu1 %vm10214_vm4, %v10215_v8 }
 0x355   :  { %9808 = vmatprep.subr.mxu0 %v10215_v8 }
 0x356   :  { %9801 = vmatmul.mubr.f32.vlgmr.msra.gmra.mrb[50].mxu0 %v8271_v25  ;;  %9826 = vmatmul.mubr.f32.vlgmr.msra.gmra.mrb[54].mxu1 %v8267_v58 }
 0x357   :  { %9809 = vmatpush3.msra.mxu0 %v11499_v53  ;;  %9810 = vmatprep.mubr.msk.f32.mxu0 %vm10214_vm4, %v10215_v8 }
 0x358   :  { %9818 = vmatprep.subr.mxu0 %v10215_v8 }
 0x35a   :  { %9811 = vmatmul.mubr.f32.vlgmr.msra.gmra.mrb[52].mxu0 %v8268_v24 }
 0x35b   :  { %9819 = vmatpush3.msra.mxu0 %v11513_v19  ;;  %9820 = vmatprep.mubr.msk.f32.mxu0 %vm10214_vm4, %v10215_v8 }
 0x35e   :  { %9821 = vmatmul.mubr.f32.vlgmr.msra.gmra.mrb[54].mxu0 %v8267_v58 }
 0x3cd   :  { %v4977_v39 = vpop.f32.mrb[8].mxu1 }
 0x3ce   :  { %v9597_v59 = vpop.f32.mrb[9].mxu1 }
 0x3d1   :  { %v5125_v2 = vpop.f32.mrb[10].mxu1 }
 0x3d2   :  { %v9607_v4 = vpop.f32.mrb[11].mxu1 }
 0x3d5   :  { %v4901_v7 = vpop.f32.mrb[8].mxu0  ;;  %v5271_v10 = vpop.f32.mrb[12].mxu1 }
 0x3d6   :  { %v4978_v32 = vadd.f32 %v4977_v39, %v4901_v7  ;;  %v9592_v53 = vpop.f32.mrb[9].mxu0  ;;  %v9617_v11 = vpop.f32.mrb[13].mxu1 }
 0x3d9   :  { %v5051_v52 = vpop.f32.mrb[10].mxu0  ;;  %v5429_v13 = vpop.f32.mrb[14].mxu1 }
 0x3da   :  { %v5052_v21 = vadd.f32 %v5051_v52, %v4978_v32  ;;  %v9602_v43 = vpop.f32.mrb[11].mxu0  ;;  %v9627_v0 = vpop.f32.mrb[15].mxu1 }
 0x3dc   :  { %v5126_v60 = vadd.f32 %v5125_v2, %v5052_v21 }
 0x3dd   :  { %v5199_v19 = vpop.f32.mrb[12].mxu0  ;;  %v5577_v22 = vpop.f32.mrb[16].mxu1 }
 0x3de   :  { %v5200_v33 = vadd.f32 %v5199_v19, %v5126_v60  ;;  %v9612_v8 = vpop.f32.mrb[13].mxu0  ;;  %v9637_v16 = vpop.f32.mrb[17].mxu1 }
 0x3e0   :  { %v5272_v45 = vadd.f32 %v5271_v10, %v5200_v33 }
 0x3e1   :  { %v5353_v18 = vpop.f32.mrb[14].mxu0  ;;  %v5723_v20 = vpop.f32.mrb[18].mxu1 }
 0x3e2   :  { %v5354_v30 = vadd.f32 %v5353_v18, %v5272_v45  ;;  %v9622_v26 = vpop.f32.mrb[15].mxu0  ;;  %v9647_v27 = vpop.f32.mrb[19].mxu1 }
 0x3e4   :  { %v5430_v28 = vadd.f32 %v5429_v13, %v5354_v30 }
 0x3e5   :  { %v5503_v34 = vpop.f32.mrb[16].mxu0  ;;  %v5958_v35 = vpop.f32.mrb[20].mxu1 }
 0x3e6   :  { %v5504_v62 = vadd.f32 %v5503_v34, %v5430_v28  ;;  %v9632_v29 = vpop.f32.mrb[17].mxu0  ;;  %v9657_v55 = vpop.f32.mrb[21].mxu1 }
 0x3e8   :  { %v5578_v36 = vadd.f32 %v5577_v22, %v5504_v62 }
 0x3e9   :  { %v5651_v37 = vpop.f32.mrb[18].mxu0  ;;  %v6106_v3 = vpop.f32.mrb[22].mxu1 }
 0x3ea   :  { %v5652_v12 = vadd.f32 %v5651_v37, %v5578_v36  ;;  %v9642_v38 = vpop.f32.mrb[19].mxu0  ;;  %v9667_v44 = vpop.f32.mrb[23].mxu1 }
 0x3ec   :  { %v5724_v63 = vadd.f32 %v5723_v20, %v5652_v12 }
 0x3ed   :  { %v5882_v1 = vpop.f32.mrb[20].mxu0  ;;  %v6252_v23 = vpop.f32.mrb[24].mxu1 }
 0x3ee   :  { %v5733_v31 = vadd.f32 %v11753_v48, %v5724_v63  ;;  %v5959_v41 = vadd.f32 %v5958_v35, %v5882_v1  ;;  %v9652_v42 = vpop.f32.mrb[21].mxu0  ;;  %v9677_v46 = vpop.f32.mrb[25].mxu1 }
 0x3f0   :  { %v5735_v61 = vcombine.high %v5733_v31, %v5733_v31  ;;  %v5742_v15 = vrot.slane %v5733_v31, %v11032_v5 }
 0x3f1   :  { %v6032_v49 = vpop.f32.mrb[22].mxu0  ;;  %v6407_v50 = vpop.f32.mrb[26].mxu1 }
 0x3f2   :  { %v5749_v51 = vrot.slane %v5735_v61, %v11032_v5  ;;  %v5750_v56 = vcombine.high %v5742_v15, %v5742_v15  ;;  %v5758_v6 = vrot.slane %v5742_v15, %v11032_v5  ;;  %v6033_v14 = vadd.f32 %v6032_v49, %v5959_v41  ;;  %v9662_v54 = vpop.f32.mrb[23].mxu0  ;;  %v9687_v57 = vpop.f32.mrb[27].mxu1 }
 0x3f4   :  { %v5751_v40 = vcombine.high %v5749_v51, %v5749_v51  ;;  %v5765_v58 = vrot.slane %v5749_v51, %v11032_v5  ;;  %v5772_v47 = vrot.slane %v5750_v56, %v11032_v5  ;;  %v5780_v24 = vcombine.high %v5758_v6, %v5758_v6  ;;  %5793 = vst.msk [vmem:[%s11920_s9] sm:$0x1] %vm5792_vm12, %v5758_v6 }
 0x3f5   :  { %v6107_v17 = vadd.f32 %v6106_v3, %v6033_v14  ;;  %v6180_v9 = vpop.f32.mrb[24].mxu0  ;;  %v6555_v25 = vpop.f32.mrb[28].mxu1 }
 0x3f6   :  { %v5779_v39 = vrot.slane %v5751_v40, %v11032_v5  ;;  %v5781_v59 = vcombine.high %v5765_v58, %v5765_v58  ;;  %v5782_v2 = vcombine.high %v5772_v47, %v5772_v47  ;;  %5794 = vst.msk [vmem:[%s11920_s9 + $0x4] sm:$0x1] %vm5792_vm12, %v5772_v47  ;;  %5795 = vst.msk [vmem:[%s11920_s9 + $0x8] sm:$0x1] %vm5792_vm12, %v5780_v24  ;;  %v9672_v4 = vpop.f32.mrb[25].mxu0  ;;  %v9697_v7 = vpop.f32.mrb[29].mxu1 }
 0x3f7   :  { %5797 = vst.msk [vmem:[%s11920_s9 + $0x10] sm:$0x1] %vm5792_vm12, %v5765_v58  ;;  %v6181_v10 = vadd.f32 %v6180_v9, %v6107_v17 }
 0x3f8   :  { %v5783_v32 = vcombine.high %v5779_v39, %v5779_v39  ;;  %5796 = vst.msk [vmem:[%s11920_s9 + $0xc] sm:$0x1] %vm5792_vm12, %v5782_v2  ;;  %5798 = vst.msk [vmem:[%s11920_s9 + $0x14] sm:$0x1] %vm5792_vm12, %v5779_v39 }
 0x3f9   :  { %5799 = vst.msk [vmem:[%s11920_s9 + $0x18] sm:$0x1] %vm5792_vm12, %v5781_v59  ;;  %v6253_v53 = vadd.f32 %v6252_v23, %v6181_v10  ;;  %v6331_v11 = vpop.f32.mrb[26].mxu0  ;;  %v6701_v52 = vpop.f32.mrb[30].mxu1 }
 0x3fa   :  { %5800 = vst.msk [vmem:[%s11920_s9 + $0x1c] sm:$0x1] %vm5792_vm12, %v5783_v32  ;;  %v9682_v13 = vpop.f32.mrb[27].mxu0  ;;  %v9707_v21 = vpop.f32.mrb[31].mxu1 }
 0x3fb   :  { %v6332_v43 = vadd.f32 %v6331_v11, %v6253_v53 }
 0x3fd   :  { %v6408_v0 = vadd.f32 %v6407_v50, %v6332_v43  ;;  %v6481_v60 = vpop.f32.mrb[28].mxu0  ;;  %v6929_v19 = vpop.f32.mrb[32].mxu1 }
 0x3fe   :  { %v9692_v22 = vpop.f32.mrb[29].mxu0  ;;  %v9717_v33 = vpop.f32.mrb[33].mxu1 }
 0x3ff   :  { %v6482_v8 = vadd.f32 %v6481_v60, %v6408_v0 }
 0x401   :  { %v6556_v16 = vadd.f32 %v6555_v25, %v6482_v8  ;;  %v6629_v45 = vpop.f32.mrb[30].mxu0  ;;  %v7077_v18 = vpop.f32.mrb[34].mxu1 }
 0x402   :  { %v9702_v20 = vpop.f32.mrb[31].mxu0  ;;  %v9727_v30 = vpop.f32.mrb[35].mxu1 }
 0x403   :  { %v6630_v26 = vadd.f32 %v6629_v45, %v6556_v16 }
 0x405   :  { %v6702_v27 = vadd.f32 %v6701_v52, %v6630_v26  ;;  %v6853_v28 = vpop.f32.mrb[32].mxu0  ;;  %v7223_v34 = vpop.f32.mrb[36].mxu1 }
 0x406   :  { %v6930_v35 = vadd.f32 %v6929_v19, %v6853_v28  ;;  %v9712_v62 = vpop.f32.mrb[33].mxu0  ;;  %v9737_v29 = vpop.f32.mrb[37].mxu1 }
 0x407   :  { %v6705_v55 = vadd.f32 %v11753_v48, %v6702_v27 }
 0x409   :  { %v6707_v36 = vcombine.high %v6705_v55, %v6705_v55  ;;  %v6714_v37 = vrot.slane %v6705_v55, %v11032_v5  ;;  %v7003_v3 = vpop.f32.mrb[34].mxu0  ;;  %v7378_v12 = vpop.f32.mrb[38].mxu1 }
 0x40a   :  { %v7004_v38 = vadd.f32 %v7003_v3, %v6930_v35  ;;  %v9722_v44 = vpop.f32.mrb[35].mxu0  ;;  %v9747_v63 = vpop.f32.mrb[39].mxu1 }
 0x40b   :  { %v6721_v1 = vrot.slane %v6707_v36, %v11032_v5  ;;  %v6722_v23 = vcombine.high %v6714_v37, %v6714_v37  ;;  %v6730_v31 = vrot.slane %v6714_v37, %v11032_v5 }
 0x40c   :  { %v7078_v41 = vadd.f32 %v7077_v18, %v7004_v38 }
 0x40d   :  { %v6723_v42 = vcombine.high %v6721_v1, %v6721_v1  ;;  %v6737_v46 = vrot.slane %v6721_v1, %v11032_v5  ;;  %v6744_v61 = vrot.slane %v6722_v23, %v11032_v5  ;;  %v6752_v15 = vcombine.high %v6730_v31, %v6730_v31  ;;  %6764 = vst.msk [vmem:[%s11920_s9 + $0x1] sm:$0x1] %vm5792_vm12, %v6730_v31  ;;  %v7151_v49 = vpop.f32.mrb[36].mxu0  ;;  %v7526_v50 = vpop.f32.mrb[40].mxu1 }
 0x40e   :  { %v7152_v51 = vadd.f32 %v7151_v49, %v7078_v41  ;;  %v9732_v56 = vpop.f32.mrb[37].mxu0  ;;  %v9757_v6 = vpop.f32.mrb[41].mxu1 }
 0x40f   :  { %v6751_v14 = vrot.slane %v6723_v42, %v11032_v5  ;;  %v6753_v54 = vcombine.high %v6737_v46, %v6737_v46  ;;  %v6754_v57 = vcombine.high %v6744_v61, %v6744_v61  ;;  %6765 = vst.msk [vmem:[%s11920_s9 + $0x5] sm:$0x1] %vm5792_vm12, %v6744_v61  ;;  %6766 = vst.msk [vmem:[%s11920_s9 + $0x9] sm:$0x1] %vm5792_vm12, %v6752_v15 }
 0x410   :  { %6768 = vst.msk [vmem:[%s11920_s9 + $0x11] sm:$0x1] %vm5792_vm12, %v6737_v46  ;;  %v7224_v40 = vadd.f32 %v7223_v34, %v7152_v51 }
 0x411   :  { %v6755_v58 = vcombine.high %v6751_v14, %v6751_v14  ;;  %6767 = vst.msk [vmem:[%s11920_s9 + $0xd] sm:$0x1] %vm5792_vm12, %v6754_v57  ;;  %6769 = vst.msk [vmem:[%s11920_s9 + $0x15] sm:$0x1] %vm5792_vm12, %v6751_v14  ;;  %v7302_v47 = vpop.f32.mrb[38].mxu0  ;;  %v7672_v24 = vpop.f32.mrb[42].mxu1 }
 0x412   :  { %6770 = vst.msk [vmem:[%s11920_s9 + $0x19] sm:$0x1] %vm5792_vm12, %v6753_v54  ;;  %v7303_v17 = vadd.f32 %v7302_v47, %v7224_v40  ;;  %v9742_v9 = vpop.f32.mrb[39].mxu0  ;;  %v9767_v25 = vpop.f32.mrb[43].mxu1 }
 0x413   :  { %6771 = vst.msk [vmem:[%s11920_s9 + $0x1d] sm:$0x1] %vm5792_vm12, %v6755_v58 }
 0x414   :  { %v7379_v39 = vadd.f32 %v7378_v12, %v7303_v17 }
 0x415   :  { %v7452_v59 = vpop.f32.mrb[40].mxu0  ;;  %v7900_v2 = vpop.f32.mrb[44].mxu1 }
 0x416   :  { %v7453_v4 = vadd.f32 %v7452_v59, %v7379_v39  ;;  %v9752_v7 = vpop.f32.mrb[41].mxu0  ;;  %v9777_v10 = vpop.f32.mrb[45].mxu1 }
 0x418   :  { %v7527_v32 = vadd.f32 %v7526_v50, %v7453_v4 }
 0x419   :  { %v7600_v53 = vpop.f32.mrb[42].mxu0  ;;  %v8048_v11 = vpop.f32.mrb[46].mxu1 }
 0x41a   :  { %v7601_v52 = vadd.f32 %v7600_v53, %v7527_v32  ;;  %v9762_v13 = vpop.f32.mrb[43].mxu0  ;;  %v9787_v21 = vpop.f32.mrb[47].mxu1 }
 0x41c   :  { %v7673_v43 = vadd.f32 %v7672_v24, %v7601_v52 }
 0x41d   :  { %v7824_v0 = vpop.f32.mrb[44].mxu0  ;;  %v8194_v60 = vpop.f32.mrb[48].mxu1 }
 0x41e   :  { %v7676_v19 = vadd.f32 %v11753_v48, %v7673_v43  ;;  %v7901_v22 = vadd.f32 %v7900_v2, %v7824_v0  ;;  %v9772_v33 = vpop.f32.mrb[45].mxu0  ;;  %v9797_v8 = vpop.f32.mrb[49].mxu1 }
 0x420   :  { %v7678_v16 = vcombine.high %v7676_v19, %v7676_v19  ;;  %v7685_v45 = vrot.slane %v7676_v19, %v11032_v5 }
 0x421   :  { %v7974_v18 = vpop.f32.mrb[46].mxu0  ;;  %v8349_v20 = vpop.f32.mrb[50].mxu1 }
 0x422   :  { %v7692_v30 = vrot.slane %v7678_v16, %v11032_v5  ;;  %v7693_v26 = vcombine.high %v7685_v45, %v7685_v45  ;;  %v7701_v27 = vrot.slane %v7685_v45, %v11032_v5  ;;  %v7975_v28 = vadd.f32 %v7974_v18, %v7901_v22  ;;  %v9782_v34 = vpop.f32.mrb[47].mxu0  ;;  %v9807_v35 = vpop.f32.mrb[51].mxu1 }
 0x424   :  { %v7694_v62 = vcombine.high %v7692_v30, %v7692_v30  ;;  %v7708_v29 = vrot.slane %v7692_v30, %v11032_v5  ;;  %v7715_v55 = vrot.slane %v7693_v26, %v11032_v5  ;;  %v7723_v36 = vcombine.high %v7701_v27, %v7701_v27  ;;  %7735 = vst.msk [vmem:[%s11920_s9 + $0x2] sm:$0x1] %vm5792_vm12, %v7701_v27 }
 0x425   :  { %v8049_v37 = vadd.f32 %v8048_v11, %v7975_v28  ;;  %v8122_v3 = vpop.f32.mrb[48].mxu0  ;;  %v8497_v12 = vpop.f32.mrb[52].mxu1 }
 0x426   :  { %v7722_v38 = vrot.slane %v7694_v62, %v11032_v5  ;;  %v7724_v44 = vcombine.high %v7708_v29, %v7708_v29  ;;  %v7725_v63 = vcombine.high %v7715_v55, %v7715_v55  ;;  %7736 = vst.msk [vmem:[%s11920_s9 + $0x6] sm:$0x1] %vm5792_vm12, %v7715_v55  ;;  %7737 = vst.msk [vmem:[%s11920_s9 + $0xa] sm:$0x1] %vm5792_vm12, %v7723_v36  ;;  %v9792_v1 = vpop.f32.mrb[49].mxu0  ;;  %v9817_v23 = vpop.f32.mrb[53].mxu1 }
 0x427   :  { %7739 = vst.msk [vmem:[%s11920_s9 + $0x12] sm:$0x1] %vm5792_vm12, %v7708_v29  ;;  %v8123_v31 = vadd.f32 %v8122_v3, %v8049_v37 }
 0x428   :  { %v7726_v41 = vcombine.high %v7722_v38, %v7722_v38  ;;  %7738 = vst.msk [vmem:[%s11920_s9 + $0xe] sm:$0x1] %vm5792_vm12, %v7725_v63  ;;  %7740 = vst.msk [vmem:[%s11920_s9 + $0x16] sm:$0x1] %vm5792_vm12, %v7722_v38 }
 0x429   :  { %7741 = vst.msk [vmem:[%s11920_s9 + $0x1a] sm:$0x1] %vm5792_vm12, %v7724_v44  ;;  %v8195_v42 = vadd.f32 %v8194_v60, %v8123_v31  ;;  %v8273_v46 = vpop.f32.mrb[50].mxu0  ;;  %v8643_v61 = vpop.f32.mrb[54].mxu1 }
 0x42a   :  { %7742 = vst.msk [vmem:[%s11920_s9 + $0x1e] sm:$0x1] %vm5792_vm12, %v7726_v41  ;;  %v9802_v15 = vpop.f32.mrb[51].mxu0  ;;  %v9827_v49 = vpop.f32.mrb[55].mxu1 }
 0x42b   :  { %v8274_v50 = vadd.f32 %v8273_v46, %v8195_v42 }
 0x42d   :  { %v8350_v51 = vadd.f32 %v8349_v20, %v8274_v50  ;;  %v8423_v56 = vpop.f32.mrb[52].mxu0 }
 0x42e   :  { %v9812_v6 = vpop.f32.mrb[53].mxu0 }
 0x42f   :  { %v8424_v14 = vadd.f32 %v8423_v56, %v8350_v51 }
 0x431   :  { %v8498_v54 = vadd.f32 %v8497_v12, %v8424_v14  ;;  %v8571_v57 = vpop.f32.mrb[54].mxu0 }
 0x432   :  { %v9822_v40 = vpop.f32.mrb[55].mxu0 }
 0x433   :  { %v8572_v58 = vadd.f32 %v8571_v57, %v8498_v54 }
 0x435   :  { %v8644_v47 = vadd.f32 %v8643_v61, %v8572_v58 }
 0x437   :  { %v8647_v24 = vadd.f32 %v11753_v48, %v8644_v47 }
 0x439   :  { %v8649_v17 = vcombine.high %v8647_v24, %v8647_v24  ;;  %v8656_v9 = vrot.slane %v8647_v24, %v11032_v5 }
 0x43b   :  { %v8663_v25 = vrot.slane %v8649_v17, %v11032_v5  ;;  %v8664_v39 = vcombine.high %v8656_v9, %v8656_v9  ;;  %v8672_v59 = vrot.slane %v8656_v9, %v11032_v5 }
 0x43d   :  { %v8665_v2 = vcombine.high %v8663_v25, %v8663_v25  ;;  %v8679_v4 = vrot.slane %v8663_v25, %v11032_v5  ;;  %v8686_v7 = vrot.slane %v8664_v39, %v11032_v5  ;;  %v8694_v10 = vcombine.high %v8672_v59, %v8672_v59  ;;  %8706 = vst.msk [vmem:[%s11920_s9 + $0x3] sm:$0x1] %vm5792_vm12, %v8672_v59 }
 0x43f   :  { %v8693_v48 = vrot.slane %v8665_v2, %v11032_v5  ;;  %v8695_v32 = vcombine.high %v8679_v4, %v8679_v4  ;;  %v8696_v53 = vcombine.high %v8686_v7, %v8686_v7  ;;  %8707 = vst.msk [vmem:[%s11920_s9 + $0x7] sm:$0x1] %vm5792_vm12, %v8686_v7  ;;  %8708 = vst.msk [vmem:[%s11920_s9 + $0xb] sm:$0x1] %vm5792_vm12, %v8694_v10 }
 0x440   :  { %8710 = vst.msk [vmem:[%s11920_s9 + $0x13] sm:$0x1] %vm5792_vm12, %v8679_v4 }
 0x441   :  { %v8697_v11 = vcombine.high %v8693_v48, %v8693_v48  ;;  %8709 = vst.msk [vmem:[%s11920_s9 + $0xf] sm:$0x1] %vm5792_vm12, %v8696_v53  ;;  %8711 = vst.msk [vmem:[%s11920_s9 + $0x17] sm:$0x1] %vm5792_vm12, %v8693_v48 }
 0x442   :  { %8712 = vst.msk [vmem:[%s11920_s9 + $0x1b] sm:$0x1] %vm5792_vm12, %v8695_v32 }
 0x443   :  { %8713 = vst.msk [vmem:[%s11920_s9 + $0x1f] sm:$0x1] %vm5792_vm12, %v8697_v11 }

</bundles_post_ra>
